<compile_context>
chip_gen: v7x
topology: tpu7x:2x2x1
jax: 0.10.0
libtpu: 0.0.40
codegen_flags: <defaults>
</compile_context>

<pallas_src>
import math
from functools import partial

import jax
import jax.numpy as jnp
from jax import lax
from jax.experimental import pallas as pl
from jax.experimental.pallas import tpu as pltpu


# -----------------------------------------------------------------------------
# Model configuration (module defaults shrunk to small, lane-aligned sizes)
# -----------------------------------------------------------------------------
D_MODEL = 128          # module default 528; shrunk & 128-aligned for the example
FEATURE_DIM = 256      # module default 1024
HEAD_NUM = 8           # module default 6; chosen so D_MODEL % HEAD_NUM == 0
EXPAND = 2
NUM_ENC = 2
IN_CHANNELS = 108
C256 = 256
C320 = 320
C320_PAD = 384         # 320-channel branch padded to a lane multiple (zeros)
LN_EPS = 1e-5


def _round_up(x, m):
    return (x + m - 1) // m * m


def _pad2(a, rows, cols):
    r, c = a.shape
    if (r, c) == (rows, cols):
        return a
    return jnp.pad(a, ((0, rows - r), (0, cols - c)))


# =============================================================================
# Pallas kernels
# =============================================================================

def _matmul_kernel(x_ref, w_ref, b_ref, o_ref, acc_ref, *, act):
    """Tiled y = act(x @ w + b). bf16 operands, f32 accumulator in VMEM."""
    @pl.when(pl.program_id(2) == 0)
    def _init():
        acc_ref[...] = jnp.zeros_like(acc_ref)

    acc_ref[...] += jnp.dot(x_ref[...], w_ref[...],
                            preferred_element_type=jnp.float32)

    @pl.when(pl.program_id(2) == pl.num_programs(2) - 1)
    def _finalize():
        y = acc_ref[...] + b_ref[...]
        if act == "gelu":
            y = jax.nn.gelu(y, approximate=True)
        o_ref[...] = y.astype(o_ref.dtype)


def pallas_linear(x, w, b, act=None, out_dtype=None):
    """y = act(x @ w + b).  x:[M,K] bf16, w:[K,N] bf16, b:[N] f32."""
    M, K = x.shape
    N = w.shape[1]
    out_dtype = out_dtype if out_dtype is not None else x.dtype
    tm = min(256, _round_up(M, 8))
    tn = min(512, _round_up(N, 128))
    tk = min(512, _round_up(K, 128))
    Mp, Kp, Np = _round_up(M, tm), _round_up(K, tk), _round_up(N, tn)
    xp = _pad2(x, Mp, Kp)
    wp = _pad2(w, Kp, Np)
    bp = _pad2(b.reshape(1, N).astype(jnp.float32), 1, Np)
    out = pl.pallas_call(
        partial(_matmul_kernel, act=act),
        out_shape=jax.ShapeDtypeStruct((Mp, Np), out_dtype),
        grid_spec=pltpu.PrefetchScalarGridSpec(
            num_scalar_prefetch=0,
            grid=(Mp // tm, Np // tn, Kp // tk),
            in_specs=[pl.BlockSpec((tm, tk), lambda i, j, k: (i, k)),
                      pl.BlockSpec((tk, tn), lambda i, j, k: (k, j)),
                      pl.BlockSpec((1, tn), lambda i, j, k: (0, j))],
            out_specs=pl.BlockSpec((tm, tn), lambda i, j, k: (i, j)),
            scratch_shapes=[pltpu.VMEM((tm, tn), jnp.float32)]),
        compiler_params=pltpu.CompilerParams(
            dimension_semantics=("parallel", "parallel", "arbitrary"),
            vmem_limit_bytes=32 * 1024 * 1024),
    )(xp, wp, bp)
    if (Mp, Np) != (M, N):
        out = out[:M, :N]
    return out


def _proj_res_ln_kernel(ctx_ref, wo_ref, bo_ref, res_ref, g_ref, bln_ref, o_ref,
                        *, eps):
    """Fused: y = LayerNorm(res + ctx @ Wo + bo). Residual/LN never leave VMEM."""
    y = jnp.dot(ctx_ref[...], wo_ref[...],
                preferred_element_type=jnp.float32) + bo_ref[...]
    y = y + res_ref[...].astype(jnp.float32)
    mu = jnp.mean(y, axis=-1, keepdims=True)
    var = jnp.mean((y - mu) ** 2, axis=-1, keepdims=True)
    y = (y - mu) * lax.rsqrt(var + eps) * g_ref[...] + bln_ref[...]
    o_ref[...] = y.astype(o_ref.dtype)


def pallas_proj_res_ln(ctx, wo, bo, res, gamma, beta, eps=LN_EPS):
    M, D = ctx.shape
    N = wo.shape[1]
    tm = min(256, _round_up(M, 8))
    Mp = _round_up(M, tm)
    ctxp = _pad2(ctx, Mp, D)
    resp = _pad2(res, Mp, N)
    out = pl.pallas_call(
        partial(_proj_res_ln_kernel, eps=eps),
        out_shape=jax.ShapeDtypeStruct((Mp, N), res.dtype),
        grid=(Mp // tm,),
        in_specs=[pl.BlockSpec((tm, D), lambda i: (i, 0)),
                  pl.BlockSpec((D, N), lambda i: (0, 0)),
                  pl.BlockSpec((1, N), lambda i: (0, 0)),
                  pl.BlockSpec((tm, N), lambda i: (i, 0)),
                  pl.BlockSpec((1, N), lambda i: (0, 0)),
                  pl.BlockSpec((1, N), lambda i: (0, 0))],
        out_specs=pl.BlockSpec((tm, N), lambda i: (i, 0)),
        compiler_params=pltpu.CompilerParams(
            dimension_semantics=("parallel",)),
    )(ctxp, wo, bo.reshape(1, N), resp, gamma.reshape(1, N), beta.reshape(1, N))
    return out[:M] if Mp != M else out


def _ffn_res_ln_kernel(x_ref, w1_ref, b1_ref, w2_ref, b2_ref, g_ref, bln_ref,
                       o_ref, *, eps):
    """Fused FFN block: y = LayerNorm(x + gelu(x@W1+b1)@W2 + b2).
    Hidden activation + residual + LN stay in VMEM."""
    h = jnp.dot(x_ref[...], w1_ref[...],
                preferred_element_type=jnp.float32) + b1_ref[...]
    h = jax.nn.gelu(h, approximate=True)
    y = jnp.dot(h.astype(w2_ref.dtype), w2_ref[...],
                preferred_element_type=jnp.float32) + b2_ref[...]
    y = y + x_ref[...].astype(jnp.float32)
    mu = jnp.mean(y, axis=-1, keepdims=True)
    var = jnp.mean((y - mu) ** 2, axis=-1, keepdims=True)
    y = (y - mu) * lax.rsqrt(var + eps) * g_ref[...] + bln_ref[...]
    o_ref[...] = y.astype(o_ref.dtype)


def pallas_ffn_res_ln(x, w1, b1, w2, b2, gamma, beta, eps=LN_EPS):
    M, D = x.shape
    H = w1.shape[1]
    tm = min(256, _round_up(M, 8))
    Mp = _round_up(M, tm)
    xp = _pad2(x, Mp, D)
    out = pl.pallas_call(
        partial(_ffn_res_ln_kernel, eps=eps),
        out_shape=jax.ShapeDtypeStruct((Mp, D), x.dtype),
        grid=(Mp // tm,),
        in_specs=[pl.BlockSpec((tm, D), lambda i: (i, 0)),
                  pl.BlockSpec((D, H), lambda i: (0, 0)),
                  pl.BlockSpec((1, H), lambda i: (0, 0)),
                  pl.BlockSpec((H, D), lambda i: (0, 0)),
                  pl.BlockSpec((1, D), lambda i: (0, 0)),
                  pl.BlockSpec((1, D), lambda i: (0, 0)),
                  pl.BlockSpec((1, D), lambda i: (0, 0))],
        out_specs=pl.BlockSpec((tm, D), lambda i: (i, 0)),
        compiler_params=pltpu.CompilerParams(
            dimension_semantics=("parallel",)),
    )(xp, w1, b1.reshape(1, H), w2, b2.reshape(1, D),
      gamma.reshape(1, D), beta.reshape(1, D))
    return out[:M] if Mp != M else out


def _conv3_kernel(*refs, has_skip):
    """k=3 stride-2 conv as three shifted matmuls accumulated in-kernel, + GELU.
    Optionally fuses the branch residual add (y = skip + gelu(conv))."""
    if has_skip:
        xm1_ref, x0_ref, xp1_ref, w0_ref, w1_ref, w2_ref, b_ref, skip_ref, o_ref = refs
    else:
        xm1_ref, x0_ref, xp1_ref, w0_ref, w1_ref, w2_ref, b_ref, o_ref = refs
    acc = jnp.dot(xm1_ref[...], w0_ref[...], preferred_element_type=jnp.float32)
    acc += jnp.dot(x0_ref[...], w1_ref[...], preferred_element_type=jnp.float32)
    acc += jnp.dot(xp1_ref[...], w2_ref[...], preferred_element_type=jnp.float32)
    acc += b_ref[...]
    y = jax.nn.gelu(acc, approximate=True)
    if has_skip:
        y = y + skip_ref[...].astype(jnp.float32)
    o_ref[...] = y.astype(o_ref.dtype)


def pallas_conv3(xm1, x0, xp1, w0, w1, w2, b, skip=None):
    M, Cin = x0.shape
    Cout = w0.shape[1]
    tm = min(256, _round_up(M, 8))
    Mp = _round_up(M, tm)
    xm1p, x0p, xp1p = (_pad2(a, Mp, Cin) for a in (xm1, x0, xp1))
    row_spec = pl.BlockSpec((tm, Cin), lambda i: (i, 0))
    w_spec = pl.BlockSpec((Cin, Cout), lambda i: (0, 0))
    in_specs = [row_spec, row_spec, row_spec, w_spec, w_spec, w_spec,
                pl.BlockSpec((1, Cout), lambda i: (0, 0))]
    args = [xm1p, x0p, xp1p, w0, w1, w2, b.reshape(1, Cout)]
    if skip is not None:
        in_specs.append(pl.BlockSpec((tm, Cout), lambda i: (i, 0)))
        args.append(_pad2(skip, Mp, Cout))
    out = pl.pallas_call(
        partial(_conv3_kernel, has_skip=skip is not None),
        out_shape=jax.ShapeDtypeStruct((Mp, Cout), x0.dtype),
        grid=(Mp // tm,),
        in_specs=in_specs,
        out_specs=pl.BlockSpec((tm, Cout), lambda i: (i, 0)),
        compiler_params=pltpu.CompilerParams(
            dimension_semantics=("parallel",)),
    )(*args)
    return out[:M] if Mp != M else out


def _gate_pool_feat_kernel(e_ref, c_ref, w_ref, b_ref, o_ref):
    """Channel-last gating head fused with the feature Linear.
    e,c:[B,Lg,D] -> gate = softmax_L(mean_C(e+c)); pooled = sum_L(e*gate); pooled@W+b."""
    e = e_ref[...].astype(jnp.float32)
    raw = e + c_ref[...].astype(jnp.float32)
    gate = jax.nn.softmax(jnp.mean(raw, axis=-1), axis=-1)          # [B, Lg]
    pooled = jnp.sum(e * gate[:, :, None], axis=1)                  # [B, D]
    y = jnp.dot(pooled.astype(w_ref.dtype), w_ref[...],
                preferred_element_type=jnp.float32) + b_ref[...]
    o_ref[...] = y


# =============================================================================
# Glue (plain JAX) + module forward
# =============================================================================

def compress_conv(x_cl, P):
    # TODO(synk): MEfficientNet (inverted-residual / drop-connect blocks) source not provided;
    #             stand-in = non-overlapping avg-pool downsample (x16/x32/x64) + pointwise conv + GELU.
    B, L, C = x_cl.shape

    def pool(f):
        return (x_cl.astype(jnp.float32).reshape(B, L // f, f, C)
                .mean(axis=2).astype(jnp.bfloat16))

    def pointwise(xp, W, bias):
        Bp, Lp, Cp = xp.shape
        y = pallas_linear(xp.reshape(Bp * Lp, Cp), W, bias, act="gelu")
        return y.reshape(Bp, Lp, -1)

    x16 = pointwise(pool(16), P["w16"], P["b16"])    # [B, L/16, 256]
    x32 = pointwise(pool(32), P["w32"], P["b32"])    # [B, L/32, 384] (320 ch, lane-padded)
    x64 = pointwise(pool(64), P["w64"], P["b64"])    # [B, L/64, D_MODEL]
    return x64, x32, x16


def former_encoder(x, layers):
    # TODO(synk): FormerEncoder (pairDim=64 variant) source not provided;
    #             stand-in = post-LN MHSA (fused QKV proj) + fused GELU-FFN blocks;
    #             the tiny attention core (S = L/64) is left to XLA in f32.
    B, S, D = x.shape
    hd = D // HEAD_NUM
    scale = 1.0 / math.sqrt(hd)
    for p in layers:
        xf = x.reshape(B * S, D)
        qkv = pallas_linear(xf, p["w_qkv"], p["b_qkv"]).reshape(B, S, 3, HEAD_NUM, hd)
        q = qkv[:, :, 0].astype(jnp.float32)
        k = qkv[:, :, 1].astype(jnp.float32)
        v = qkv[:, :, 2].astype(jnp.float32)
        attn = jax.nn.softmax(jnp.einsum("bshd,bthd->bhst", q, k) * scale, axis=-1)
        ctx = jnp.einsum("bhst,bthd->bshd", attn, v).reshape(B * S, D).astype(jnp.bfloat16)
        # fused: LN(x + ctx @ Wo + bo)
        x = pallas_proj_res_ln(ctx, p["wo"], p["bo"], xf,
                               p["ln1_g"], p["ln1_b"]).reshape(B, S, D)
        # fused: LN(x + FFN(x))
        x = pallas_ffn_res_ln(x.reshape(B * S, D), p["w1"], p["b1"],
                              p["w2"], p["b2"],
                              p["ln2_g"], p["ln2_b"]).reshape(B, S, D)
    return x


def conv1d_k3s2p1(x_cl, w0, w1, w2, b, skip=None):
    """PyTorch Conv1d(k=3, stride=2, padding=1) + GELU in channel-last layout.
    out[t] = gelu(x[2t-1]@w0 + x[2t]@w1 + x[2t+1]@w2 + b) (+ skip[t] if given)."""
    B, L, Cin = x_cl.shape
    Lout = L // 2
    xe = x_cl[:, 0::2, :]                                        # x[2t]
    xo = x_cl[:, 1::2, :]                                        # x[2t+1]
    xm1 = jnp.pad(xo, ((0, 0), (1, 0), (0, 0)))[:, :Lout, :]      # x[2t-1], zero pad at t=0
    skip_f = None if skip is None else skip.reshape(B * Lout, -1)
    y = pallas_conv3(xm1.reshape(B * Lout, Cin),
                     xe.reshape(B * Lout, Cin),
                     xo.reshape(B * Lout, Cin),
                     w0, w1, w2, b, skip=skip_f)
    return y.reshape(B, Lout, -1)


def gseqformer_forward(x, params):
    """x: [B, C, L] channel-first (like the PyTorch module) -> [B, feature_dim]."""
    B = x.shape[0]
    x_cl = jnp.transpose(x, (0, 2, 1)).astype(jnp.bfloat16)       # [B, L, C] lane-dense channels

    x64, x32, x16 = compress_conv(x_cl, params["compress"])
    eX64 = former_encoder(x64, params["former"])                  # [B, L/64, D]

    # branchX32 = x32 + gelu(conv16_32(x16))  (add fused into the conv kernel)
    branch32 = conv1d_k3s2p1(x16, params["c16_w0"], params["c16_w1"],
                             params["c16_w2"], params["c16_b"], skip=x32)
    # conv32_64 = gelu(conv32_64(branchX32))
    c32_64 = conv1d_k3s2p1(branch32, params["c32_w0"], params["c32_w1"],
                           params["c32_w2"], params["c32_b"])     # [B, L/64, D]

    feat_w, feat_b = params["feat_w"], params["feat_b"]
    F_dim = feat_w.shape[1]
    return pl.pallas_call(
        _gate_pool_feat_kernel,
        out_shape=jax.ShapeDtypeStruct((B, F_dim), jnp.float32),
    )(eX64, c32_64, feat_w, feat_b.reshape(1, F_dim))


# =============================================================================
# Deterministic parameter init (weights stored once in bf16, biases/LN in f32)
# =============================================================================

def init_params(key):
    keys = iter(jax.random.split(key, 32))

    def w(shape, s=0.05):
        return (jax.random.normal(next(keys), shape, jnp.float32) * s).astype(jnp.bfloat16)

    def zeros(shape):
        return jnp.zeros(shape, jnp.float32)

    def conv_taps(cout, cin, cin_pad, cout_pad, s=0.05):
        W = jax.random.normal(next(keys), (cout, cin, 3), jnp.float32) * s  # PyTorch [Cout,Cin,k]
        taps = []
        for k in range(3):
            t = jnp.pad(W[:, :, k].T, ((0, cin_pad - cin), (0, cout_pad - cout)))
            taps.append(t.astype(jnp.bfloat16))
        return taps

    compress = {
        "w16": w((IN_CHANNELS, C256)), "b16": zeros((C256,)),
        "w32": jnp.pad((jax.random.normal(next(keys), (IN_CHANNELS, C320), jnp.float32) * 0.05),
                       ((0, 0), (0, C320_PAD - C320))).astype(jnp.bfloat16),
        "b32": zeros((C320_PAD,)),
        "w64": w((IN_CHANNELS, D_MODEL)), "b64": zeros((D_MODEL,)),
    }

    former = []
    for _ in range(NUM_ENC):
        former.append({
            "w_qkv": w((D_MODEL, 3 * D_MODEL)), "b_qkv": zeros((3 * D_MODEL,)),
            "wo": w((D_MODEL, D_MODEL)), "bo": zeros((D_MODEL,)),
            "ln1_g": jnp.ones((D_MODEL,), jnp.float32), "ln1_b": zeros((D_MODEL,)),
            "w1": w((D_MODEL, EXPAND * D_MODEL)), "b1": zeros((EXPAND * D_MODEL,)),
            "w2": w((EXPAND * D_MODEL, D_MODEL)), "b2": zeros((D_MODEL,)),
            "ln2_g": jnp.ones((D_MODEL,), jnp.float32), "ln2_b": zeros((D_MODEL,)),
        })

    c16_taps = conv_taps(C320, C256, C256, C320_PAD)        # Conv1d(256, 320)
    c32_taps = conv_taps(D_MODEL, C320, C320_PAD, D_MODEL)  # Conv1d(320, d_model)

    return {
        "compress": compress,
        "former": former,
        "c16_w0": c16_taps[0], "c16_w1": c16_taps[1], "c16_w2": c16_taps[2],
        "c16_b": zeros((C320_PAD,)),
        "c32_w0": c32_taps[0], "c32_w1": c32_taps[1], "c32_w2": c32_taps[2],
        "c32_b": zeros((D_MODEL,)),
        "feat_w": w((D_MODEL, FEATURE_DIM)), "feat_b": zeros((FEATURE_DIM,)),
    }


# =============================================================================
# Run
# =============================================================================

if __name__ == "__main__":
    key = jax.random.PRNGKey(0)
    pkey, xkey = jax.random.split(key)
    params = init_params(pkey)

    B, L = 2, 256
    x = jax.random.normal(xkey, (B, IN_CHANNELS, L), jnp.float32)

    fwd = jax.jit(gseqformer_forward)
    out = fwd(x, params)
    out = jax.block_until_ready(out)

    assert out.shape == (B, FEATURE_DIM) and out.dtype == jnp.float32
    assert bool(jnp.all(jnp.isfinite(out)))
    print("KERNEL_OK")
</pallas_src>

<mosaic_0001>
module attributes {stable_mosaic.version = 11 : i64} {
  func.func @_matmul_kernel(%arg0: i32, %arg1: i32, %arg2: i32, %arg3: memref<8x128xbf16, #tpu.memory_space<vmem>>, %arg4: memref<128x384xbf16, #tpu.memory_space<vmem>>, %arg5: memref<1x384xf32, #tpu.memory_space<vmem>>, %arg6: memref<8x384xbf16, #tpu.memory_space<vmem>>, %arg7: memref<8x384xf32, #tpu.memory_space<vmem>>) attributes {dimension_semantics = [#tpu.dimension_semantics<parallel>, #tpu.dimension_semantics<parallel>, #tpu.dimension_semantics<arbitrary>], iteration_bounds = array<i64: 1, 1, 1>, scalar_prefetch = 0 : i64, scratch_operands = 1 : i64, tpu.core_type = #tpu.core_type<tc>, window_params = [{transform_indices = @transform_0, window_bounds = array<i64: 8, 128>}, {transform_indices = @transform_1, window_bounds = array<i64: 128, 384>}, {transform_indices = @transform_2, window_bounds = array<i64: 1, 384>}, {transform_indices = @transform_3, window_bounds = array<i64: 8, 384>}]} {
    %c0_i32 = arith.constant 0 : i32
    %0 = arith.cmpi eq, %arg2, %c0_i32 : i32
    %1 = arith.extui %0 : i1 to i32
    %c0_i32_0 = arith.constant 0 : i32
    %2 = arith.cmpi ne, %1, %c0_i32_0 : i32
    scf.if %2 {
      %cst_10 = arith.constant 0.000000e+00 : f32
      %12 = vector.broadcast %cst_10 : f32 to vector<8x384xf32>
      %c0_11 = arith.constant 0 : index
      %c0_12 = arith.constant 0 : index
      %13 = vector.load %arg7[%c0_11, %c0_12] : memref<8x384xf32, #tpu.memory_space<vmem>>, vector<8x384xf32>
      tpu.vector_store %arg7[%c0_11, %c0_12], %12 {strides = array<i32>} : memref<8x384xf32, #tpu.memory_space<vmem>>, vector<8x384xf32>,
    } else {
    }
    %c0 = arith.constant 0 : index
    %c0_1 = arith.constant 0 : index
    %3 = vector.load %arg7[%c0, %c0_1] : memref<8x384xf32, #tpu.memory_space<vmem>>, vector<8x384xf32>
    %c0_2 = arith.constant 0 : index
    %c0_3 = arith.constant 0 : index
    %4 = vector.load %arg3[%c0_2, %c0_3] : memref<8x128xbf16, #tpu.memory_space<vmem>>, vector<8x128xbf16>
    %c0_4 = arith.constant 0 : index
    %c0_5 = arith.constant 0 : index
    %5 = vector.load %arg4[%c0_4, %c0_5] : memref<128x384xbf16, #tpu.memory_space<vmem>>, vector<128x384xbf16>
    %cst = arith.constant dense<0.000000e+00> : vector<8x384xf32>
    %6 = tpu.matmul %4, %5, %cst {dimension_numbers = #tpu.dot_dimension_numbers<[1], [0], [0], [1], [0, 0, 1, 1], [], []>} : vector<8x128xbf16>, vector<128x384xbf16>, vector<8x384xf32> -> vector<8x384xf32>
    %7 = arith.addf %3, %6 : vector<8x384xf32>
    %c0_6 = arith.constant 0 : index
    %c0_7 = arith.constant 0 : index
    %8 = vector.load %arg7[%c0_6, %c0_7] : memref<8x384xf32, #tpu.memory_space<vmem>>, vector<8x384xf32>
    tpu.vector_store %arg7[%c0_6, %c0_7], %7 {strides = array<i32>} : memref<8x384xf32, #tpu.memory_space<vmem>>, vector<8x384xf32>,
    %c0_i32_8 = arith.constant 0 : i32
    %9 = arith.cmpi eq, %arg2, %c0_i32_8 : i32
    %10 = arith.extui %9 : i1 to i32
    %c0_i32_9 = arith.constant 0 : i32
    %11 = arith.cmpi ne, %10, %c0_i32_9 : i32
    scf.if %11 {
      %c0_10 = arith.constant 0 : index
      %c0_11 = arith.constant 0 : index
      %12 = vector.load %arg7[%c0_10, %c0_11] : memref<8x384xf32, #tpu.memory_space<vmem>>, vector<8x384xf32>
      %c0_12 = arith.constant 0 : index
      %c0_13 = arith.constant 0 : index
      %13 = vector.load %arg5[%c0_12, %c0_13] : memref<1x384xf32, #tpu.memory_space<vmem>>, vector<1x384xf32>
      %14 = vector.broadcast %13 : vector<1x384xf32> to vector<8x384xf32>
      %15 = arith.addf %12, %14 : vector<8x384xf32>
      %16 = arith.truncf %15 : vector<8x384xf32> to vector<8x384xbf16>
      %c0_14 = arith.constant 0 : index
      %c0_15 = arith.constant 0 : index
      %17 = vector.load %arg6[%c0_14, %c0_15] : memref<8x384xbf16, #tpu.memory_space<vmem>>, vector<8x384xbf16>
      tpu.vector_store %arg6[%c0_14, %c0_15], %16 {strides = array<i32>} : memref<8x384xbf16, #tpu.memory_space<vmem>>, vector<8x384xbf16>,
    } else {
    }
    return
  }
  func.func @transform_0(%arg0: i32, %arg1: i32, %arg2: i32) -> (i32, i32) {
    %c0_i32 = arith.constant 0 : i32
    return %arg0, %arg2 : i32, i32
  }
  func.func @transform_1(%arg0: i32, %arg1: i32, %arg2: i32) -> (i32, i32) {
    %c0_i32 = arith.constant 0 : i32
    return %arg2, %arg1 : i32, i32
  }
  func.func @transform_2(%arg0: i32, %arg1: i32, %arg2: i32) -> (i32, i32) {
    %c0_i32 = arith.constant 0 : i32
    %c0_i32_0 = arith.constant 0 : i32
    return %c0_i32, %arg1 : i32, i32
  }
  func.func @transform_3(%arg0: i32, %arg1: i32, %arg2: i32) -> (i32, i32) {
    %c0_i32 = arith.constant 0 : i32
    return %arg0, %arg1 : i32, i32
  }
}

module attributes {stable_mosaic.version = 11 : i64} {
  func.func @_matmul_kernel(%arg0: i32, %arg1: i32, %arg2: i32, %arg3: memref<8x128xbf16, #tpu.memory_space<vmem>>, %arg4: memref<128x128xbf16, #tpu.memory_space<vmem>>, %arg5: memref<1x128xf32, #tpu.memory_space<vmem>>, %arg6: memref<8x128xbf16, #tpu.memory_space<vmem>>, %arg7: memref<8x128xf32, #tpu.memory_space<vmem>>) attributes {dimension_semantics = [#tpu.dimension_semantics<parallel>, #tpu.dimension_semantics<parallel>, #tpu.dimension_semantics<arbitrary>], iteration_bounds = array<i64: 1, 1, 1>, scalar_prefetch = 0 : i64, scratch_operands = 1 : i64, tpu.core_type = #tpu.core_type<tc>, window_params = [{transform_indices = @transform_0, window_bounds = array<i64: 8, 128>}, {transform_indices = @transform_1, window_bounds = array<i64: 128, 128>}, {transform_indices = @transform_2, window_bounds = array<i64: 1, 128>}, {transform_indices = @transform_3, window_bounds = array<i64: 8, 128>}]} {
    %c0_i32 = arith.constant 0 : i32
    %0 = arith.cmpi eq, %arg2, %c0_i32 : i32
    %1 = arith.extui %0 : i1 to i32
    %c0_i32_0 = arith.constant 0 : i32
    %2 = arith.cmpi ne, %1, %c0_i32_0 : i32
    scf.if %2 {
      %cst_10 = arith.constant 0.000000e+00 : f32
      %12 = vector.broadcast %cst_10 : f32 to vector<8x128xf32>
      %c0_11 = arith.constant 0 : index
      %c0_12 = arith.constant 0 : index
      %13 = vector.load %arg7[%c0_11, %c0_12] : memref<8x128xf32, #tpu.memory_space<vmem>>, vector<8x128xf32>
      tpu.vector_store %arg7[%c0_11, %c0_12], %12 {strides = array<i32>} : memref<8x128xf32, #tpu.memory_space<vmem>>, vector<8x128xf32>,
    } else {
    }
    %c0 = arith.constant 0 : index
    %c0_1 = arith.constant 0 : index
    %3 = vector.load %arg7[%c0, %c0_1] : memref<8x128xf32, #tpu.memory_space<vmem>>, vector<8x128xf32>
    %c0_2 = arith.constant 0 : index
    %c0_3 = arith.constant 0 : index
    %4 = vector.load %arg3[%c0_2, %c0_3] : memref<8x128xbf16, #tpu.memory_space<vmem>>, vector<8x128xbf16>
    %c0_4 = arith.constant 0 : index
    %c0_5 = arith.constant 0 : index
    %5 = vector.load %arg4[%c0_4, %c0_5] : memref<128x128xbf16, #tpu.memory_space<vmem>>, vector<128x128xbf16>
    %cst = arith.constant dense<0.000000e+00> : vector<8x128xf32>
    %6 = tpu.matmul %4, %5, %cst {dimension_numbers = #tpu.dot_dimension_numbers<[1], [0], [0], [1], [0, 0, 1, 1], [], []>} : vector<8x128xbf16>, vector<128x128xbf16>, vector<8x128xf32> -> vector<8x128xf32>
    %7 = arith.addf %3, %6 : vector<8x128xf32>
    %c0_6 = arith.constant 0 : index
    %c0_7 = arith.constant 0 : index
    %8 = vector.load %arg7[%c0_6, %c0_7] : memref<8x128xf32, #tpu.memory_space<vmem>>, vector<8x128xf32>
    tpu.vector_store %arg7[%c0_6, %c0_7], %7 {strides = array<i32>} : memref<8x128xf32, #tpu.memory_space<vmem>>, vector<8x128xf32>,
    %c0_i32_8 = arith.constant 0 : i32
    %9 = arith.cmpi eq, %arg2, %c0_i32_8 : i32
    %10 = arith.extui %9 : i1 to i32
    %c0_i32_9 = arith.constant 0 : i32
    %11 = arith.cmpi ne, %10, %c0_i32_9 : i32
    scf.if %11 {
      %c0_10 = arith.constant 0 : index
      %c0_11 = arith.constant 0 : index
      %12 = vector.load %arg7[%c0_10, %c0_11] : memref<8x128xf32, #tpu.memory_space<vmem>>, vector<8x128xf32>
      %c0_12 = arith.constant 0 : index
      %c0_13 = arith.constant 0 : index
      %13 = vector.load %arg5[%c0_12, %c0_13] : memref<1x128xf32, #tpu.memory_space<vmem>>, vector<1x128xf32>
      %14 = vector.broadcast %13 : vector<1x128xf32> to vector<8x128xf32>
      %15 = arith.addf %12, %14 : vector<8x128xf32>
      %16 = arith.mulf %15, %15 : vector<8x128xf32>
      %17 = arith.mulf %15, %16 : vector<8x128xf32>
      %cst_14 = arith.constant 4.471500e-02 : f32
      %18 = vector.broadcast %cst_14 : f32 to vector<8x128xf32>
      %19 = arith.mulf %18, %17 : vector<8x128xf32>
      %20 = arith.addf %15, %19 : vector<8x128xf32>
      %cst_15 = arith.constant 0.797884583 : f32
      %21 = vector.broadcast %cst_15 : f32 to vector<8x128xf32>
      %22 = arith.mulf %21, %20 : vector<8x128xf32>
      %23 = math.tanh %22 : vector<8x128xf32>
      %cst_16 = arith.constant 1.000000e+00 : f32
      %24 = vector.broadcast %cst_16 : f32 to vector<8x128xf32>
      %25 = arith.addf %24, %23 : vector<8x128xf32>
      %cst_17 = arith.constant 5.000000e-01 : f32
      %26 = vector.broadcast %cst_17 : f32 to vector<8x128xf32>
      %27 = arith.mulf %26, %25 : vector<8x128xf32>
      %28 = arith.mulf %15, %27 : vector<8x128xf32>
      %29 = arith.truncf %28 : vector<8x128xf32> to vector<8x128xbf16>
      %c0_18 = arith.constant 0 : index
      %c0_19 = arith.constant 0 : index
      %30 = vector.load %arg6[%c0_18, %c0_19] : memref<8x128xbf16, #tpu.memory_space<vmem>>, vector<8x128xbf16>
      tpu.vector_store %arg6[%c0_18, %c0_19], %29 {strides = array<i32>} : memref<8x128xbf16, #tpu.memory_space<vmem>>, vector<8x128xbf16>,
    } else {
    }
    return
  }
  func.func @transform_0(%arg0: i32, %arg1: i32, %arg2: i32) -> (i32, i32) {
    %c0_i32 = arith.constant 0 : i32
    return %arg0, %arg2 : i32, i32
  }
  func.func @transform_1(%arg0: i32, %arg1: i32, %arg2: i32) -> (i32, i32) {
    %c0_i32 = arith.constant 0 : i32
    return %arg2, %arg1 : i32, i32
  }
  func.func @transform_2(%arg0: i32, %arg1: i32, %arg2: i32) -> (i32, i32) {
    %c0_i32 = arith.constant 0 : i32
    %c0_i32_0 = arith.constant 0 : i32
    return %c0_i32, %arg1 : i32, i32
  }
  func.func @transform_3(%arg0: i32, %arg1: i32, %arg2: i32) -> (i32, i32) {
    %c0_i32 = arith.constant 0 : i32
    return %arg0, %arg1 : i32, i32
  }
}

module attributes {stable_mosaic.version = 11 : i64} {
  func.func @_proj_res_ln_kernel(%arg0: i32, %arg1: memref<8x128xbf16, #tpu.memory_space<vmem>>, %arg2: memref<128x128xbf16, #tpu.memory_space<vmem>>, %arg3: memref<1x128xf32, #tpu.memory_space<vmem>>, %arg4: memref<8x128xbf16, #tpu.memory_space<vmem>>, %arg5: memref<1x128xf32, #tpu.memory_space<vmem>>, %arg6: memref<1x128xf32, #tpu.memory_space<vmem>>, %arg7: memref<8x128xbf16, #tpu.memory_space<vmem>>) attributes {dimension_semantics = [#tpu.dimension_semantics<parallel>], iteration_bounds = array<i64: 1>, scalar_prefetch = 0 : i64, scratch_operands = 0 : i64, tpu.core_type = #tpu.core_type<tc>, window_params = [{transform_indices = @transform_0, window_bounds = array<i64: 8, 128>}, {pipeline_mode = #tpu.pipeline_mode<synchronous>, transform_indices = @transform_1, window_bounds = array<i64: 128, 128>}, {pipeline_mode = #tpu.pipeline_mode<synchronous>, transform_indices = @transform_2, window_bounds = array<i64: 1, 128>}, {transform_indices = @transform_3, window_bounds = array<i64: 8, 128>}, {pipeline_mode = #tpu.pipeline_mode<synchronous>, transform_indices = @transform_4, window_bounds = array<i64: 1, 128>}, {pipeline_mode = #tpu.pipeline_mode<synchronous>, transform_indices = @transform_5, window_bounds = array<i64: 1, 128>}, {transform_indices = @transform_6, window_bounds = array<i64: 8, 128>}]} {
    %c0 = arith.constant 0 : index
    %c0_0 = arith.constant 0 : index
    %0 = vector.load %arg1[%c0, %c0_0] : memref<8x128xbf16, #tpu.memory_space<vmem>>, vector<8x128xbf16>
    %c0_1 = arith.constant 0 : index
    %c0_2 = arith.constant 0 : index
    %1 = vector.load %arg2[%c0_1, %c0_2] : memref<128x128xbf16, #tpu.memory_space<vmem>>, vector<128x128xbf16>
    %cst = arith.constant dense<0.000000e+00> : vector<8x128xf32>
    %2 = tpu.matmul %0, %1, %cst {dimension_numbers = #tpu.dot_dimension_numbers<[1], [0], [0], [1], [0, 0, 1, 1], [], []>} : vector<8x128xbf16>, vector<128x128xbf16>, vector<8x128xf32> -> vector<8x128xf32>
    %c0_3 = arith.constant 0 : index
    %c0_4 = arith.constant 0 : index
    %3 = vector.load %arg3[%c0_3, %c0_4] : memref<1x128xf32, #tpu.memory_space<vmem>>, vector<1x128xf32>
    %4 = vector.broadcast %3 : vector<1x128xf32> to vector<8x128xf32>
    %5 = arith.addf %2, %4 : vector<8x128xf32>
    %c0_5 = arith.constant 0 : index
    %c0_6 = arith.constant 0 : index
    %6 = vector.load %arg4[%c0_5, %c0_6] : memref<8x128xbf16, #tpu.memory_space<vmem>>, vector<8x128xbf16>
    %7 = arith.extf %6 : vector<8x128xbf16> to vector<8x128xf32>
    %8 = arith.addf %5, %7 : vector<8x128xf32>
    %cst_7 = arith.constant dense<0.000000e+00> : vector<8xf32>
    %9 = vector.multi_reduction <add>, %8, %cst_7 [1] : vector<8x128xf32> to vector<8xf32>
    %10 = vector.shape_cast %9 : vector<8xf32> to vector<8x1xf32>
    %cst_8 = arith.constant 1.280000e+02 : f32
    %11 = vector.broadcast %cst_8 : f32 to vector<8x1xf32>
    %12 = arith.divf %10, %11 : vector<8x1xf32>
    %13 = vector.broadcast %12 : vector<8x1xf32> to vector<8x128xf32>
    %14 = arith.subf %8, %13 : vector<8x128xf32>
    %15 = arith.mulf %14, %14 : vector<8x128xf32>
    %cst_9 = arith.constant dense<0.000000e+00> : vector<8xf32>
    %16 = vector.multi_reduction <add>, %15, %cst_9 [1] : vector<8x128xf32> to vector<8xf32>
    %17 = vector.shape_cast %16 : vector<8xf32> to vector<8x1xf32>
    %cst_10 = arith.constant 1.280000e+02 : f32
    %18 = vector.broadcast %cst_10 : f32 to vector<8x1xf32>
    %19 = arith.divf %17, %18 : vector<8x1xf32>
    %20 = vector.broadcast %12 : vector<8x1xf32> to vector<8x128xf32>
    %21 = arith.subf %8, %20 : vector<8x128xf32>
    %cst_11 = arith.constant 9.99999974E-6 : f32
    %22 = vector.broadcast %cst_11 : f32 to vector<8x1xf32>
    %23 = arith.addf %19, %22 : vector<8x1xf32>
    %24 = math.rsqrt %23 : vector<8x1xf32>
    %25 = vector.broadcast %24 : vector<8x1xf32> to vector<8x128xf32>
    %26 = arith.mulf %21, %25 : vector<8x128xf32>
    %c0_12 = arith.constant 0 : index
    %c0_13 = arith.constant 0 : index
    %27 = vector.load %arg5[%c0_12, %c0_13] : memref<1x128xf32, #tpu.memory_space<vmem>>, vector<1x128xf32>
    %28 = vector.broadcast %27 : vector<1x128xf32> to vector<8x128xf32>
    %29 = arith.mulf %26, %28 : vector<8x128xf32>
    %c0_14 = arith.constant 0 : index
    %c0_15 = arith.constant 0 : index
    %30 = vector.load %arg6[%c0_14, %c0_15] : memref<1x128xf32, #tpu.memory_space<vmem>>, vector<1x128xf32>
    %31 = vector.broadcast %30 : vector<1x128xf32> to vector<8x128xf32>
    %32 = arith.addf %29, %31 : vector<8x128xf32>
    %33 = arith.truncf %32 : vector<8x128xf32> to vector<8x128xbf16>
    %c0_16 = arith.constant 0 : index
    %c0_17 = arith.constant 0 : index
    %34 = vector.load %arg7[%c0_16, %c0_17] : memref<8x128xbf16, #tpu.memory_space<vmem>>, vector<8x128xbf16>
    tpu.vector_store %arg7[%c0_16, %c0_17], %33 {strides = array<i32>} : memref<8x128xbf16, #tpu.memory_space<vmem>>, vector<8x128xbf16>,
    return
  }
  func.func @transform_0(%arg0: i32) -> (i32, i32) {
    %c0_i32 = arith.constant 0 : i32
    %c0_i32_0 = arith.constant 0 : i32
    return %arg0, %c0_i32 : i32, i32
  }
  func.func @transform_1(%arg0: i32) -> (i32, i32) {
    %c0_i32 = arith.constant 0 : i32
    %c0_i32_0 = arith.constant 0 : i32
    %c0_i32_1 = arith.constant 0 : i32
    return %c0_i32, %c0_i32_0 : i32, i32
  }
  func.func @transform_2(%arg0: i32) -> (i32, i32) {
    %c0_i32 = arith.constant 0 : i32
    %c0_i32_0 = arith.constant 0 : i32
    %c0_i32_1 = arith.constant 0 : i32
    return %c0_i32, %c0_i32_0 : i32, i32
  }
  func.func @transform_3(%arg0: i32) -> (i32, i32) {
    %c0_i32 = arith.constant 0 : i32
    %c0_i32_0 = arith.constant 0 : i32
    return %arg0, %c0_i32 : i32, i32
  }
  func.func @transform_4(%arg0: i32) -> (i32, i32) {
    %c0_i32 = arith.constant 0 : i32
    %c0_i32_0 = arith.constant 0 : i32
    %c0_i32_1 = arith.constant 0 : i32
    return %c0_i32, %c0_i32_0 : i32, i32
  }
  func.func @transform_5(%arg0: i32) -> (i32, i32) {
    %c0_i32 = arith.constant 0 : i32
    %c0_i32_0 = arith.constant 0 : i32
    %c0_i32_1 = arith.constant 0 : i32
    return %c0_i32, %c0_i32_0 : i32, i32
  }
  func.func @transform_6(%arg0: i32) -> (i32, i32) {
    %c0_i32 = arith.constant 0 : i32
    %c0_i32_0 = arith.constant 0 : i32
    return %arg0, %c0_i32 : i32, i32
  }
}

module attributes {stable_mosaic.version = 11 : i64} {
  func.func @_ffn_res_ln_kernel(%arg0: i32, %arg1: memref<8x128xbf16, #tpu.memory_space<vmem>>, %arg2: memref<128x256xbf16, #tpu.memory_space<vmem>>, %arg3: memref<1x256xf32, #tpu.memory_space<vmem>>, %arg4: memref<256x128xbf16, #tpu.memory_space<vmem>>, %arg5: memref<1x128xf32, #tpu.memory_space<vmem>>, %arg6: memref<1x128xf32, #tpu.memory_space<vmem>>, %arg7: memref<1x128xf32, #tpu.memory_space<vmem>>, %arg8: memref<8x128xbf16, #tpu.memory_space<vmem>>) attributes {dimension_semantics = [#tpu.dimension_semantics<parallel>], iteration_bounds = array<i64: 1>, scalar_prefetch = 0 : i64, scratch_operands = 0 : i64, tpu.core_type = #tpu.core_type<tc>, window_params = [{transform_indices = @transform_0, window_bounds = array<i64: 8, 128>}, {pipeline_mode = #tpu.pipeline_mode<synchronous>, transform_indices = @transform_1, window_bounds = array<i64: 128, 256>}, {pipeline_mode = #tpu.pipeline_mode<synchronous>, transform_indices = @transform_2, window_bounds = array<i64: 1, 256>}, {pipeline_mode = #tpu.pipeline_mode<synchronous>, transform_indices = @transform_3, window_bounds = array<i64: 256, 128>}, {pipeline_mode = #tpu.pipeline_mode<synchronous>, transform_indices = @transform_4, window_bounds = array<i64: 1, 128>}, {pipeline_mode = #tpu.pipeline_mode<synchronous>, transform_indices = @transform_5, window_bounds = array<i64: 1, 128>}, {pipeline_mode = #tpu.pipeline_mode<synchronous>, transform_indices = @transform_6, window_bounds = array<i64: 1, 128>}, {transform_indices = @transform_7, window_bounds = array<i64: 8, 128>}]} {
    %c0 = arith.constant 0 : index
    %c0_0 = arith.constant 0 : index
    %0 = vector.load %arg1[%c0, %c0_0] : memref<8x128xbf16, #tpu.memory_space<vmem>>, vector<8x128xbf16>
    %c0_1 = arith.constant 0 : index
    %c0_2 = arith.constant 0 : index
    %1 = vector.load %arg2[%c0_1, %c0_2] : memref<128x256xbf16, #tpu.memory_space<vmem>>, vector<128x256xbf16>
    %cst = arith.constant dense<0.000000e+00> : vector<8x256xf32>
    %2 = tpu.matmul %0, %1, %cst {dimension_numbers = #tpu.dot_dimension_numbers<[1], [0], [0], [1], [0, 0, 1, 1], [], []>} : vector<8x128xbf16>, vector<128x256xbf16>, vector<8x256xf32> -> vector<8x256xf32>
    %c0_3 = arith.constant 0 : index
    %c0_4 = arith.constant 0 : index
    %3 = vector.load %arg3[%c0_3, %c0_4] : memref<1x256xf32, #tpu.memory_space<vmem>>, vector<1x256xf32>
    %4 = vector.broadcast %3 : vector<1x256xf32> to vector<8x256xf32>
    %5 = arith.addf %2, %4 : vector<8x256xf32>
    %6 = arith.mulf %5, %5 : vector<8x256xf32>
    %7 = arith.mulf %5, %6 : vector<8x256xf32>
    %cst_5 = arith.constant 4.471500e-02 : f32
    %8 = vector.broadcast %cst_5 : f32 to vector<8x256xf32>
    %9 = arith.mulf %8, %7 : vector<8x256xf32>
    %10 = arith.addf %5, %9 : vector<8x256xf32>
    %cst_6 = arith.constant 0.797884583 : f32
    %11 = vector.broadcast %cst_6 : f32 to vector<8x256xf32>
    %12 = arith.mulf %11, %10 : vector<8x256xf32>
    %13 = math.tanh %12 : vector<8x256xf32>
    %cst_7 = arith.constant 1.000000e+00 : f32
    %14 = vector.broadcast %cst_7 : f32 to vector<8x256xf32>
    %15 = arith.addf %14, %13 : vector<8x256xf32>
    %cst_8 = arith.constant 5.000000e-01 : f32
    %16 = vector.broadcast %cst_8 : f32 to vector<8x256xf32>
    %17 = arith.mulf %16, %15 : vector<8x256xf32>
    %18 = arith.mulf %5, %17 : vector<8x256xf32>
    %19 = arith.truncf %18 : vector<8x256xf32> to vector<8x256xbf16>
    %c0_9 = arith.constant 0 : index
    %c0_10 = arith.constant 0 : index
    %20 = vector.load %arg4[%c0_9, %c0_10] : memref<256x128xbf16, #tpu.memory_space<vmem>>, vector<256x128xbf16>
    %cst_11 = arith.constant dense<0.000000e+00> : vector<8x128xf32>
    %21 = tpu.matmul %19, %20, %cst_11 {dimension_numbers = #tpu.dot_dimension_numbers<[1], [0], [0], [1], [0, 0, 1, 1], [], []>} : vector<8x256xbf16>, vector<256x128xbf16>, vector<8x128xf32> -> vector<8x128xf32>
    %c0_12 = arith.constant 0 : index
    %c0_13 = arith.constant 0 : index
    %22 = vector.load %arg5[%c0_12, %c0_13] : memref<1x128xf32, #tpu.memory_space<vmem>>, vector<1x128xf32>
    %23 = vector.broadcast %22 : vector<1x128xf32> to vector<8x128xf32>
    %24 = arith.addf %21, %23 : vector<8x128xf32>
    %c0_14 = arith.constant 0 : index
    %c0_15 = arith.constant 0 : index
    %25 = vector.load %arg1[%c0_14, %c0_15] : memref<8x128xbf16, #tpu.memory_space<vmem>>, vector<8x128xbf16>
    %26 = arith.extf %25 : vector<8x128xbf16> to vector<8x128xf32>
    %27 = arith.addf %24, %26 : vector<8x128xf32>
    %cst_16 = arith.constant dense<0.000000e+00> : vector<8xf32>
    %28 = vector.multi_reduction <add>, %27, %cst_16 [1] : vector<8x128xf32> to vector<8xf32>
    %29 = vector.shape_cast %28 : vector<8xf32> to vector<8x1xf32>
    %cst_17 = arith.constant 1.280000e+02 : f32
    %30 = vector.broadcast %cst_17 : f32 to vector<8x1xf32>
    %31 = arith.divf %29, %30 : vector<8x1xf32>
    %32 = vector.broadcast %31 : vector<8x1xf32> to vector<8x128xf32>
    %33 = arith.subf %27, %32 : vector<8x128xf32>
    %34 = arith.mulf %33, %33 : vector<8x128xf32>
    %cst_18 = arith.constant dense<0.000000e+00> : vector<8xf32>
    %35 = vector.multi_reduction <add>, %34, %cst_18 [1] : vector<8x128xf32> to vector<8xf32>
    %36 = vector.shape_cast %35 : vector<8xf32> to vector<8x1xf32>
    %cst_19 = arith.constant 1.280000e+02 : f32
    %37 = vector.broadcast %cst_19 : f32 to vector<8x1xf32>
    %38 = arith.divf %36, %37 : vector<8x1xf32>
    %39 = vector.broadcast %31 : vector<8x1xf32> to vector<8x128xf32>
    %40 = arith.subf %27, %39 : vector<8x128xf32>
    %cst_20 = arith.constant 9.99999974E-6 : f32
    %41 = vector.broadcast %cst_20 : f32 to vector<8x1xf32>
    %42 = arith.addf %38, %41 : vector<8x1xf32>
    %43 = math.rsqrt %42 : vector<8x1xf32>
    %44 = vector.broadcast %43 : vector<8x1xf32> to vector<8x128xf32>
    %45 = arith.mulf %40, %44 : vector<8x128xf32>
    %c0_21 = arith.constant 0 : index
    %c0_22 = arith.constant 0 : index
    %46 = vector.load %arg6[%c0_21, %c0_22] : memref<1x128xf32, #tpu.memory_space<vmem>>, vector<1x128xf32>
    %47 = vector.broadcast %46 : vector<1x128xf32> to vector<8x128xf32>
    %48 = arith.mulf %45, %47 : vector<8x128xf32>
    %c0_23 = arith.constant 0 : index
    %c0_24 = arith.constant 0 : index
    %49 = vector.load %arg7[%c0_23, %c0_24] : memref<1x128xf32, #tpu.memory_space<vmem>>, vector<1x128xf32>
    %50 = vector.broadcast %49 : vector<1x128xf32> to vector<8x128xf32>
    %51 = arith.addf %48, %50 : vector<8x128xf32>
    %52 = arith.truncf %51 : vector<8x128xf32> to vector<8x128xbf16>
    %c0_25 = arith.constant 0 : index
    %c0_26 = arith.constant 0 : index
    %53 = vector.load %arg8[%c0_25, %c0_26] : memref<8x128xbf16, #tpu.memory_space<vmem>>, vector<8x128xbf16>
    tpu.vector_store %arg8[%c0_25, %c0_26], %52 {strides = array<i32>} : memref<8x128xbf16, #tpu.memory_space<vmem>>, vector<8x128xbf16>,
    return
  }
  func.func @transform_0(%arg0: i32) -> (i32, i32) {
    %c0_i32 = arith.constant 0 : i32
    %c0_i32_0 = arith.constant 0 : i32
    return %arg0, %c0_i32 : i32, i32
  }
  func.func @transform_1(%arg0: i32) -> (i32, i32) {
    %c0_i32 = arith.constant 0 : i32
    %c0_i32_0 = arith.constant 0 : i32
    %c0_i32_1 = arith.constant 0 : i32
    return %c0_i32, %c0_i32_0 : i32, i32
  }
  func.func @transform_2(%arg0: i32) -> (i32, i32) {
    %c0_i32 = arith.constant 0 : i32
    %c0_i32_0 = arith.constant 0 : i32
    %c0_i32_1 = arith.constant 0 : i32
    return %c0_i32, %c0_i32_0 : i32, i32
  }
  func.func @transform_3(%arg0: i32) -> (i32, i32) {
    %c0_i32 = arith.constant 0 : i32
    %c0_i32_0 = arith.constant 0 : i32
    %c0_i32_1 = arith.constant 0 : i32
    return %c0_i32, %c0_i32_0 : i32, i32
  }
  func.func @transform_4(%arg0: i32) -> (i32, i32) {
    %c0_i32 = arith.constant 0 : i32
    %c0_i32_0 = arith.constant 0 : i32
    %c0_i32_1 = arith.constant 0 : i32
    return %c0_i32, %c0_i32_0 : i32, i32
  }
  func.func @transform_5(%arg0: i32) -> (i32, i32) {
    %c0_i32 = arith.constant 0 : i32
    %c0_i32_0 = arith.constant 0 : i32
    %c0_i32_1 = arith.constant 0 : i32
    return %c0_i32, %c0_i32_0 : i32, i32
  }
  func.func @transform_6(%arg0: i32) -> (i32, i32) {
    %c0_i32 = arith.constant 0 : i32
    %c0_i32_0 = arith.constant 0 : i32
    %c0_i32_1 = arith.constant 0 : i32
    return %c0_i32, %c0_i32_0 : i32, i32
  }
  func.func @transform_7(%arg0: i32) -> (i32, i32) {
    %c0_i32 = arith.constant 0 : i32
    %c0_i32_0 = arith.constant 0 : i32
    return %arg0, %c0_i32 : i32, i32
  }
}

module attributes {stable_mosaic.version = 11 : i64} {
  func.func @_matmul_kernel(%arg0: i32, %arg1: i32, %arg2: i32, %arg3: memref<32x128xbf16, #tpu.memory_space<vmem>>, %arg4: memref<128x256xbf16, #tpu.memory_space<vmem>>, %arg5: memref<1x256xf32, #tpu.memory_space<vmem>>, %arg6: memref<32x256xbf16, #tpu.memory_space<vmem>>, %arg7: memref<32x256xf32, #tpu.memory_space<vmem>>) attributes {dimension_semantics = [#tpu.dimension_semantics<parallel>, #tpu.dimension_semantics<parallel>, #tpu.dimension_semantics<arbitrary>], iteration_bounds = array<i64: 1, 1, 1>, scalar_prefetch = 0 : i64, scratch_operands = 1 : i64, tpu.core_type = #tpu.core_type<tc>, window_params = [{transform_indices = @transform_0, window_bounds = array<i64: 32, 128>}, {transform_indices = @transform_1, window_bounds = array<i64: 128, 256>}, {transform_indices = @transform_2, window_bounds = array<i64: 1, 256>}, {transform_indices = @transform_3, window_bounds = array<i64: 32, 256>}]} {
    %c0_i32 = arith.constant 0 : i32
    %0 = arith.cmpi eq, %arg2, %c0_i32 : i32
    %1 = arith.extui %0 : i1 to i32
    %c0_i32_0 = arith.constant 0 : i32
    %2 = arith.cmpi ne, %1, %c0_i32_0 : i32
    scf.if %2 {
      %cst_10 = arith.constant 0.000000e+00 : f32
      %12 = vector.broadcast %cst_10 : f32 to vector<32x256xf32>
      %c0_11 = arith.constant 0 : index
      %c0_12 = arith.constant 0 : index
      %13 = vector.load %arg7[%c0_11, %c0_12] : memref<32x256xf32, #tpu.memory_space<vmem>>, vector<32x256xf32>
      tpu.vector_store %arg7[%c0_11, %c0_12], %12 {strides = array<i32>} : memref<32x256xf32, #tpu.memory_space<vmem>>, vector<32x256xf32>,
    } else {
    }
    %c0 = arith.constant 0 : index
    %c0_1 = arith.constant 0 : index
    %3 = vector.load %arg7[%c0, %c0_1] : memref<32x256xf32, #tpu.memory_space<vmem>>, vector<32x256xf32>
    %c0_2 = arith.constant 0 : index
    %c0_3 = arith.constant 0 : index
    %4 = vector.load %arg3[%c0_2, %c0_3] : memref<32x128xbf16, #tpu.memory_space<vmem>>, vector<32x128xbf16>
    %c0_4 = arith.constant 0 : index
    %c0_5 = arith.constant 0 : index
    %5 = vector.load %arg4[%c0_4, %c0_5] : memref<128x256xbf16, #tpu.memory_space<vmem>>, vector<128x256xbf16>
    %cst = arith.constant dense<0.000000e+00> : vector<32x256xf32>
    %6 = tpu.matmul %4, %5, %cst {dimension_numbers = #tpu.dot_dimension_numbers<[1], [0], [0], [1], [0, 0, 1, 1], [], []>} : vector<32x128xbf16>, vector<128x256xbf16>, vector<32x256xf32> -> vector<32x256xf32>
    %7 = arith.addf %3, %6 : vector<32x256xf32>
    %c0_6 = arith.constant 0 : index
    %c0_7 = arith.constant 0 : index
    %8 = vector.load %arg7[%c0_6, %c0_7] : memref<32x256xf32, #tpu.memory_space<vmem>>, vector<32x256xf32>
    tpu.vector_store %arg7[%c0_6, %c0_7], %7 {strides = array<i32>} : memref<32x256xf32, #tpu.memory_space<vmem>>, vector<32x256xf32>,
    %c0_i32_8 = arith.constant 0 : i32
    %9 = arith.cmpi eq, %arg2, %c0_i32_8 : i32
    %10 = arith.extui %9 : i1 to i32
    %c0_i32_9 = arith.constant 0 : i32
    %11 = arith.cmpi ne, %10, %c0_i32_9 : i32
    scf.if %11 {
      %c0_10 = arith.constant 0 : index
      %c0_11 = arith.constant 0 : index
      %12 = vector.load %arg7[%c0_10, %c0_11] : memref<32x256xf32, #tpu.memory_space<vmem>>, vector<32x256xf32>
      %c0_12 = arith.constant 0 : index
      %c0_13 = arith.constant 0 : index
      %13 = vector.load %arg5[%c0_12, %c0_13] : memref<1x256xf32, #tpu.memory_space<vmem>>, vector<1x256xf32>
      %14 = vector.broadcast %13 : vector<1x256xf32> to vector<32x256xf32>
      %15 = arith.addf %12, %14 : vector<32x256xf32>
      %16 = arith.mulf %15, %15 : vector<32x256xf32>
      %17 = arith.mulf %15, %16 : vector<32x256xf32>
      %cst_14 = arith.constant 4.471500e-02 : f32
      %18 = vector.broadcast %cst_14 : f32 to vector<32x256xf32>
      %19 = arith.mulf %18, %17 : vector<32x256xf32>
      %20 = arith.addf %15, %19 : vector<32x256xf32>
      %cst_15 = arith.constant 0.797884583 : f32
      %21 = vector.broadcast %cst_15 : f32 to vector<32x256xf32>
      %22 = arith.mulf %21, %20 : vector<32x256xf32>
      %23 = math.tanh %22 : vector<32x256xf32>
      %cst_16 = arith.constant 1.000000e+00 : f32
      %24 = vector.broadcast %cst_16 : f32 to vector<32x256xf32>
      %25 = arith.addf %24, %23 : vector<32x256xf32>
      %cst_17 = arith.constant 5.000000e-01 : f32
      %26 = vector.broadcast %cst_17 : f32 to vector<32x256xf32>
      %27 = arith.mulf %26, %25 : vector<32x256xf32>
      %28 = arith.mulf %15, %27 : vector<32x256xf32>
      %29 = arith.truncf %28 : vector<32x256xf32> to vector<32x256xbf16>
      %c0_18 = arith.constant 0 : index
      %c0_19 = arith.constant 0 : index
      %30 = vector.load %arg6[%c0_18, %c0_19] : memref<32x256xbf16, #tpu.memory_space<vmem>>, vector<32x256xbf16>
      tpu.vector_store %arg6[%c0_18, %c0_19], %29 {strides = array<i32>} : memref<32x256xbf16, #tpu.memory_space<vmem>>, vector<32x256xbf16>,
    } else {
    }
    return
  }
  func.func @transform_0(%arg0: i32, %arg1: i32, %arg2: i32) -> (i32, i32) {
    %c0_i32 = arith.constant 0 : i32
    return %arg0, %arg2 : i32, i32
  }
  func.func @transform_1(%arg0: i32, %arg1: i32, %arg2: i32) -> (i32, i32) {
    %c0_i32 = arith.constant 0 : i32
    return %arg2, %arg1 : i32, i32
  }
  func.func @transform_2(%arg0: i32, %arg1: i32, %arg2: i32) -> (i32, i32) {
    %c0_i32 = arith.constant 0 : i32
    %c0_i32_0 = arith.constant 0 : i32
    return %c0_i32, %arg1 : i32, i32
  }
  func.func @transform_3(%arg0: i32, %arg1: i32, %arg2: i32) -> (i32, i32) {
    %c0_i32 = arith.constant 0 : i32
    return %arg0, %arg1 : i32, i32
  }
}

module attributes {stable_mosaic.version = 11 : i64} {
  func.func @_matmul_kernel(%arg0: i32, %arg1: i32, %arg2: i32, %arg3: memref<16x128xbf16, #tpu.memory_space<vmem>>, %arg4: memref<128x384xbf16, #tpu.memory_space<vmem>>, %arg5: memref<1x384xf32, #tpu.memory_space<vmem>>, %arg6: memref<16x384xbf16, #tpu.memory_space<vmem>>, %arg7: memref<16x384xf32, #tpu.memory_space<vmem>>) attributes {dimension_semantics = [#tpu.dimension_semantics<parallel>, #tpu.dimension_semantics<parallel>, #tpu.dimension_semantics<arbitrary>], iteration_bounds = array<i64: 1, 1, 1>, scalar_prefetch = 0 : i64, scratch_operands = 1 : i64, tpu.core_type = #tpu.core_type<tc>, window_params = [{transform_indices = @transform_0, window_bounds = array<i64: 16, 128>}, {transform_indices = @transform_1, window_bounds = array<i64: 128, 384>}, {transform_indices = @transform_2, window_bounds = array<i64: 1, 384>}, {transform_indices = @transform_3, window_bounds = array<i64: 16, 384>}]} {
    %c0_i32 = arith.constant 0 : i32
    %0 = arith.cmpi eq, %arg2, %c0_i32 : i32
    %1 = arith.extui %0 : i1 to i32
    %c0_i32_0 = arith.constant 0 : i32
    %2 = arith.cmpi ne, %1, %c0_i32_0 : i32
    scf.if %2 {
      %cst_10 = arith.constant 0.000000e+00 : f32
      %12 = vector.broadcast %cst_10 : f32 to vector<16x384xf32>
      %c0_11 = arith.constant 0 : index
      %c0_12 = arith.constant 0 : index
      %13 = vector.load %arg7[%c0_11, %c0_12] : memref<16x384xf32, #tpu.memory_space<vmem>>, vector<16x384xf32>
      tpu.vector_store %arg7[%c0_11, %c0_12], %12 {strides = array<i32>} : memref<16x384xf32, #tpu.memory_space<vmem>>, vector<16x384xf32>,
    } else {
    }
    %c0 = arith.constant 0 : index
    %c0_1 = arith.constant 0 : index
    %3 = vector.load %arg7[%c0, %c0_1] : memref<16x384xf32, #tpu.memory_space<vmem>>, vector<16x384xf32>
    %c0_2 = arith.constant 0 : index
    %c0_3 = arith.constant 0 : index
    %4 = vector.load %arg3[%c0_2, %c0_3] : memref<16x128xbf16, #tpu.memory_space<vmem>>, vector<16x128xbf16>
    %c0_4 = arith.constant 0 : index
    %c0_5 = arith.constant 0 : index
    %5 = vector.load %arg4[%c0_4, %c0_5] : memref<128x384xbf16, #tpu.memory_space<vmem>>, vector<128x384xbf16>
    %cst = arith.constant dense<0.000000e+00> : vector<16x384xf32>
    %6 = tpu.matmul %4, %5, %cst {dimension_numbers = #tpu.dot_dimension_numbers<[1], [0], [0], [1], [0, 0, 1, 1], [], []>} : vector<16x128xbf16>, vector<128x384xbf16>, vector<16x384xf32> -> vector<16x384xf32>
    %7 = arith.addf %3, %6 : vector<16x384xf32>
    %c0_6 = arith.constant 0 : index
    %c0_7 = arith.constant 0 : index
    %8 = vector.load %arg7[%c0_6, %c0_7] : memref<16x384xf32, #tpu.memory_space<vmem>>, vector<16x384xf32>
    tpu.vector_store %arg7[%c0_6, %c0_7], %7 {strides = array<i32>} : memref<16x384xf32, #tpu.memory_space<vmem>>, vector<16x384xf32>,
    %c0_i32_8 = arith.constant 0 : i32
    %9 = arith.cmpi eq, %arg2, %c0_i32_8 : i32
    %10 = arith.extui %9 : i1 to i32
    %c0_i32_9 = arith.constant 0 : i32
    %11 = arith.cmpi ne, %10, %c0_i32_9 : i32
    scf.if %11 {
      %c0_10 = arith.constant 0 : index
      %c0_11 = arith.constant 0 : index
      %12 = vector.load %arg7[%c0_10, %c0_11] : memref<16x384xf32, #tpu.memory_space<vmem>>, vector<16x384xf32>
      %c0_12 = arith.constant 0 : index
      %c0_13 = arith.constant 0 : index
      %13 = vector.load %arg5[%c0_12, %c0_13] : memref<1x384xf32, #tpu.memory_space<vmem>>, vector<1x384xf32>
      %14 = vector.broadcast %13 : vector<1x384xf32> to vector<16x384xf32>
      %15 = arith.addf %12, %14 : vector<16x384xf32>
      %16 = arith.mulf %15, %15 : vector<16x384xf32>
      %17 = arith.mulf %15, %16 : vector<16x384xf32>
      %cst_14 = arith.constant 4.471500e-02 : f32
      %18 = vector.broadcast %cst_14 : f32 to vector<16x384xf32>
      %19 = arith.mulf %18, %17 : vector<16x384xf32>
      %20 = arith.addf %15, %19 : vector<16x384xf32>
      %cst_15 = arith.constant 0.797884583 : f32
      %21 = vector.broadcast %cst_15 : f32 to vector<16x384xf32>
      %22 = arith.mulf %21, %20 : vector<16x384xf32>
      %23 = math.tanh %22 : vector<16x384xf32>
      %cst_16 = arith.constant 1.000000e+00 : f32
      %24 = vector.broadcast %cst_16 : f32 to vector<16x384xf32>
      %25 = arith.addf %24, %23 : vector<16x384xf32>
      %cst_17 = arith.constant 5.000000e-01 : f32
      %26 = vector.broadcast %cst_17 : f32 to vector<16x384xf32>
      %27 = arith.mulf %26, %25 : vector<16x384xf32>
      %28 = arith.mulf %15, %27 : vector<16x384xf32>
      %29 = arith.truncf %28 : vector<16x384xf32> to vector<16x384xbf16>
      %c0_18 = arith.constant 0 : index
      %c0_19 = arith.constant 0 : index
      %30 = vector.load %arg6[%c0_18, %c0_19] : memref<16x384xbf16, #tpu.memory_space<vmem>>, vector<16x384xbf16>
      tpu.vector_store %arg6[%c0_18, %c0_19], %29 {strides = array<i32>} : memref<16x384xbf16, #tpu.memory_space<vmem>>, vector<16x384xbf16>,
    } else {
    }
    return
  }
  func.func @transform_0(%arg0: i32, %arg1: i32, %arg2: i32) -> (i32, i32) {
    %c0_i32 = arith.constant 0 : i32
    return %arg0, %arg2 : i32, i32
  }
  func.func @transform_1(%arg0: i32, %arg1: i32, %arg2: i32) -> (i32, i32) {
    %c0_i32 = arith.constant 0 : i32
    return %arg2, %arg1 : i32, i32
  }
  func.func @transform_2(%arg0: i32, %arg1: i32, %arg2: i32) -> (i32, i32) {
    %c0_i32 = arith.constant 0 : i32
    %c0_i32_0 = arith.constant 0 : i32
    return %c0_i32, %arg1 : i32, i32
  }
  func.func @transform_3(%arg0: i32, %arg1: i32, %arg2: i32) -> (i32, i32) {
    %c0_i32 = arith.constant 0 : i32
    return %arg0, %arg1 : i32, i32
  }
}

module attributes {stable_mosaic.version = 11 : i64} {
  func.func @_conv3_kernel(%arg0: i32, %arg1: memref<16x256xbf16, #tpu.memory_space<vmem>>, %arg2: memref<16x256xbf16, #tpu.memory_space<vmem>>, %arg3: memref<16x256xbf16, #tpu.memory_space<vmem>>, %arg4: memref<256x384xbf16, #tpu.memory_space<vmem>>, %arg5: memref<256x384xbf16, #tpu.memory_space<vmem>>, %arg6: memref<256x384xbf16, #tpu.memory_space<vmem>>, %arg7: memref<1x384xf32, #tpu.memory_space<vmem>>, %arg8: memref<16x384xbf16, #tpu.memory_space<vmem>>, %arg9: memref<16x384xbf16, #tpu.memory_space<vmem>>) attributes {dimension_semantics = [#tpu.dimension_semantics<parallel>], iteration_bounds = array<i64: 1>, scalar_prefetch = 0 : i64, scratch_operands = 0 : i64, tpu.core_type = #tpu.core_type<tc>, window_params = [{transform_indices = @transform_0, window_bounds = array<i64: 16, 256>}, {transform_indices = @transform_1, window_bounds = array<i64: 16, 256>}, {transform_indices = @transform_2, window_bounds = array<i64: 16, 256>}, {pipeline_mode = #tpu.pipeline_mode<synchronous>, transform_indices = @transform_3, window_bounds = array<i64: 256, 384>}, {pipeline_mode = #tpu.pipeline_mode<synchronous>, transform_indices = @transform_4, window_bounds = array<i64: 256, 384>}, {pipeline_mode = #tpu.pipeline_mode<synchronous>, transform_indices = @transform_5, window_bounds = array<i64: 256, 384>}, {pipeline_mode = #tpu.pipeline_mode<synchronous>, transform_indices = @transform_6, window_bounds = array<i64: 1, 384>}, {transform_indices = @transform_7, window_bounds = array<i64: 16, 384>}, {transform_indices = @transform_8, window_bounds = array<i64: 16, 384>}]} {
    %c0 = arith.constant 0 : index
    %c0_0 = arith.constant 0 : index
    %0 = vector.load %arg1[%c0, %c0_0] : memref<16x256xbf16, #tpu.memory_space<vmem>>, vector<16x256xbf16>
    %c0_1 = arith.constant 0 : index
    %c0_2 = arith.constant 0 : index
    %1 = vector.load %arg4[%c0_1, %c0_2] : memref<256x384xbf16, #tpu.memory_space<vmem>>, vector<256x384xbf16>
    %cst = arith.constant dense<0.000000e+00> : vector<16x384xf32>
    %2 = tpu.matmul %0, %1, %cst {dimension_numbers = #tpu.dot_dimension_numbers<[1], [0], [0], [1], [0, 0, 1, 1], [], []>} : vector<16x256xbf16>, vector<256x384xbf16>, vector<16x384xf32> -> vector<16x384xf32>
    %c0_3 = arith.constant 0 : index
    %c0_4 = arith.constant 0 : index
    %3 = vector.load %arg2[%c0_3, %c0_4] : memref<16x256xbf16, #tpu.memory_space<vmem>>, vector<16x256xbf16>
    %c0_5 = arith.constant 0 : index
    %c0_6 = arith.constant 0 : index
    %4 = vector.load %arg5[%c0_5, %c0_6] : memref<256x384xbf16, #tpu.memory_space<vmem>>, vector<256x384xbf16>
    %cst_7 = arith.constant dense<0.000000e+00> : vector<16x384xf32>
    %5 = tpu.matmul %3, %4, %cst_7 {dimension_numbers = #tpu.dot_dimension_numbers<[1], [0], [0], [1], [0, 0, 1, 1], [], []>} : vector<16x256xbf16>, vector<256x384xbf16>, vector<16x384xf32> -> vector<16x384xf32>
    %6 = arith.addf %2, %5 : vector<16x384xf32>
    %c0_8 = arith.constant 0 : index
    %c0_9 = arith.constant 0 : index
    %7 = vector.load %arg3[%c0_8, %c0_9] : memref<16x256xbf16, #tpu.memory_space<vmem>>, vector<16x256xbf16>
    %c0_10 = arith.constant 0 : index
    %c0_11 = arith.constant 0 : index
    %8 = vector.load %arg6[%c0_10, %c0_11] : memref<256x384xbf16, #tpu.memory_space<vmem>>, vector<256x384xbf16>
    %cst_12 = arith.constant dense<0.000000e+00> : vector<16x384xf32>
    %9 = tpu.matmul %7, %8, %cst_12 {dimension_numbers = #tpu.dot_dimension_numbers<[1], [0], [0], [1], [0, 0, 1, 1], [], []>} : vector<16x256xbf16>, vector<256x384xbf16>, vector<16x384xf32> -> vector<16x384xf32>
    %10 = arith.addf %6, %9 : vector<16x384xf32>
    %c0_13 = arith.constant 0 : index
    %c0_14 = arith.constant 0 : index
    %11 = vector.load %arg7[%c0_13, %c0_14] : memref<1x384xf32, #tpu.memory_space<vmem>>, vector<1x384xf32>
    %12 = vector.broadcast %11 : vector<1x384xf32> to vector<16x384xf32>
    %13 = arith.addf %10, %12 : vector<16x384xf32>
    %14 = arith.mulf %13, %13 : vector<16x384xf32>
    %15 = arith.mulf %13, %14 : vector<16x384xf32>
    %cst_15 = arith.constant 4.471500e-02 : f32
    %16 = vector.broadcast %cst_15 : f32 to vector<16x384xf32>
    %17 = arith.mulf %16, %15 : vector<16x384xf32>
    %18 = arith.addf %13, %17 : vector<16x384xf32>
    %cst_16 = arith.constant 0.797884583 : f32
    %19 = vector.broadcast %cst_16 : f32 to vector<16x384xf32>
    %20 = arith.mulf %19, %18 : vector<16x384xf32>
    %21 = math.tanh %20 : vector<16x384xf32>
    %cst_17 = arith.constant 1.000000e+00 : f32
    %22 = vector.broadcast %cst_17 : f32 to vector<16x384xf32>
    %23 = arith.addf %22, %21 : vector<16x384xf32>
    %cst_18 = arith.constant 5.000000e-01 : f32
    %24 = vector.broadcast %cst_18 : f32 to vector<16x384xf32>
    %25 = arith.mulf %24, %23 : vector<16x384xf32>
    %26 = arith.mulf %13, %25 : vector<16x384xf32>
    %c0_19 = arith.constant 0 : index
    %c0_20 = arith.constant 0 : index
    %27 = vector.load %arg8[%c0_19, %c0_20] : memref<16x384xbf16, #tpu.memory_space<vmem>>, vector<16x384xbf16>
    %28 = arith.extf %27 : vector<16x384xbf16> to vector<16x384xf32>
    %29 = arith.addf %26, %28 : vector<16x384xf32>
    %30 = arith.truncf %29 : vector<16x384xf32> to vector<16x384xbf16>
    %c0_21 = arith.constant 0 : index
    %c0_22 = arith.constant 0 : index
    %31 = vector.load %arg9[%c0_21, %c0_22] : memref<16x384xbf16, #tpu.memory_space<vmem>>, vector<16x384xbf16>
    tpu.vector_store %arg9[%c0_21, %c0_22], %30 {strides = array<i32>} : memref<16x384xbf16, #tpu.memory_space<vmem>>, vector<16x384xbf16>,
    return
  }
  func.func @transform_0(%arg0: i32) -> (i32, i32) {
    %c0_i32 = arith.constant 0 : i32
    %c0_i32_0 = arith.constant 0 : i32
    return %arg0, %c0_i32 : i32, i32
  }
  func.func @transform_1(%arg0: i32) -> (i32, i32) {
    %c0_i32 = arith.constant 0 : i32
    %c0_i32_0 = arith.constant 0 : i32
    return %arg0, %c0_i32 : i32, i32
  }
  func.func @transform_2(%arg0: i32) -> (i32, i32) {
    %c0_i32 = arith.constant 0 : i32
    %c0_i32_0 = arith.constant 0 : i32
    return %arg0, %c0_i32 : i32, i32
  }
  func.func @transform_3(%arg0: i32) -> (i32, i32) {
    %c0_i32 = arith.constant 0 : i32
    %c0_i32_0 = arith.constant 0 : i32
    %c0_i32_1 = arith.constant 0 : i32
    return %c0_i32, %c0_i32_0 : i32, i32
  }
  func.func @transform_4(%arg0: i32) -> (i32, i32) {
    %c0_i32 = arith.constant 0 : i32
    %c0_i32_0 = arith.constant 0 : i32
    %c0_i32_1 = arith.constant 0 : i32
    return %c0_i32, %c0_i32_0 : i32, i32
  }
  func.func @transform_5(%arg0: i32) -> (i32, i32) {
    %c0_i32 = arith.constant 0 : i32
    %c0_i32_0 = arith.constant 0 : i32
    %c0_i32_1 = arith.constant 0 : i32
    return %c0_i32, %c0_i32_0 : i32, i32
  }
  func.func @transform_6(%arg0: i32) -> (i32, i32) {
    %c0_i32 = arith.constant 0 : i32
    %c0_i32_0 = arith.constant 0 : i32
    %c0_i32_1 = arith.constant 0 : i32
    return %c0_i32, %c0_i32_0 : i32, i32
  }
  func.func @transform_7(%arg0: i32) -> (i32, i32) {
    %c0_i32 = arith.constant 0 : i32
    %c0_i32_0 = arith.constant 0 : i32
    return %arg0, %c0_i32 : i32, i32
  }
  func.func @transform_8(%arg0: i32) -> (i32, i32) {
    %c0_i32 = arith.constant 0 : i32
    %c0_i32_0 = arith.constant 0 : i32
    return %arg0, %c0_i32 : i32, i32
  }
}

module attributes {stable_mosaic.version = 11 : i64} {
  func.func @_conv3_kernel(%arg0: i32, %arg1: memref<8x384xbf16, #tpu.memory_space<vmem>>, %arg2: memref<8x384xbf16, #tpu.memory_space<vmem>>, %arg3: memref<8x384xbf16, #tpu.memory_space<vmem>>, %arg4: memref<384x128xbf16, #tpu.memory_space<vmem>>, %arg5: memref<384x128xbf16, #tpu.memory_space<vmem>>, %arg6: memref<384x128xbf16, #tpu.memory_space<vmem>>, %arg7: memref<1x128xf32, #tpu.memory_space<vmem>>, %arg8: memref<8x128xbf16, #tpu.memory_space<vmem>>) attributes {dimension_semantics = [#tpu.dimension_semantics<parallel>], iteration_bounds = array<i64: 1>, scalar_prefetch = 0 : i64, scratch_operands = 0 : i64, tpu.core_type = #tpu.core_type<tc>, window_params = [{transform_indices = @transform_0, window_bounds = array<i64: 8, 384>}, {transform_indices = @transform_1, window_bounds = array<i64: 8, 384>}, {transform_indices = @transform_2, window_bounds = array<i64: 8, 384>}, {pipeline_mode = #tpu.pipeline_mode<synchronous>, transform_indices = @transform_3, window_bounds = array<i64: 384, 128>}, {pipeline_mode = #tpu.pipeline_mode<synchronous>, transform_indices = @transform_4, window_bounds = array<i64: 384, 128>}, {pipeline_mode = #tpu.pipeline_mode<synchronous>, transform_indices = @transform_5, window_bounds = array<i64: 384, 128>}, {pipeline_mode = #tpu.pipeline_mode<synchronous>, transform_indices = @transform_6, window_bounds = array<i64: 1, 128>}, {transform_indices = @transform_7, window_bounds = array<i64: 8, 128>}]} {
    %c0 = arith.constant 0 : index
    %c0_0 = arith.constant 0 : index
    %0 = vector.load %arg1[%c0, %c0_0] : memref<8x384xbf16, #tpu.memory_space<vmem>>, vector<8x384xbf16>
    %c0_1 = arith.constant 0 : index
    %c0_2 = arith.constant 0 : index
    %1 = vector.load %arg4[%c0_1, %c0_2] : memref<384x128xbf16, #tpu.memory_space<vmem>>, vector<384x128xbf16>
    %cst = arith.constant dense<0.000000e+00> : vector<8x128xf32>
    %2 = tpu.matmul %0, %1, %cst {dimension_numbers = #tpu.dot_dimension_numbers<[1], [0], [0], [1], [0, 0, 1, 1], [], []>} : vector<8x384xbf16>, vector<384x128xbf16>, vector<8x128xf32> -> vector<8x128xf32>
    %c0_3 = arith.constant 0 : index
    %c0_4 = arith.constant 0 : index
    %3 = vector.load %arg2[%c0_3, %c0_4] : memref<8x384xbf16, #tpu.memory_space<vmem>>, vector<8x384xbf16>
    %c0_5 = arith.constant 0 : index
    %c0_6 = arith.constant 0 : index
    %4 = vector.load %arg5[%c0_5, %c0_6] : memref<384x128xbf16, #tpu.memory_space<vmem>>, vector<384x128xbf16>
    %cst_7 = arith.constant dense<0.000000e+00> : vector<8x128xf32>
    %5 = tpu.matmul %3, %4, %cst_7 {dimension_numbers = #tpu.dot_dimension_numbers<[1], [0], [0], [1], [0, 0, 1, 1], [], []>} : vector<8x384xbf16>, vector<384x128xbf16>, vector<8x128xf32> -> vector<8x128xf32>
    %6 = arith.addf %2, %5 : vector<8x128xf32>
    %c0_8 = arith.constant 0 : index
    %c0_9 = arith.constant 0 : index
    %7 = vector.load %arg3[%c0_8, %c0_9] : memref<8x384xbf16, #tpu.memory_space<vmem>>, vector<8x384xbf16>
    %c0_10 = arith.constant 0 : index
    %c0_11 = arith.constant 0 : index
    %8 = vector.load %arg6[%c0_10, %c0_11] : memref<384x128xbf16, #tpu.memory_space<vmem>>, vector<384x128xbf16>
    %cst_12 = arith.constant dense<0.000000e+00> : vector<8x128xf32>
    %9 = tpu.matmul %7, %8, %cst_12 {dimension_numbers = #tpu.dot_dimension_numbers<[1], [0], [0], [1], [0, 0, 1, 1], [], []>} : vector<8x384xbf16>, vector<384x128xbf16>, vector<8x128xf32> -> vector<8x128xf32>
    %10 = arith.addf %6, %9 : vector<8x128xf32>
    %c0_13 = arith.constant 0 : index
    %c0_14 = arith.constant 0 : index
    %11 = vector.load %arg7[%c0_13, %c0_14] : memref<1x128xf32, #tpu.memory_space<vmem>>, vector<1x128xf32>
    %12 = vector.broadcast %11 : vector<1x128xf32> to vector<8x128xf32>
    %13 = arith.addf %10, %12 : vector<8x128xf32>
    %14 = arith.mulf %13, %13 : vector<8x128xf32>
    %15 = arith.mulf %13, %14 : vector<8x128xf32>
    %cst_15 = arith.constant 4.471500e-02 : f32
    %16 = vector.broadcast %cst_15 : f32 to vector<8x128xf32>
    %17 = arith.mulf %16, %15 : vector<8x128xf32>
    %18 = arith.addf %13, %17 : vector<8x128xf32>
    %cst_16 = arith.constant 0.797884583 : f32
    %19 = vector.broadcast %cst_16 : f32 to vector<8x128xf32>
    %20 = arith.mulf %19, %18 : vector<8x128xf32>
    %21 = math.tanh %20 : vector<8x128xf32>
    %cst_17 = arith.constant 1.000000e+00 : f32
    %22 = vector.broadcast %cst_17 : f32 to vector<8x128xf32>
    %23 = arith.addf %22, %21 : vector<8x128xf32>
    %cst_18 = arith.constant 5.000000e-01 : f32
    %24 = vector.broadcast %cst_18 : f32 to vector<8x128xf32>
    %25 = arith.mulf %24, %23 : vector<8x128xf32>
    %26 = arith.mulf %13, %25 : vector<8x128xf32>
    %27 = arith.truncf %26 : vector<8x128xf32> to vector<8x128xbf16>
    %c0_19 = arith.constant 0 : index
    %c0_20 = arith.constant 0 : index
    %28 = vector.load %arg8[%c0_19, %c0_20] : memref<8x128xbf16, #tpu.memory_space<vmem>>, vector<8x128xbf16>
    tpu.vector_store %arg8[%c0_19, %c0_20], %27 {strides = array<i32>} : memref<8x128xbf16, #tpu.memory_space<vmem>>, vector<8x128xbf16>,
    return
  }
  func.func @transform_0(%arg0: i32) -> (i32, i32) {
    %c0_i32 = arith.constant 0 : i32
    %c0_i32_0 = arith.constant 0 : i32
    return %arg0, %c0_i32 : i32, i32
  }
  func.func @transform_1(%arg0: i32) -> (i32, i32) {
    %c0_i32 = arith.constant 0 : i32
    %c0_i32_0 = arith.constant 0 : i32
    return %arg0, %c0_i32 : i32, i32
  }
  func.func @transform_2(%arg0: i32) -> (i32, i32) {
    %c0_i32 = arith.constant 0 : i32
    %c0_i32_0 = arith.constant 0 : i32
    return %arg0, %c0_i32 : i32, i32
  }
  func.func @transform_3(%arg0: i32) -> (i32, i32) {
    %c0_i32 = arith.constant 0 : i32
    %c0_i32_0 = arith.constant 0 : i32
    %c0_i32_1 = arith.constant 0 : i32
    return %c0_i32, %c0_i32_0 : i32, i32
  }
  func.func @transform_4(%arg0: i32) -> (i32, i32) {
    %c0_i32 = arith.constant 0 : i32
    %c0_i32_0 = arith.constant 0 : i32
    %c0_i32_1 = arith.constant 0 : i32
    return %c0_i32, %c0_i32_0 : i32, i32
  }
  func.func @transform_5(%arg0: i32) -> (i32, i32) {
    %c0_i32 = arith.constant 0 : i32
    %c0_i32_0 = arith.constant 0 : i32
    %c0_i32_1 = arith.constant 0 : i32
    return %c0_i32, %c0_i32_0 : i32, i32
  }
  func.func @transform_6(%arg0: i32) -> (i32, i32) {
    %c0_i32 = arith.constant 0 : i32
    %c0_i32_0 = arith.constant 0 : i32
    %c0_i32_1 = arith.constant 0 : i32
    return %c0_i32, %c0_i32_0 : i32, i32
  }
  func.func @transform_7(%arg0: i32) -> (i32, i32) {
    %c0_i32 = arith.constant 0 : i32
    %c0_i32_0 = arith.constant 0 : i32
    return %arg0, %c0_i32 : i32, i32
  }
}

module attributes {stable_mosaic.version = 11 : i64} {
  func.func @_gate_pool_feat_kernel(%arg0: memref<2x4x128xbf16, #tpu.memory_space<vmem>>, %arg1: memref<2x4x128xbf16, #tpu.memory_space<vmem>>, %arg2: memref<128x256xbf16, #tpu.memory_space<vmem>>, %arg3: memref<1x256xf32, #tpu.memory_space<vmem>>, %arg4: memref<2x256xf32, #tpu.memory_space<vmem>>) attributes {dimension_semantics = [], scalar_prefetch = 0 : i64, scratch_operands = 0 : i64, tpu.core_type = #tpu.core_type<tc>} {
    %c0 = arith.constant 0 : index
    %c0_0 = arith.constant 0 : index
    %c0_1 = arith.constant 0 : index
    %0 = vector.load %arg0[%c0, %c0_0, %c0_1] : memref<2x4x128xbf16, #tpu.memory_space<vmem>>, vector<2x4x128xbf16>
    %1 = arith.extf %0 : vector<2x4x128xbf16> to vector<2x4x128xf32>
    %c0_2 = arith.constant 0 : index
    %c0_3 = arith.constant 0 : index
    %c0_4 = arith.constant 0 : index
    %2 = vector.load %arg1[%c0_2, %c0_3, %c0_4] : memref<2x4x128xbf16, #tpu.memory_space<vmem>>, vector<2x4x128xbf16>
    %3 = arith.extf %2 : vector<2x4x128xbf16> to vector<2x4x128xf32>
    %4 = arith.addf %1, %3 : vector<2x4x128xf32>
    %cst = arith.constant dense<0.000000e+00> : vector<2x4xf32>
    %5 = vector.multi_reduction <add>, %4, %cst [2] : vector<2x4x128xf32> to vector<2x4xf32>
    %cst_5 = arith.constant 1.280000e+02 : f32
    %6 = vector.broadcast %cst_5 : f32 to vector<2x4xf32>
    %7 = arith.divf %5, %6 : vector<2x4xf32>
    %cst_6 = arith.constant dense<0xFF800000> : vector<2xf32>
    %8 = vector.multi_reduction <maximumf>, %7, %cst_6 [1] : vector<2x4xf32> to vector<2xf32>
    %cst_7 = arith.constant 0xFF800000 : f32
    %9 = vector.broadcast %cst_7 : f32 to vector<2xf32>
    %10 = arith.maximumf %9, %8 : vector<2xf32>
    %11 = vector.shape_cast %10 : vector<2xf32> to vector<2x1xf32>
    %12 = vector.broadcast %11 : vector<2x1xf32> to vector<2x4xf32>
    %13 = arith.subf %7, %12 : vector<2x4xf32>
    %14 = math.exp %13 : vector<2x4xf32>
    %cst_8 = arith.constant dense<0.000000e+00> : vector<2xf32>
    %15 = vector.multi_reduction <add>, %14, %cst_8 [1] : vector<2x4xf32> to vector<2xf32>
    %16 = vector.shape_cast %15 : vector<2xf32> to vector<2x1xf32>
    %17 = vector.broadcast %16 : vector<2x1xf32> to vector<2x4xf32>
    %18 = arith.divf %14, %17 : vector<2x4xf32>
    %19 = vector.shape_cast %18 : vector<2x4xf32> to vector<2x4x1xf32>
    %20 = vector.broadcast %19 : vector<2x4x1xf32> to vector<2x4x128xf32>
    %21 = arith.mulf %1, %20 : vector<2x4x128xf32>
    %cst_9 = arith.constant dense<0.000000e+00> : vector<2x128xf32>
    %22 = vector.multi_reduction <add>, %21, %cst_9 [1] : vector<2x4x128xf32> to vector<2x128xf32>
    %23 = arith.truncf %22 : vector<2x128xf32> to vector<2x128xbf16>
    %c0_10 = arith.constant 0 : index
    %c0_11 = arith.constant 0 : index
    %24 = vector.load %arg2[%c0_10, %c0_11] : memref<128x256xbf16, #tpu.memory_space<vmem>>, vector<128x256xbf16>
    %cst_12 = arith.constant dense<0.000000e+00> : vector<2x256xf32>
    %25 = tpu.matmul %23, %24, %cst_12 {dimension_numbers = #tpu.dot_dimension_numbers<[1], [0], [0], [1], [0, 0, 1, 1], [], []>} : vector<2x128xbf16>, vector<128x256xbf16>, vector<2x256xf32> -> vector<2x256xf32>
    %c0_13 = arith.constant 0 : index
    %c0_14 = arith.constant 0 : index
    %26 = vector.load %arg3[%c0_13, %c0_14] : memref<1x256xf32, #tpu.memory_space<vmem>>, vector<1x256xf32>
    %27 = vector.broadcast %26 : vector<1x256xf32> to vector<2x256xf32>
    %28 = arith.addf %25, %27 : vector<2x256xf32>
    %c0_15 = arith.constant 0 : index
    %c0_16 = arith.constant 0 : index
    %29 = vector.load %arg4[%c0_15, %c0_16] : memref<2x256xf32, #tpu.memory_space<vmem>>, vector<2x256xf32>
    tpu.vector_store %arg4[%c0_15, %c0_16], %28 {strides = array<i32>} : memref<2x256xf32, #tpu.memory_space<vmem>>, vector<2x256xf32>,
    return
  }
}

</mosaic_0001>

<bundles_post_ra>
// kernel: gseqformer_forward.14
= control target key start
LH: loop header
LB: loop body
LE: loop exit
PB: predicated region body
PF: predicated region fallthrough
CT: control target
= control target key end

     0   :  { %v205_v0 = vmov 0.0   ;;  %vm206_vm0 = vmmov 0   ;;  %s260_s1 = inlined_call_operand.vmem [shape: bf16[128,128], index: 1, kind: input, shape index: {}]   ;;  %s261_s0 = inlined_call_operand.vmem [shape: bf16[8,128], index: 0, kind: input, shape index: {}]   ;;  %s262_s2 = inlined_call_operand.vmem [shape: f32[1,128], index: 2, kind: input, shape index: {}]   ;;  %s263_s3 = inlined_call_operand.vmem [shape: bf16[8,128], index: 3, kind: output, shape index: {}]  }
   0x1   :  { %173 = vmatprep.subr.bf16.mxu0 %v205_v0  ;;  %v195_v1 = vld [vmem:[%s260_s1] sm:$0xff]   ;;  %189 = vmatprep.mubr.msk.bf16.mxu0 %vm206_vm0, %v205_v0  ;;  %v196_v2 = vld [vmem:[%s260_s1 + $0x8] sm:$0xff]   ;;  %v197_v3 = vld [vmem:[%s260_s1 + $0x10] sm:$0xff]  }
   0x2   :  { %174 = vmatpush3.bf16.msra.mxu0 %v195_v1  ;;  %v198_v4 = vld [vmem:[%s260_s1 + $0x18] sm:$0xff]   ;;  %v199_v5 = vld [vmem:[%s260_s1 + $0x20] sm:$0xff]   ;;  %v200_v6 = vld [vmem:[%s260_s1 + $0x28] sm:$0xff]  }
   0x3   :  { %175 = vmatprep.subr.bf16.mxu0 %v205_v0  ;;  %v201_v7 = vld [vmem:[%s260_s1 + $0x30] sm:$0xff]   ;;  %v202_v8 = vld [vmem:[%s260_s1 + $0x38] sm:$0xff]   ;;  %v21_v9 = vld [vmem:[%s261_s0] sm:$0xf] }
   0x4   :  { %v163_v10 = vld [vmem:[%s262_s2] ss:$0 sm:$0xff] }
   0x6   :  { %176 = vmatpush3.bf16.msra.mxu0 %v196_v2 }
   0x7   :  { %177 = vmatprep.subr.bf16.mxu0 %v205_v0 }
   0xa   :  { %178 = vmatpush3.bf16.msra.mxu0 %v197_v3 }
   0xb   :  { %179 = vmatprep.subr.bf16.mxu0 %v205_v0 }
   0xe   :  { %180 = vmatpush3.bf16.msra.mxu0 %v198_v4 }
   0xf   :  { %181 = vmatprep.subr.bf16.mxu0 %v205_v0 }
  0x12   :  { %182 = vmatpush3.bf16.msra.mxu0 %v199_v5 }
  0x13   :  { %183 = vmatprep.subr.bf16.mxu0 %v205_v0 }
  0x16   :  { %184 = vmatpush3.bf16.msra.mxu0 %v200_v6 }
  0x17   :  { %185 = vmatprep.subr.bf16.mxu0 %v205_v0 }
  0x1a   :  { %186 = vmatpush3.bf16.msra.mxu0 %v201_v7 }
  0x1b   :  { %187 = vmatprep.subr.bf16.mxu0 %v205_v0 }
  0x1e   :  { %188 = vmatpush3.bf16.msra.mxu0 %v202_v8 }
  0x21   :  { %190 = vmatmul.mubr.bf16.vlgmr.msra.gmra.mrb[0].mxu0 %v21_v9 }
  0xf4   :  { %v120_v11 = vpop.f32.mrb[0].mxu0 }
  0xf5   :  { %v139_v12 = vadd.f32 %v163_v10, %v120_v11  ;;  %v191_v13 = vpop.f32.mrb[1].mxu0 }
  0xf6   :  { %v123_v14 = vpop.f32.mrb[2].mxu0 }
  0xf7   :  { %v140_v15 = vmul.f32 %v139_v12, %v139_v12  ;;  %v192_v16 = vpop.f32.mrb[3].mxu0 }
  0xf9   :  { %v141_v17 = vmul.f32 %v140_v15, %v139_v12 }
  0xfb   :  { %v142_v18 = vmul.f32 0.044715, %v141_v17 }
  0xfd   :  { %v143_v19 = vadd.f32 %v142_v18, %v139_v12 }
  0xff   :  { %v144_v20 = vmul.f32 0.7978846, %v143_v19 }
 0x101   :  { %203 = vtanh.f32 %v144_v20 }
 0x10b   :  { %v204_v21 = vpop.eup %203 }
 0x10c   :  { %v146_v22 = vadd.f32 1.0, %v204_v21 }
 0x10e   :  { %v147_v23 = vmul.f32 0.5, %v146_v22 }
 0x110   :  { %v148_v24 = vmul.f32 %v147_v23, %v139_v12 }
 0x112   :  { %v149_v25 = vpack.c.bf16 %v148_v24, %v148_v24 }
 0x114   :  { %150 = vst [vmem:[%s263_s3] sm:$0xf] %v149_v25 }

// kernel: gseqformer_forward.15
= control target key start
LH: loop header
LB: loop body
LE: loop exit
PB: predicated region body
PF: predicated region fallthrough
CT: control target
= control target key end

     0   :  { %v410_v0 = vmov 0.0   ;;  %vm411_vm0 = vmmov 0   ;;  %v412_v3 = vmov 0   ;;  %v281_v27 = vlaneseq  ;;  %s517_s1 = inlined_call_operand.vmem [shape: bf16[128,384], index: 1, kind: input, shape index: {}]   ;;  %s518_s0 = inlined_call_operand.vmem [shape: bf16[8,128], index: 0, kind: input, shape index: {}]   ;;  %s519_s2 = inlined_call_operand.vmem [shape: f32[1,384], index: 2, kind: input, shape index: {}]   ;;  %s520_s3 = inlined_call_operand.vmem [shape: bf16[8,384], index: 3, kind: output, shape index: {}]  }
   0x1   :  { %355 = vmatprep.subr.bf16.mxu1 %v410_v0  ;;  %v378_v1 = vld [vmem:[%s517_s1 + $0x4] ss:$12 sps:$4 sm:$0xff]   ;;  %371 = vmatprep.mubr.msk.bf16.mxu1 %vm411_vm0, %v410_v0  ;;  %v380_v2 = vld [vmem:[%s517_s1 + $0x8] ss:$12 sps:$4 sm:$0xff]   ;;  %v381_v4 = vld [vmem:[%s517_s1] ss:$12 sps:$4 sm:$0xff]  }
   0x2   :  { %218 = vmatprep.mubr.bf16.mxu0 %v412_v3  ;;  %186 = vmatprep.subr.bf16.mxu0 %v378_v1  ;;  %v382_v5 = vld [vmem:[%s517_s1 + $0x1c] ss:$12 sps:$4 sm:$0xff]   ;;  %v384_v6 = vld [vmem:[%s517_s1 + $0x20] ss:$12 sps:$4 sm:$0xff]   ;;  %v385_v7 = vld [vmem:[%s517_s1 + $0x18] ss:$12 sps:$4 sm:$0xff]  }
   0x3   :  { %356 = vmatpush3.bf16.msra.mxu1 %v380_v2  ;;  %187 = vmatpush1.bf16.msra.mxu0 %v381_v4  ;;  %v386_v8 = vld [vmem:[%s517_s1 + $0x34] ss:$12 sps:$4 sm:$0xff]   ;;  %v388_v9 = vld [vmem:[%s517_s1 + $0x38] ss:$12 sps:$4 sm:$0xff]   ;;  %v389_v10 = vld [vmem:[%s517_s1 + $0x30] ss:$12 sps:$4 sm:$0xff]  }
   0x4   :  { %357 = vmatprep.subr.bf16.mxu1 %v410_v0  ;;  %188 = vmatprep.subr.bf16.mxu0 %v382_v5  ;;  %v390_v11 = vld [vmem:[%s517_s1 + $0x4c] ss:$12 sps:$4 sm:$0xff]   ;;  %v392_v12 = vld [vmem:[%s517_s1 + $0x50] ss:$12 sps:$4 sm:$0xff]   ;;  %v393_v13 = vld [vmem:[%s517_s1 + $0x48] ss:$12 sps:$4 sm:$0xff]  }
   0x5   :  { %v394_v14 = vld [vmem:[%s517_s1 + $0x64] ss:$12 sps:$4 sm:$0xff]   ;;  %v396_v15 = vld [vmem:[%s517_s1 + $0x68] ss:$12 sps:$4 sm:$0xff]   ;;  %v397_v16 = vld [vmem:[%s517_s1 + $0x60] ss:$12 sps:$4 sm:$0xff]  }
   0x6   :  { %v398_v17 = vld [vmem:[%s517_s1 + $0x7c] ss:$12 sps:$4 sm:$0xff]   ;;  %v400_v18 = vld [vmem:[%s517_s1 + $0x80] ss:$12 sps:$4 sm:$0xff]   ;;  %v401_v19 = vld [vmem:[%s517_s1 + $0x78] ss:$12 sps:$4 sm:$0xff]  }
   0x7   :  { %358 = vmatpush3.bf16.msra.mxu1 %v384_v6  ;;  %189 = vmatpush1.bf16.msra.mxu0 %v385_v7  ;;  %v402_v20 = vld [vmem:[%s517_s1 + $0x94] ss:$12 sps:$4 sm:$0xff]   ;;  %v404_v21 = vld [vmem:[%s517_s1 + $0x98] ss:$12 sps:$4 sm:$0xff]   ;;  %v405_v22 = vld [vmem:[%s517_s1 + $0x90] ss:$12 sps:$4 sm:$0xff]  }
   0x8   :  { %359 = vmatprep.subr.bf16.mxu1 %v410_v0  ;;  %190 = vmatprep.subr.bf16.mxu0 %v386_v8  ;;  %v406_v23 = vld [vmem:[%s517_s1 + $0xac] ss:$12 sps:$4 sm:$0xff]   ;;  %v408_v24 = vld [vmem:[%s517_s1 + $0xb0] ss:$12 sps:$4 sm:$0xff]   ;;  %v409_v25 = vld [vmem:[%s517_s1 + $0xa8] ss:$12 sps:$4 sm:$0xff]  }
   0x9   :  { %v25_v26 = vld [vmem:[%s518_s0] sm:$0xf]  ;;  %v282_v28 = vshrl.u32 %v281_v27, 7 }
   0xa   :  { %v279_v30 = vld [vmem:[%s519_s2] sm:$0x7] }
   0xb   :  { %360 = vmatpush3.bf16.msra.mxu1 %v388_v9  ;;  %191 = vmatpush1.bf16.msra.mxu0 %v389_v10  ;;  %v291_v29 = vsub.s32 2, %v282_v28  ;;  %v283_v31 = vsub.s32 0, %v282_v28  ;;  %v287_v32 = vsub.s32 1, %v282_v28 }
   0xc   :  { %361 = vmatprep.subr.bf16.mxu1 %v410_v0  ;;  %192 = vmatprep.subr.bf16.mxu0 %v390_v11 }
   0xd   :  { %v292_v33 = vrot.slane %v279_v30, %v291_v29  ;;  %v284_v34 = vrot.slane %v279_v30, %v283_v31  ;;  %v288_v35 = vrot.slane %v279_v30, %v287_v32 }
   0xf   :  { %362 = vmatpush3.bf16.msra.mxu1 %v392_v12  ;;  %193 = vmatpush1.bf16.msra.mxu0 %v393_v13 }
  0x10   :  { %363 = vmatprep.subr.bf16.mxu1 %v410_v0  ;;  %194 = vmatprep.subr.bf16.mxu0 %v394_v14 }
  0x13   :  { %364 = vmatpush3.bf16.msra.mxu1 %v396_v15  ;;  %195 = vmatpush1.bf16.msra.mxu0 %v397_v16 }
  0x14   :  { %365 = vmatprep.subr.bf16.mxu1 %v410_v0  ;;  %196 = vmatprep.subr.bf16.mxu0 %v398_v17 }
  0x17   :  { %366 = vmatpush3.bf16.msra.mxu1 %v400_v18  ;;  %197 = vmatpush1.bf16.msra.mxu0 %v401_v19 }
  0x18   :  { %367 = vmatprep.subr.bf16.mxu1 %v410_v0  ;;  %198 = vmatprep.subr.bf16.mxu0 %v402_v20 }
  0x1b   :  { %368 = vmatpush3.bf16.msra.mxu1 %v404_v21  ;;  %199 = vmatpush1.bf16.msra.mxu0 %v405_v22 }
  0x1c   :  { %369 = vmatprep.subr.bf16.mxu1 %v410_v0  ;;  %200 = vmatprep.subr.bf16.mxu0 %v406_v23 }
  0x1f   :  { %370 = vmatpush3.bf16.msra.mxu1 %v408_v24  ;;  %201 = vmatpush1.bf16.msra.mxu0 %v409_v25 }
  0x22   :  { %372 = vmatmul.mubr.bf16.vlgmr.msra.gmra.mrb[0].mxu1 %v25_v26  ;;  %219 = vmatmul.mubr.bf16.vlgmr.msra.gmra.mrb[0].mxu0 %v25_v26 }
  0xf5   :  { %v261_v36 = vpop.f32.mrb[0].mxu1  ;;  %v220_v38 = vpop.f32.mrb[0].mxu0 }
  0xf6   :  { %v298_v37 = vadd.f32 %v292_v33, %v261_v36  ;;  %v373_v39 = vpop.f32.mrb[1].mxu1  ;;  %v296_v40 = vadd.f32 %v284_v34, %v220_v38  ;;  %v222_v41 = vpop.f32.mrb[1].mxu0 }
  0xf7   :  { %v264_v42 = vpop.f32.mrb[2].mxu1  ;;  %v297_v44 = vadd.f32 %v288_v35, %v222_v41  ;;  %v224_v45 = vpop.f32.mrb[2].mxu0 }
  0xf8   :  { %v345_v43 = vpack.c.bf16 %v298_v37, %v298_v37  ;;  %v374_v46 = vpop.f32.mrb[3].mxu1  ;;  %v225_v47 = vpop.f32.mrb[3].mxu0 }
  0xf9   :  { %v344_v48 = vpack.c.bf16 %v297_v44, %v296_v40 }
  0xfa   :  { %313 = vst [vmem:[%s520_s3 + $0x8] sm:$0xf] %v345_v43 }
  0xfb   :  { %312 = vst [vmem:[%s520_s3] sm:$0xff] %v344_v48 }

// kernel: gseqformer_forward.16
= control target key start
LH: loop header
LB: loop body
LE: loop exit
PB: predicated region body
PF: predicated region fallthrough
CT: control target
= control target key end

     0   :  { %v225_v0 = vmov 0.0   ;;  %vm226_vm0 = vmmov 0   ;;  %s304_s1 = inlined_call_operand.vmem [shape: bf16[128,128], index: 1, kind: input, shape index: {}]   ;;  %s305_s0 = inlined_call_operand.vmem [shape: bf16[8,128], index: 0, kind: input, shape index: {}]   ;;  %s306_s3 = inlined_call_operand.vmem [shape: bf16[8,128], index: 3, kind: input, shape index: {}]   ;;  %s307_s2 = inlined_call_operand.vmem [shape: f32[1,128], index: 2, kind: input, shape index: {}]   ;;  %s308_s4 = inlined_call_operand.vmem [shape: f32[1,128], index: 4, kind: input, shape index: {}]   ;;  %s309_s5 = inlined_call_operand.vmem [shape: f32[1,128], index: 5, kind: input, shape index: {}]   ;;  %s310_s6 = inlined_call_operand.vmem [shape: bf16[8,128], index: 6, kind: output, shape index: {}]  }
   0x1   :  { %193 = vmatprep.subr.bf16.mxu0 %v225_v0  ;;  %v215_v1 = vld [vmem:[%s304_s1] sm:$0xff]   ;;  %209 = vmatprep.mubr.msk.bf16.mxu0 %vm226_vm0, %v225_v0  ;;  %v216_v2 = vld [vmem:[%s304_s1 + $0x8] sm:$0xff]   ;;  %v217_v3 = vld [vmem:[%s304_s1 + $0x10] sm:$0xff]  }
   0x2   :  { %194 = vmatpush3.bf16.msra.mxu0 %v215_v1  ;;  %v218_v4 = vld [vmem:[%s304_s1 + $0x18] sm:$0xff]   ;;  %v219_v5 = vld [vmem:[%s304_s1 + $0x20] sm:$0xff]   ;;  %v220_v6 = vld [vmem:[%s304_s1 + $0x28] sm:$0xff]  }
   0x3   :  { %195 = vmatprep.subr.bf16.mxu0 %v225_v0  ;;  %v221_v7 = vld [vmem:[%s304_s1 + $0x30] sm:$0xff]   ;;  %v222_v8 = vld [vmem:[%s304_s1 + $0x38] sm:$0xff]   ;;  %v24_v9 = vld [vmem:[%s305_s0] sm:$0xf] }
   0x4   :  { %v136_v10 = vld [vmem:[%s306_s3] sm:$0xf] }
   0x5   :  { %v173_v11 = vld [vmem:[%s307_s2] ss:$0 sm:$0xff]  ;;  %v137_v12 = vunpack.c.l.bf16 %v136_v10 }
   0x6   :  { %196 = vmatpush3.bf16.msra.mxu0 %v216_v2  ;;  %v182_v27 = vld [vmem:[%s308_s4] ss:$0 sm:$0xff] }
   0x7   :  { %197 = vmatprep.subr.bf16.mxu0 %v225_v0  ;;  %v183_v29 = vld [vmem:[%s309_s5] ss:$0 sm:$0xff] }
   0xa   :  { %198 = vmatpush3.bf16.msra.mxu0 %v217_v3 }
   0xb   :  { %199 = vmatprep.subr.bf16.mxu0 %v225_v0 }
   0xe   :  { %200 = vmatpush3.bf16.msra.mxu0 %v218_v4 }
   0xf   :  { %201 = vmatprep.subr.bf16.mxu0 %v225_v0 }
  0x12   :  { %202 = vmatpush3.bf16.msra.mxu0 %v219_v5 }
  0x13   :  { %203 = vmatprep.subr.bf16.mxu0 %v225_v0 }
  0x16   :  { %204 = vmatpush3.bf16.msra.mxu0 %v220_v6 }
  0x17   :  { %205 = vmatprep.subr.bf16.mxu0 %v225_v0 }
  0x1a   :  { %206 = vmatpush3.bf16.msra.mxu0 %v221_v7 }
  0x1b   :  { %207 = vmatprep.subr.bf16.mxu0 %v225_v0 }
  0x1e   :  { %208 = vmatpush3.bf16.msra.mxu0 %v222_v8 }
  0x21   :  { %210 = vmatmul.mubr.bf16.vlgmr.msra.gmra.mrb[0].mxu0 %v24_v9 }
  0xf4   :  { %v130_v13 = vpop.f32.mrb[0].mxu0 }
  0xf5   :  { %v131_v14 = vadd.f32 %v173_v11, %v130_v13  ;;  %v211_v15 = vpop.f32.mrb[1].mxu0 }
  0xf6   :  { %v133_v16 = vpop.f32.mrb[2].mxu0 }
  0xf7   :  { %v212_v17 = vpop.f32.mrb[3].mxu0  ;;  %v138_v18 = vadd.f32 %v137_v12, %v131_v14 }
  0xf9   :  { %139 = vadd.xlane.f32.xlu0 %v138_v18 }
 0x186   :  { %v140_v19 = vpop.xlane.xlu0 %139 }
 0x187   :  { %v142_v20 = vmul.f32 0.0078125, %v140_v19 }
 0x189   :  { %v143_v21 = vsub.f32 %v138_v18, %v142_v20 }
 0x18b   :  { %v144_v22 = vmul.f32 %v143_v21, %v143_v21 }
 0x18d   :  { %145 = vadd.xlane.f32.xlu0 %v144_v22 }
 0x21a   :  { %v146_v23 = vpop.xlane.xlu0 %145 }
 0x21b   :  { %v147_v24 = vmul.f32 0.0078125, %v146_v23 }
 0x21d   :  { %v148_v25 = vadd.f32 1e-05, %v147_v24 }
 0x21f   :  { %223 = vrsqrt.f32 %v148_v25 }
 0x229   :  { %v224_v26 = vpop.eup %223 }
 0x22a   :  { %v150_v28 = vmul.f32 %v224_v26, %v143_v21 }
 0x22c   :  { %v158_v30 = vmul.f32 %v182_v27, %v150_v28 }
 0x22e   :  { %v166_v31 = vadd.f32 %v183_v29, %v158_v30 }
 0x230   :  { %v167_v32 = vpack.c.bf16 %v166_v31, %v166_v31 }
 0x232   :  { %168 = vst [vmem:[%s310_s6] sm:$0xf] %v167_v32 }

// kernel: gseqformer_forward.17
= control target key start
LH: loop header
LB: loop body
LE: loop exit
PB: predicated region body
PF: predicated region fallthrough
CT: control target
= control target key end

     0   :  { %v512_v1 = vmov 0   ;;  %v46_v34 = vlaneseq  ;;  %s671_s1 = inlined_call_operand.vmem [shape: bf16[128,256], index: 1, kind: input, shape index: {}]   ;;  %s672_s0 = inlined_call_operand.vmem [shape: bf16[8,128], index: 0, kind: input, shape index: {}]   ;;  %s673_s3 = inlined_call_operand.vmem [shape: bf16[256,128], index: 3, kind: input, shape index: {}]   ;;  %s674_s2 = inlined_call_operand.vmem [shape: f32[1,256], index: 2, kind: input, shape index: {}]   ;;  %s675_s4 = inlined_call_operand.vmem [shape: f32[1,128], index: 4, kind: input, shape index: {}]   ;;  %s676_s5 = inlined_call_operand.vmem [shape: f32[1,128], index: 5, kind: input, shape index: {}]   ;;  %s677_s6 = inlined_call_operand.vmem [shape: f32[1,128], index: 6, kind: input, shape index: {}]   ;;  %s678_s7 = inlined_call_operand.vmem [shape: bf16[8,128], index: 7, kind: output, shape index: {}]  }
   0x1   :  { %v466_v0 = vld [vmem:[%s671_s1 + $0x4] ss:$8 sps:$4 sm:$0xff]   ;;  %168 = vmatprep.mubr.bf16.mxu0 %v512_v1  ;;  %v468_v2 = vld [vmem:[%s671_s1] ss:$8 sps:$4 sm:$0xff]   ;;  %v469_v3 = vld [vmem:[%s671_s1 + $0x14] ss:$8 sps:$4 sm:$0xff]  }
   0x2   :  { %136 = vmatprep.subr.bf16.mxu0 %v466_v0  ;;  %v471_v4 = vld [vmem:[%s671_s1 + $0x10] ss:$8 sps:$4 sm:$0xff]   ;;  %v472_v5 = vld [vmem:[%s671_s1 + $0x24] ss:$8 sps:$4 sm:$0xff]   ;;  %v474_v6 = vld [vmem:[%s671_s1 + $0x20] ss:$8 sps:$4 sm:$0xff]  }
   0x3   :  { %137 = vmatpush1.bf16.msra.mxu0 %v468_v2  ;;  %v475_v7 = vld [vmem:[%s671_s1 + $0x34] ss:$8 sps:$4 sm:$0xff]   ;;  %v477_v8 = vld [vmem:[%s671_s1 + $0x30] ss:$8 sps:$4 sm:$0xff]   ;;  %v478_v9 = vld [vmem:[%s671_s1 + $0x44] ss:$8 sps:$4 sm:$0xff]  }
   0x4   :  { %138 = vmatprep.subr.bf16.mxu0 %v469_v3  ;;  %v480_v10 = vld [vmem:[%s671_s1 + $0x40] ss:$8 sps:$4 sm:$0xff]   ;;  %v481_v11 = vld [vmem:[%s671_s1 + $0x54] ss:$8 sps:$4 sm:$0xff]   ;;  %v483_v12 = vld [vmem:[%s671_s1 + $0x50] ss:$8 sps:$4 sm:$0xff]  }
   0x5   :  { %v484_v13 = vld [vmem:[%s671_s1 + $0x64] ss:$8 sps:$4 sm:$0xff]   ;;  %v486_v14 = vld [vmem:[%s671_s1 + $0x60] ss:$8 sps:$4 sm:$0xff]   ;;  %v487_v15 = vld [vmem:[%s671_s1 + $0x74] ss:$8 sps:$4 sm:$0xff]  }
   0x6   :  { %v489_v16 = vld [vmem:[%s671_s1 + $0x70] ss:$8 sps:$4 sm:$0xff]   ;;  %v604_v17 = vld [vmem:[%s672_s0] sm:$0xf]  ;;  %v492_v20 = vld [vmem:[%s673_s3 + $0x48] sm:$0xff]   ;;  %v47_v35 = vshrl.u32 %v46_v34, 7 }
   0x7   :  { %139 = vmatpush1.bf16.msra.mxu0 %v471_v4  ;;  %v490_v18 = vld [vmem:[%s673_s3 + $0x40] sm:$0xff]   ;;  %v493_v21 = vld [vmem:[%s673_s3 + $0x8] sm:$0xff]   ;;  %v494_v22 = vld [vmem:[%s673_s3 + $0x50] sm:$0xff]  }
   0x8   :  { %140 = vmatprep.subr.bf16.mxu0 %v472_v5  ;;  %v491_v19 = vld [vmem:[%s673_s3] sm:$0xff]   ;;  %443 = vmatprep.subr.bf16.mxu1 %v490_v18  ;;  %v495_v23 = vld [vmem:[%s673_s3 + $0x10] sm:$0xff]   ;;  %v496_v24 = vld [vmem:[%s673_s3 + $0x58] sm:$0xff]   ;;  %v48_v36 = vsub.s32 0, %v47_v35  ;;  %v52_v38 = vsub.s32 1, %v47_v35 }
   0x9   :  { %444 = vmatpush3.bf16.msra.mxu1 %v491_v19  ;;  %v497_v25 = vld [vmem:[%s673_s3 + $0x18] sm:$0xff]   ;;  %v498_v26 = vld [vmem:[%s673_s3 + $0x60] sm:$0xff]   ;;  %v500_v28 = vld [vmem:[%s673_s3 + $0x68] sm:$0xff]  }
   0xa   :  { %445 = vmatprep.subr.bf16.mxu1 %v492_v20  ;;  %v499_v27 = vld [vmem:[%s673_s3 + $0x20] sm:$0xff]   ;;  %v501_v29 = vld [vmem:[%s673_s3 + $0x28] sm:$0xff]   ;;  %v502_v30 = vld [vmem:[%s673_s3 + $0x70] sm:$0xff]  }
   0xb   :  { %141 = vmatpush1.bf16.msra.mxu0 %v474_v6  ;;  %v503_v31 = vld [vmem:[%s673_s3 + $0x30] sm:$0xff]   ;;  %v504_v32 = vld [vmem:[%s673_s3 + $0x78] sm:$0xff]   ;;  %v44_v37 = vld [vmem:[%s674_s2] sm:$0x3]  ;;  %v372_v6 = vunpack.c.l.bf16 %v604_v17 }
   0xc   :  { %142 = vmatprep.subr.bf16.mxu0 %v475_v7  ;;  %v505_v33 = vld [vmem:[%s673_s3 + $0x38] sm:$0xff]   ;;  %v49_v39 = vrot.slane %v44_v37, %v48_v36  ;;  %v53_v40 = vrot.slane %v44_v37, %v52_v38  ;;  %v424_v4 = vld [vmem:[%s675_s4] ss:$0 sm:$0xff] }
   0xd   :  { %446 = vmatpush3.bf16.msra.mxu1 %v493_v21 }
   0xe   :  { %447 = vmatprep.subr.bf16.mxu1 %v494_v22  ;;  %v442_v22 = vld [vmem:[%s677_s6] ss:$0 sm:$0xff] }
   0xf   :  { %143 = vmatpush1.bf16.msra.mxu0 %v477_v8 }
  0x10   :  { %144 = vmatprep.subr.bf16.mxu0 %v478_v9 }
  0x11   :  { %448 = vmatpush3.bf16.msra.mxu1 %v495_v23 }
  0x12   :  { %449 = vmatprep.subr.bf16.mxu1 %v496_v24 }
  0x13   :  { %145 = vmatpush1.bf16.msra.mxu0 %v480_v10 }
  0x14   :  { %146 = vmatprep.subr.bf16.mxu0 %v481_v11 }
  0x15   :  { %450 = vmatpush3.bf16.msra.mxu1 %v497_v25 }
  0x16   :  { %451 = vmatprep.subr.bf16.mxu1 %v498_v26 }
  0x17   :  { %147 = vmatpush1.bf16.msra.mxu0 %v483_v12 }
  0x18   :  { %148 = vmatprep.subr.bf16.mxu0 %v484_v13 }
  0x19   :  { %452 = vmatpush3.bf16.msra.mxu1 %v499_v27 }
  0x1a   :  { %453 = vmatprep.subr.bf16.mxu1 %v500_v28 }
  0x1b   :  { %149 = vmatpush1.bf16.msra.mxu0 %v486_v14 }
  0x1c   :  { %150 = vmatprep.subr.bf16.mxu0 %v487_v15 }
  0x1d   :  { %454 = vmatpush3.bf16.msra.mxu1 %v501_v29 }
  0x1e   :  { %455 = vmatprep.subr.bf16.mxu1 %v502_v30 }
  0x1f   :  { %151 = vmatpush1.bf16.msra.mxu0 %v489_v16 }
  0x21   :  { %456 = vmatpush3.bf16.msra.mxu1 %v503_v31 }
  0x22   :  { %169 = vmatmul.mubr.bf16.vlgmr.msra.gmra.mrb[0].mxu0 %v604_v17  ;;  %457 = vmatprep.subr.bf16.mxu1 %v504_v32  ;;  %v441_v17 = vld [vmem:[%s676_s5] ss:$0 sm:$0xff] }
  0x25   :  { %458 = vmatpush3.bf16.msra.mxu1 %v505_v33 }
  0xf5   :  { %v170_v41 = vpop.f32.mrb[0].mxu0 }
  0xf6   :  { %v171_v42 = vadd.f32 %v170_v41, %v49_v39  ;;  %v172_v43 = vpop.f32.mrb[1].mxu0 }
  0xf7   :  { %v173_v44 = vadd.f32 %v172_v43, %v53_v40  ;;  %v174_v45 = vpop.f32.mrb[2].mxu0 }
  0xf8   :  { %v177_v46 = vmul.f32 %v171_v42, %v171_v42  ;;  %v175_v47 = vpop.f32.mrb[3].mxu0 }
  0xf9   :  { %v178_v48 = vmul.f32 %v173_v44, %v173_v44 }
  0xfa   :  { %v179_v49 = vmul.f32 %v177_v46, %v171_v42 }
  0xfb   :  { %v180_v50 = vmul.f32 %v178_v48, %v173_v44 }
  0xfc   :  { %v181_v51 = vmul.f32 0.044715, %v179_v49 }
  0xfd   :  { %v182_v52 = vmul.f32 0.044715, %v180_v50 }
  0xfe   :  { %v183_v53 = vadd.f32 %v181_v51, %v171_v42 }
  0xff   :  { %v184_v54 = vadd.f32 %v182_v52, %v173_v44 }
 0x100   :  { %v185_v55 = vmul.f32 0.7978846, %v183_v53 }
 0x101   :  { %v186_v56 = vmul.f32 0.7978846, %v184_v54 }
 0x102   :  { %506 = vtanh.f32 %v185_v55 }
 0x103   :  { %508 = vtanh.f32 %v186_v56 }
 0x10c   :  { %v507_v57 = vpop.eup %506 }
 0x10d   :  { %v509_v58 = vpop.eup %508  ;;  %v189_v59 = vadd.f32 1.0, %v507_v57 }
 0x10e   :  { %v190_v60 = vadd.f32 1.0, %v509_v58 }
 0x10f   :  { %v191_v61 = vmul.f32 0.5, %v189_v59 }
 0x110   :  { %v192_v62 = vmul.f32 0.5, %v190_v60 }
 0x111   :  { %v193_v63 = vmul.f32 %v191_v61, %v171_v42 }
 0x112   :  { %v194_v0 = vmul.f32 %v192_v62, %v173_v44 }
 0x113   :  { %v195_v2 = vpack.c.bf16 %v193_v63, %v193_v63 }
 0x114   :  { %v196_v1 = vpack.c.bf16 %v194_v0, %v194_v0 }
 0x116   :  { %364 = vmatprep.mubr.bf16.mxu1 %v196_v1 }
 0x117   :  { %365 = vmatmul.mubr.bf16.vlgmr.msra.gmra.mrb[0].mxu1 %v195_v2 }
 0x1ea   :  { %v459_v3 = vpop.f32.mrb[0].mxu1 }
 0x1eb   :  { %v460_v5 = vpop.f32.mrb[1].mxu1 }
 0x1ec   :  { %v461_v7 = vadd.f32 %v460_v5, %v459_v3  ;;  %v462_v8 = vpop.f32.mrb[2].mxu1 }
 0x1ed   :  { %v463_v9 = vpop.f32.mrb[3].mxu1 }
 0x1ee   :  { %v367_v10 = vadd.f32 %v461_v7, %v424_v4 }
 0x1f0   :  { %v373_v11 = vadd.f32 %v372_v6, %v367_v10 }
 0x1f2   :  { %374 = vadd.xlane.f32.xlu0 %v373_v11 }
 0x27f   :  { %v375_v12 = vpop.xlane.xlu0 %374 }
 0x280   :  { %v377_v13 = vmul.f32 0.0078125, %v375_v12 }
 0x282   :  { %v378_v14 = vsub.f32 %v373_v11, %v377_v13 }
 0x284   :  { %v379_v15 = vmul.f32 %v378_v14, %v378_v14 }
 0x286   :  { %380 = vadd.xlane.f32.xlu0 %v379_v15 }
 0x313   :  { %v381_v16 = vpop.xlane.xlu0 %380 }
 0x314   :  { %v382_v18 = vmul.f32 0.0078125, %v381_v16 }
 0x316   :  { %v383_v19 = vadd.f32 1e-05, %v382_v18 }
 0x318   :  { %510 = vrsqrt.f32 %v383_v19 }
 0x322   :  { %v511_v20 = vpop.eup %510 }
 0x323   :  { %v385_v21 = vmul.f32 %v511_v20, %v378_v14 }
 0x325   :  { %v393_v23 = vmul.f32 %v441_v17, %v385_v21 }
 0x327   :  { %v401_v24 = vadd.f32 %v442_v22, %v393_v23 }
 0x329   :  { %v402_v25 = vpack.c.bf16 %v401_v24, %v401_v24 }
 0x32b   :  { %403 = vst [vmem:[%s678_s7] sm:$0xf] %v402_v25 }

// kernel: gseqformer_forward.12
= control target key start
LH: loop header
LB: loop body
LE: loop exit
PB: predicated region body
PF: predicated region fallthrough
CT: control target
= control target key end

     0   :  { %v436_v1 = vmov 0   ;;  %v229_v19 = vlaneseq  ;;  %s582_s1 = inlined_call_operand.vmem [shape: bf16[128,256], index: 1, kind: input, shape index: {}]   ;;  %s583_s0 = inlined_call_operand.vmem [shape: bf16[32,128], index: 0, kind: input, shape index: {}]   ;;  %s584_s2 = inlined_call_operand.vmem [shape: f32[1,256], index: 2, kind: input, shape index: {}]   ;;  %s585_s3 = inlined_call_operand.vmem [shape: bf16[32,256], index: 3, kind: output, shape index: {}]  }
   0x1   :  { %v394_v0 = vld [vmem:[%s582_s1 + $0x4] ss:$8 sps:$4 sm:$0xff]   ;;  %179 = vmatprep.mubr.bf16.mxu0 %v436_v1  ;;  %189 = vmatprep.mubr.bf16.mxu1 %v436_v1  ;;  %v396_v2 = vld [vmem:[%s582_s1] ss:$8 sps:$4 sm:$0xff]   ;;  %v397_v3 = vld [vmem:[%s582_s1 + $0x14] ss:$8 sps:$4 sm:$0xff]  }
   0x2   :  { %147 = vmatprep.subr.bf16.mxu0 %v394_v0  ;;  %377 = vmatprep.subr.bf16.mxu1 %v394_v0  ;;  %v399_v4 = vld [vmem:[%s582_s1 + $0x10] ss:$8 sps:$4 sm:$0xff]   ;;  %v400_v5 = vld [vmem:[%s582_s1 + $0x24] ss:$8 sps:$4 sm:$0xff]   ;;  %v402_v6 = vld [vmem:[%s582_s1 + $0x20] ss:$8 sps:$4 sm:$0xff]  }
   0x3   :  { %148 = vmatpush1.bf16.msra.mxu0 %v396_v2  ;;  %385 = vmatpush1.bf16.msra.mxu1 %v396_v2  ;;  %v403_v7 = vld [vmem:[%s582_s1 + $0x34] ss:$8 sps:$4 sm:$0xff]   ;;  %v405_v8 = vld [vmem:[%s582_s1 + $0x30] ss:$8 sps:$4 sm:$0xff]   ;;  %v406_v9 = vld [vmem:[%s582_s1 + $0x44] ss:$8 sps:$4 sm:$0xff]  }
   0x4   :  { %149 = vmatprep.subr.bf16.mxu0 %v397_v3  ;;  %378 = vmatprep.subr.bf16.mxu1 %v397_v3  ;;  %v408_v10 = vld [vmem:[%s582_s1 + $0x40] ss:$8 sps:$4 sm:$0xff]   ;;  %v409_v11 = vld [vmem:[%s582_s1 + $0x54] ss:$8 sps:$4 sm:$0xff]   ;;  %v411_v12 = vld [vmem:[%s582_s1 + $0x50] ss:$8 sps:$4 sm:$0xff]  }
   0x5   :  { %v412_v13 = vld [vmem:[%s582_s1 + $0x64] ss:$8 sps:$4 sm:$0xff]   ;;  %v414_v14 = vld [vmem:[%s582_s1 + $0x60] ss:$8 sps:$4 sm:$0xff]   ;;  %v415_v15 = vld [vmem:[%s582_s1 + $0x74] ss:$8 sps:$4 sm:$0xff]  }
   0x6   :  { %v417_v16 = vld [vmem:[%s582_s1 + $0x70] ss:$8 sps:$4 sm:$0xff]   ;;  %v418_v17 = vld [vmem:[%s583_s0] sm:$0xff]   ;;  %v419_v18 = vld [vmem:[%s583_s0 + $0x8] sm:$0xff]   ;;  %v230_v20 = vshrl.u32 %v229_v19, 7 }
   0x7   :  { %150 = vmatpush1.bf16.msra.mxu0 %v399_v4  ;;  %386 = vmatpush1.bf16.msra.mxu1 %v399_v4  ;;  %v227_v22 = vld [vmem:[%s584_s2] sm:$0x3] }
   0x8   :  { %151 = vmatprep.subr.bf16.mxu0 %v400_v5  ;;  %379 = vmatprep.subr.bf16.mxu1 %v400_v5  ;;  %v231_v21 = vsub.s32 0, %v230_v20  ;;  %v235_v23 = vsub.s32 1, %v230_v20 }
   0xa   :  { %v232_v24 = vrot.slane %v227_v22, %v231_v21  ;;  %v236_v25 = vrot.slane %v227_v22, %v235_v23 }
   0xb   :  { %152 = vmatpush1.bf16.msra.mxu0 %v402_v6  ;;  %387 = vmatpush1.bf16.msra.mxu1 %v402_v6 }
   0xc   :  { %153 = vmatprep.subr.bf16.mxu0 %v403_v7  ;;  %380 = vmatprep.subr.bf16.mxu1 %v403_v7 }
   0xf   :  { %154 = vmatpush1.bf16.msra.mxu0 %v405_v8  ;;  %388 = vmatpush1.bf16.msra.mxu1 %v405_v8 }
  0x10   :  { %155 = vmatprep.subr.bf16.mxu0 %v406_v9  ;;  %381 = vmatprep.subr.bf16.mxu1 %v406_v9 }
  0x13   :  { %156 = vmatpush1.bf16.msra.mxu0 %v408_v10  ;;  %389 = vmatpush1.bf16.msra.mxu1 %v408_v10 }
  0x14   :  { %157 = vmatprep.subr.bf16.mxu0 %v409_v11  ;;  %382 = vmatprep.subr.bf16.mxu1 %v409_v11 }
  0x17   :  { %158 = vmatpush1.bf16.msra.mxu0 %v411_v12  ;;  %390 = vmatpush1.bf16.msra.mxu1 %v411_v12 }
  0x18   :  { %159 = vmatprep.subr.bf16.mxu0 %v412_v13  ;;  %383 = vmatprep.subr.bf16.mxu1 %v412_v13 }
  0x1b   :  { %160 = vmatpush1.bf16.msra.mxu0 %v414_v14  ;;  %391 = vmatpush1.bf16.msra.mxu1 %v414_v14 }
  0x1c   :  { %161 = vmatprep.subr.bf16.mxu0 %v415_v15  ;;  %384 = vmatprep.subr.bf16.mxu1 %v415_v15 }
  0x1f   :  { %162 = vmatpush1.bf16.msra.mxu0 %v417_v16  ;;  %392 = vmatpush1.bf16.msra.mxu1 %v417_v16 }
  0x22   :  { %180 = vmatmul.mubr.bf16.vlgmr.msra.gmra.mrb[0].mxu0 %v418_v17  ;;  %190 = vmatmul.mubr.bf16.vlgmr.msra.gmra.mrb[0].mxu1 %v419_v18 }
  0xf5   :  { %v181_v26 = vpop.f32.mrb[0].mxu0  ;;  %v191_v27 = vpop.f32.mrb[0].mxu1 }
  0xf6   :  { %v514_v28 = vadd.f32 %v232_v24, %v181_v26  ;;  %v516_v29 = vadd.f32 %v232_v24, %v191_v27  ;;  %v183_v30 = vpop.f32.mrb[1].mxu0  ;;  %v193_v31 = vpop.f32.mrb[1].mxu1 }
  0xf7   :  { %v518_v32 = vadd.f32 %v236_v25, %v183_v30  ;;  %v520_v33 = vadd.f32 %v236_v25, %v193_v31  ;;  %v185_v34 = vpop.f32.mrb[2].mxu0  ;;  %v195_v35 = vpop.f32.mrb[2].mxu1 }
  0xf8   :  { %v247_v36 = vmul.f32 %v514_v28, %v514_v28  ;;  %v251_v37 = vmul.f32 %v516_v29, %v516_v29  ;;  %v526_v38 = vadd.f32 %v232_v24, %v185_v34  ;;  %v528_v39 = vadd.f32 %v232_v24, %v195_v35  ;;  %v187_v40 = vpop.f32.mrb[3].mxu0  ;;  %v197_v41 = vpop.f32.mrb[3].mxu1 }
  0xf9   :  { %v248_v42 = vmul.f32 %v518_v32, %v518_v32  ;;  %v252_v43 = vmul.f32 %v520_v33, %v520_v33  ;;  %v534_v44 = vadd.f32 %v236_v25, %v187_v40  ;;  %v536_v45 = vadd.f32 %v236_v25, %v197_v41 }
  0xfa   :  { %v255_v46 = vmul.f32 %v247_v36, %v514_v28  ;;  %v259_v47 = vmul.f32 %v251_v37, %v516_v29  ;;  %v249_v48 = vmul.f32 %v526_v38, %v526_v38  ;;  %v253_v49 = vmul.f32 %v528_v39, %v528_v39 }
  0xfb   :  { %v256_v50 = vmul.f32 %v248_v42, %v518_v32  ;;  %v260_v51 = vmul.f32 %v252_v43, %v520_v33  ;;  %v250_v52 = vmul.f32 %v534_v44, %v534_v44  ;;  %v254_v53 = vmul.f32 %v536_v45, %v536_v45 }
  0xfc   :  { %v263_v54 = vmul.f32 0.044715, %v255_v46  ;;  %v267_v55 = vmul.f32 0.044715, %v259_v47  ;;  %v257_v56 = vmul.f32 %v249_v48, %v526_v38  ;;  %v261_v57 = vmul.f32 %v253_v49, %v528_v39 }
  0xfd   :  { %v264_v58 = vmul.f32 0.044715, %v256_v50  ;;  %v268_v59 = vmul.f32 0.044715, %v260_v51  ;;  %v258_v60 = vmul.f32 %v250_v52, %v534_v44  ;;  %v262_v61 = vmul.f32 %v254_v53, %v536_v45 }
  0xfe   :  { %v271_v62 = vadd.f32 %v263_v54, %v514_v28  ;;  %v275_v63 = vadd.f32 %v267_v55, %v516_v29  ;;  %v265_v0 = vmul.f32 0.044715, %v257_v56  ;;  %v269_v1 = vmul.f32 0.044715, %v261_v57 }
  0xff   :  { %v272_v2 = vadd.f32 %v264_v58, %v518_v32  ;;  %v276_v3 = vadd.f32 %v268_v59, %v520_v33  ;;  %v266_v4 = vmul.f32 0.044715, %v258_v60  ;;  %v270_v5 = vmul.f32 0.044715, %v262_v61 }
 0x100   :  { %v279_v6 = vmul.f32 0.7978846, %v271_v62  ;;  %v283_v7 = vmul.f32 0.7978846, %v275_v63  ;;  %v273_v8 = vadd.f32 %v265_v0, %v526_v38  ;;  %v277_v9 = vadd.f32 %v269_v1, %v528_v39 }
 0x101   :  { %v280_v10 = vmul.f32 0.7978846, %v272_v2  ;;  %v284_v11 = vmul.f32 0.7978846, %v276_v3  ;;  %v274_v12 = vadd.f32 %v266_v4, %v534_v44  ;;  %v278_v13 = vadd.f32 %v270_v5, %v536_v45 }
 0x102   :  { %420 = vtanh.f32 %v279_v6  ;;  %v281_v14 = vmul.f32 0.7978846, %v273_v8  ;;  %v285_v15 = vmul.f32 0.7978846, %v277_v9 }
 0x103   :  { %422 = vtanh.f32 %v283_v7  ;;  %v282_v16 = vmul.f32 0.7978846, %v274_v12  ;;  %v286_v17 = vmul.f32 0.7978846, %v278_v13 }
 0x104   :  { %424 = vtanh.f32 %v280_v10 }
 0x105   :  { %426 = vtanh.f32 %v284_v11 }
 0x106   :  { %428 = vtanh.f32 %v281_v14 }
 0x107   :  { %430 = vtanh.f32 %v285_v15 }
 0x108   :  { %432 = vtanh.f32 %v282_v16 }
 0x109   :  { %434 = vtanh.f32 %v286_v17 }
 0x10c   :  { %v421_v18 = vpop.eup %420 }
 0x10d   :  { %v423_v19 = vpop.eup %422  ;;  %v295_v20 = vadd.f32 1.0, %v421_v18 }
 0x10e   :  { %v425_v21 = vpop.eup %424  ;;  %v299_v22 = vadd.f32 1.0, %v423_v19 }
 0x10f   :  { %v427_v23 = vpop.eup %426  ;;  %v303_v24 = vmul.f32 0.5, %v295_v20  ;;  %v296_v25 = vadd.f32 1.0, %v425_v21 }
 0x110   :  { %v429_v26 = vpop.eup %428  ;;  %v307_v27 = vmul.f32 0.5, %v299_v22  ;;  %v300_v30 = vadd.f32 1.0, %v427_v23 }
 0x111   :  { %v431_v31 = vpop.eup %430  ;;  %v311_v34 = vmul.f32 %v303_v24, %v514_v28  ;;  %v304_v35 = vmul.f32 0.5, %v296_v25  ;;  %v297_v36 = vadd.f32 1.0, %v429_v26 }
 0x112   :  { %v433_v37 = vpop.eup %432  ;;  %v315_v40 = vmul.f32 %v307_v27, %v516_v29  ;;  %v308_v41 = vmul.f32 0.5, %v300_v30  ;;  %v301_v42 = vadd.f32 1.0, %v431_v31 }
 0x113   :  { %v435_v43 = vpop.eup %434  ;;  %v312_v46 = vmul.f32 %v304_v35, %v518_v32  ;;  %v305_v47 = vmul.f32 0.5, %v297_v36  ;;  %v298_v48 = vadd.f32 1.0, %v433_v37 }
 0x114   :  { %v316_v49 = vmul.f32 %v308_v41, %v520_v33  ;;  %v309_v50 = vmul.f32 0.5, %v301_v42  ;;  %v302_v51 = vadd.f32 1.0, %v435_v43 }
 0x115   :  { %v373_v52 = vpack.c.bf16 %v312_v46, %v311_v34  ;;  %v313_v53 = vmul.f32 %v305_v47, %v526_v38  ;;  %v306_v28 = vmul.f32 0.5, %v298_v48 }
 0x116   :  { %v375_v54 = vpack.c.bf16 %v316_v49, %v315_v40  ;;  %v317_v55 = vmul.f32 %v309_v50, %v528_v39  ;;  %v310_v56 = vmul.f32 0.5, %v302_v51 }
 0x117   :  { %343 = vst [vmem:[%s585_s3] sm:$0xff] %v373_v52  ;;  %v314_v29 = vmul.f32 %v306_v28, %v534_v44 }
 0x118   :  { %345 = vst [vmem:[%s585_s3 + $0x10] sm:$0xff] %v375_v54  ;;  %v318_v32 = vmul.f32 %v310_v56, %v536_v45 }
 0x119   :  { %v374_v33 = vpack.c.bf16 %v314_v29, %v313_v53 }
 0x11a   :  { %v376_v57 = vpack.c.bf16 %v318_v32, %v317_v55 }
 0x11b   :  { %344 = vst [vmem:[%s585_s3 + $0x8] sm:$0xff] %v374_v33 }
 0x11c   :  { %346 = vst [vmem:[%s585_s3 + $0x18] sm:$0xff] %v376_v57 }

// kernel: gseqformer_forward.13
= control target key start
LH: loop header
LB: loop body
LE: loop exit
PB: predicated region body
PF: predicated region fallthrough
CT: control target
= control target key end

     0   :  { %v519_v0 = vmov 0.0   ;;  %vm520_vm0 = vmmov 0   ;;  %v521_v3 = vmov 0   ;;  %v306_v27 = vlaneseq  ;;  %s646_s1 = inlined_call_operand.vmem [shape: bf16[128,384], index: 1, kind: input, shape index: {}]   ;;  %s647_s0 = inlined_call_operand.vmem [shape: bf16[16,128], index: 0, kind: input, shape index: {}]   ;;  %s648_s2 = inlined_call_operand.vmem [shape: f32[1,384], index: 2, kind: input, shape index: {}]   ;;  %s649_s3 = inlined_call_operand.vmem [shape: bf16[16,384], index: 3, kind: output, shape index: {}]  }
   0x1   :  { %451 = vmatprep.subr.bf16.mxu1 %v519_v0  ;;  %v474_v1 = vld [vmem:[%s646_s1 + $0x4] ss:$12 sps:$4 sm:$0xff]   ;;  %467 = vmatprep.mubr.msk.bf16.mxu1 %vm520_vm0, %v519_v0  ;;  %v476_v2 = vld [vmem:[%s646_s1 + $0x8] ss:$12 sps:$4 sm:$0xff]   ;;  %v477_v4 = vld [vmem:[%s646_s1] ss:$12 sps:$4 sm:$0xff]  }
   0x2   :  { %231 = vmatprep.mubr.bf16.mxu0 %v521_v3  ;;  %199 = vmatprep.subr.bf16.mxu0 %v474_v1  ;;  %v478_v5 = vld [vmem:[%s646_s1 + $0x1c] ss:$12 sps:$4 sm:$0xff]   ;;  %v480_v6 = vld [vmem:[%s646_s1 + $0x20] ss:$12 sps:$4 sm:$0xff]   ;;  %v481_v7 = vld [vmem:[%s646_s1 + $0x18] ss:$12 sps:$4 sm:$0xff]  }
   0x3   :  { %452 = vmatpush3.bf16.msra.mxu1 %v476_v2  ;;  %200 = vmatpush1.bf16.msra.mxu0 %v477_v4  ;;  %v482_v8 = vld [vmem:[%s646_s1 + $0x34] ss:$12 sps:$4 sm:$0xff]   ;;  %v484_v9 = vld [vmem:[%s646_s1 + $0x38] ss:$12 sps:$4 sm:$0xff]   ;;  %v485_v10 = vld [vmem:[%s646_s1 + $0x30] ss:$12 sps:$4 sm:$0xff]  }
   0x4   :  { %453 = vmatprep.subr.bf16.mxu1 %v519_v0  ;;  %201 = vmatprep.subr.bf16.mxu0 %v478_v5  ;;  %v486_v11 = vld [vmem:[%s646_s1 + $0x4c] ss:$12 sps:$4 sm:$0xff]   ;;  %v488_v12 = vld [vmem:[%s646_s1 + $0x50] ss:$12 sps:$4 sm:$0xff]   ;;  %v489_v13 = vld [vmem:[%s646_s1 + $0x48] ss:$12 sps:$4 sm:$0xff]  }
   0x5   :  { %v490_v14 = vld [vmem:[%s646_s1 + $0x64] ss:$12 sps:$4 sm:$0xff]   ;;  %v492_v15 = vld [vmem:[%s646_s1 + $0x68] ss:$12 sps:$4 sm:$0xff]   ;;  %v493_v16 = vld [vmem:[%s646_s1 + $0x60] ss:$12 sps:$4 sm:$0xff]  }
   0x6   :  { %v494_v17 = vld [vmem:[%s646_s1 + $0x7c] ss:$12 sps:$4 sm:$0xff]   ;;  %v496_v18 = vld [vmem:[%s646_s1 + $0x80] ss:$12 sps:$4 sm:$0xff]   ;;  %v497_v19 = vld [vmem:[%s646_s1 + $0x78] ss:$12 sps:$4 sm:$0xff]  }
   0x7   :  { %454 = vmatpush3.bf16.msra.mxu1 %v480_v6  ;;  %202 = vmatpush1.bf16.msra.mxu0 %v481_v7  ;;  %v498_v20 = vld [vmem:[%s646_s1 + $0x94] ss:$12 sps:$4 sm:$0xff]   ;;  %v500_v21 = vld [vmem:[%s646_s1 + $0x98] ss:$12 sps:$4 sm:$0xff]   ;;  %v501_v22 = vld [vmem:[%s646_s1 + $0x90] ss:$12 sps:$4 sm:$0xff]  }
   0x8   :  { %455 = vmatprep.subr.bf16.mxu1 %v519_v0  ;;  %203 = vmatprep.subr.bf16.mxu0 %v482_v8  ;;  %v502_v23 = vld [vmem:[%s646_s1 + $0xac] ss:$12 sps:$4 sm:$0xff]   ;;  %v504_v24 = vld [vmem:[%s646_s1 + $0xb0] ss:$12 sps:$4 sm:$0xff]   ;;  %v505_v25 = vld [vmem:[%s646_s1 + $0xa8] ss:$12 sps:$4 sm:$0xff]  }
   0x9   :  { %v506_v26 = vld [vmem:[%s647_s0] sm:$0xff]   ;;  %v307_v28 = vshrl.u32 %v306_v27, 7 }
   0xa   :  { %v304_v30 = vld [vmem:[%s648_s2] sm:$0x7] }
   0xb   :  { %456 = vmatpush3.bf16.msra.mxu1 %v484_v9  ;;  %204 = vmatpush1.bf16.msra.mxu0 %v485_v10  ;;  %v316_v29 = vsub.s32 2, %v307_v28  ;;  %v308_v31 = vsub.s32 0, %v307_v28  ;;  %v312_v32 = vsub.s32 1, %v307_v28 }
   0xc   :  { %457 = vmatprep.subr.bf16.mxu1 %v519_v0  ;;  %205 = vmatprep.subr.bf16.mxu0 %v486_v11 }
   0xd   :  { %v317_v33 = vrot.slane %v304_v30, %v316_v29  ;;  %v309_v34 = vrot.slane %v304_v30, %v308_v31  ;;  %v313_v35 = vrot.slane %v304_v30, %v312_v32 }
   0xf   :  { %458 = vmatpush3.bf16.msra.mxu1 %v488_v12  ;;  %206 = vmatpush1.bf16.msra.mxu0 %v489_v13 }
  0x10   :  { %459 = vmatprep.subr.bf16.mxu1 %v519_v0  ;;  %207 = vmatprep.subr.bf16.mxu0 %v490_v14 }
  0x13   :  { %460 = vmatpush3.bf16.msra.mxu1 %v492_v15  ;;  %208 = vmatpush1.bf16.msra.mxu0 %v493_v16 }
  0x14   :  { %461 = vmatprep.subr.bf16.mxu1 %v519_v0  ;;  %209 = vmatprep.subr.bf16.mxu0 %v494_v17 }
  0x17   :  { %462 = vmatpush3.bf16.msra.mxu1 %v496_v18  ;;  %210 = vmatpush1.bf16.msra.mxu0 %v497_v19 }
  0x18   :  { %463 = vmatprep.subr.bf16.mxu1 %v519_v0  ;;  %211 = vmatprep.subr.bf16.mxu0 %v498_v20 }
  0x1b   :  { %464 = vmatpush3.bf16.msra.mxu1 %v500_v21  ;;  %212 = vmatpush1.bf16.msra.mxu0 %v501_v22 }
  0x1c   :  { %465 = vmatprep.subr.bf16.mxu1 %v519_v0  ;;  %213 = vmatprep.subr.bf16.mxu0 %v502_v23 }
  0x1f   :  { %466 = vmatpush3.bf16.msra.mxu1 %v504_v24  ;;  %214 = vmatpush1.bf16.msra.mxu0 %v505_v25 }
  0x22   :  { %468 = vmatmul.mubr.bf16.vlgmr.msra.gmra.mrb[0].mxu1 %v506_v26  ;;  %232 = vmatmul.mubr.bf16.vlgmr.msra.gmra.mrb[0].mxu0 %v506_v26 }
  0xf5   :  { %v276_v36 = vpop.f32.mrb[0].mxu1  ;;  %v233_v38 = vpop.f32.mrb[0].mxu0 }
  0xf6   :  { %v323_v37 = vadd.f32 %v317_v33, %v276_v36  ;;  %v469_v39 = vpop.f32.mrb[1].mxu1  ;;  %v321_v40 = vadd.f32 %v309_v34, %v233_v38  ;;  %v235_v41 = vpop.f32.mrb[1].mxu0 }
  0xf7   :  { %v279_v42 = vpop.f32.mrb[2].mxu1  ;;  %v322_v44 = vadd.f32 %v313_v35, %v235_v41  ;;  %v237_v46 = vpop.f32.mrb[2].mxu0 }
  0xf8   :  { %v329_v43 = vmul.f32 %v323_v37, %v323_v37  ;;  %v620_v45 = vadd.f32 %v317_v33, %v279_v42  ;;  %v470_v47 = vpop.f32.mrb[3].mxu1  ;;  %v327_v48 = vmul.f32 %v321_v40, %v321_v40  ;;  %v622_v49 = vadd.f32 %v309_v34, %v237_v46  ;;  %v239_v50 = vpop.f32.mrb[3].mxu0 }
  0xf9   :  { %v328_v52 = vmul.f32 %v322_v44, %v322_v44  ;;  %v325_v54 = vadd.f32 %v313_v35, %v239_v50 }
  0xfa   :  { %v335_v51 = vmul.f32 %v329_v43, %v323_v37  ;;  %v332_v53 = vmul.f32 %v620_v45, %v620_v45  ;;  %v333_v55 = vmul.f32 %v327_v48, %v321_v40  ;;  %v330_v56 = vmul.f32 %v622_v49, %v622_v49 }
  0xfb   :  { %v334_v58 = vmul.f32 %v328_v52, %v322_v44  ;;  %v331_v60 = vmul.f32 %v325_v54, %v325_v54 }
  0xfc   :  { %v341_v57 = vmul.f32 0.044715, %v335_v51  ;;  %v338_v59 = vmul.f32 %v332_v53, %v620_v45  ;;  %v339_v61 = vmul.f32 0.044715, %v333_v55  ;;  %v336_v62 = vmul.f32 %v330_v56, %v622_v49 }
  0xfd   :  { %v340_v0 = vmul.f32 0.044715, %v334_v58  ;;  %v337_v2 = vmul.f32 %v331_v60, %v325_v54 }
  0xfe   :  { %v347_v63 = vadd.f32 %v341_v57, %v323_v37  ;;  %v344_v1 = vmul.f32 0.044715, %v338_v59  ;;  %v345_v3 = vadd.f32 %v339_v61, %v321_v40  ;;  %v342_v4 = vmul.f32 0.044715, %v336_v62 }
  0xff   :  { %v346_v6 = vadd.f32 %v340_v0, %v322_v44  ;;  %v343_v8 = vmul.f32 0.044715, %v337_v2 }
 0x100   :  { %v353_v5 = vmul.f32 0.7978846, %v347_v63  ;;  %v350_v7 = vadd.f32 %v344_v1, %v620_v45  ;;  %v351_v9 = vmul.f32 0.7978846, %v345_v3  ;;  %v348_v10 = vadd.f32 %v342_v4, %v622_v49 }
 0x101   :  { %v352_v11 = vmul.f32 0.7978846, %v346_v6  ;;  %v349_v13 = vadd.f32 %v343_v8, %v325_v54 }
 0x102   :  { %507 = vtanh.f32 %v353_v5  ;;  %v356_v12 = vmul.f32 0.7978846, %v350_v7  ;;  %v354_v14 = vmul.f32 0.7978846, %v348_v10 }
 0x103   :  { %509 = vtanh.f32 %v351_v9  ;;  %v355_v15 = vmul.f32 0.7978846, %v349_v13 }
 0x104   :  { %511 = vtanh.f32 %v352_v11 }
 0x105   :  { %513 = vtanh.f32 %v356_v12 }
 0x106   :  { %515 = vtanh.f32 %v354_v14 }
 0x107   :  { %517 = vtanh.f32 %v355_v15 }
 0x10c   :  { %v508_v16 = vpop.eup %507 }
 0x10d   :  { %v510_v17 = vpop.eup %509  ;;  %v365_v18 = vadd.f32 1.0, %v508_v16 }
 0x10e   :  { %v512_v19 = vpop.eup %511  ;;  %v363_v20 = vadd.f32 1.0, %v510_v17 }
 0x10f   :  { %v514_v21 = vpop.eup %513  ;;  %v371_v22 = vmul.f32 0.5, %v365_v18  ;;  %v364_v23 = vadd.f32 1.0, %v512_v19 }
 0x110   :  { %v516_v24 = vpop.eup %515  ;;  %v369_v25 = vmul.f32 0.5, %v363_v20  ;;  %v368_v26 = vadd.f32 1.0, %v514_v21 }
 0x111   :  { %v518_v27 = vpop.eup %517  ;;  %v377_v28 = vmul.f32 %v371_v22, %v323_v37  ;;  %v370_v29 = vmul.f32 0.5, %v364_v23  ;;  %v366_v30 = vadd.f32 1.0, %v516_v24 }
 0x112   :  { %v375_v31 = vmul.f32 %v369_v25, %v321_v40  ;;  %v374_v32 = vmul.f32 0.5, %v368_v26  ;;  %v367_v33 = vadd.f32 1.0, %v518_v27 }
 0x113   :  { %v439_v34 = vpack.c.bf16 %v377_v28, %v377_v28  ;;  %v376_v35 = vmul.f32 %v370_v29, %v322_v44  ;;  %v372_v36 = vmul.f32 0.5, %v366_v30 }
 0x114   :  { %v380_v38 = vmul.f32 %v374_v32, %v620_v45  ;;  %v373_v39 = vmul.f32 0.5, %v367_v33 }
 0x115   :  { %402 = vst [vmem:[%s649_s3 + $0x8] sm:$0xf] %v439_v34  ;;  %v438_v41 = vpack.c.bf16 %v376_v35, %v375_v31  ;;  %v378_v42 = vmul.f32 %v372_v36, %v622_v49 }
 0x116   :  { %v441_v43 = vpack.c.bf16 %v380_v38, %v380_v38  ;;  %v379_v37 = vmul.f32 %v373_v39, %v325_v54 }
 0x117   :  { %401 = vst [vmem:[%s649_s3] sm:$0xff] %v438_v41 }
 0x118   :  { %404 = vst [vmem:[%s649_s3 + $0x14] sm:$0xf] %v441_v43  ;;  %v440_v40 = vpack.c.bf16 %v379_v37, %v378_v42 }
 0x11a   :  { %403 = vst [vmem:[%s649_s3 + $0xc] sm:$0xff] %v440_v40 }

// kernel: gseqformer_forward.23
= control target key start
LH: loop header
LB: loop body
LE: loop exit
PB: predicated region body
PF: predicated region fallthrough
CT: control target
= control target key end

     0   :  { %vm29_vm0 = vcmask 1043456   ;;  %s533_s0 = inlined_call_operand.vmem [shape: bf16[2,4,128], index: 0, kind: input, shape index: {}]   ;;  %s534_s1 = inlined_call_operand.vmem [shape: bf16[2,4,128], index: 1, kind: input, shape index: {}]   ;;  %s535_s2 = inlined_call_operand.vmem [shape: bf16[128,256], index: 2, kind: input, shape index: {}]   ;;  %s536_s3 = inlined_call_operand.vmem [shape: f32[1,256], index: 3, kind: input, shape index: {}]   ;;  %s537_s4 = inlined_call_operand.hbm [shape: f32[2,256], index: 4, kind: output, shape index: {}]  }
   0x1   :  { %v428_v0 = vld [vmem:[%s533_s0] sm:$0x3]  ;;  %v437_v4 = vld [vmem:[%s533_s0 + $0x2] sm:$0x3] }
   0x2   :  { %v23_v1 = vld [vmem:[%s534_s1] sm:$0x3]  ;;  %v21_v2 = vunpack.c.l.bf16 %v428_v0  ;;  %v24_v5 = vld [vmem:[%s534_s1 + $0x2] sm:$0x3]  ;;  %v22_v6 = vunpack.c.l.bf16 %v437_v4 }
   0x3   :  { %v25_v3 = vunpack.c.l.bf16 %v23_v1  ;;  %v26_v7 = vunpack.c.l.bf16 %v24_v5 }
   0x5   :  { %v27_v8 = vadd.f32 %v25_v3, %v21_v2  ;;  %v28_v9 = vadd.f32 %v26_v7, %v22_v6 }
   0x7   :  { %v30_v10 = vsel %vm29_vm0, %v27_v8, 0.0 }
   0x8   :  { %31 = vadd.xlane.f32.xlu0 %v30_v10 }
   0x9   :  { %9 = vsyncpa [#allocation3], 0  ;;  %v33_v11 = vsel %vm29_vm0, %v28_v9, 0.0  ;;  %v41_v12 = vlaneseq  ;;  %vm51_vm1 = vcmask 1041409   ;;  %vm54_vm2 = vcmask 25600   ;;  %s399_s26 = smov [#allocation2]  }
   0xa   :  { %v398_v24 = vmov 0   ;;  %v342_v42 = vld [vmem:[%s535_s2 + $0x4] ss:$8 sps:$4 sm:$0xff]   ;;  %v344_v43 = vld [vmem:[%s535_s2] ss:$8 sps:$4 sm:$0xff]   ;;  %s313_s27 = sshll.u32 %s399_s26, 4  ;;  %s314_s27 = int_to_ptr.vmem [resolvable:$true] %s313_s27 }
   0xb   :  { %v42_v13 = vand.u32 127, %v41_v12  ;;  %v44_v14 = vshrl.u32 %v41_v12, 7  ;;  %341 = vset.pattern.permute.xlu0 %v398_v24  ;;  %340 = vset.pattern.permute.xlu1 %v398_v24  ;;  %v345_v44 = vld [vmem:[%s535_s2 + $0x14] ss:$8 sps:$4 sm:$0xff]   ;;  %v347_v45 = vld [vmem:[%s535_s2 + $0x10] ss:$8 sps:$4 sm:$0xff]   ;;  %p379_p1 = scmp.lt.s32.totalorder %s314_s27, %s314_s27 }
   0xc   :  { %34 = vadd.xlane.f32.xlu0 %v33_v11  ;;  %286 = vmatprep.mubr.bf16.mxu0 %v398_v24  ;;  %v348_v52 = vld [vmem:[%s535_s2 + $0x24] ss:$8 sps:$4 sm:$0xff]   ;;  %v350_v54 = vld [vmem:[%s535_s2 + $0x20] ss:$8 sps:$4 sm:$0xff]   ;;  %v351_v55 = vld [vmem:[%s535_s2 + $0x34] ss:$8 sps:$4 sm:$0xff]  }
   0xd   :  { %v45_v16 = vsub.s32 %v42_v13, %v44_v14  ;;  %v451_v25 = vsub.s32 0, %v44_v14  ;;  %v453_v26 = vsub.s32 1, %v44_v14  ;;  %254 = vmatprep.subr.bf16.mxu0 %v342_v42  ;;  %v353_v56 = vld [vmem:[%s535_s2 + $0x30] ss:$8 sps:$4 sm:$0xff]   ;;  %v354_v57 = vld [vmem:[%s535_s2 + $0x44] ss:$8 sps:$4 sm:$0xff]  }
   0xe   :  { %255 = vmatpush1.bf16.msra.mxu0 %v344_v43  ;;  %v356_v58 = vld [vmem:[%s535_s2 + $0x40] ss:$8 sps:$4 sm:$0xff]   ;;  %v357_v59 = vld [vmem:[%s535_s2 + $0x54] ss:$8 sps:$4 sm:$0xff]   ;;  %v359_v60 = vld [vmem:[%s535_s2 + $0x50] ss:$8 sps:$4 sm:$0xff]  }
   0xf   :  { %256 = vmatprep.subr.bf16.mxu0 %v345_v44  ;;  %v360_v61 = vld [vmem:[%s535_s2 + $0x64] ss:$8 sps:$4 sm:$0xff]   ;;  %v362_v62 = vld [vmem:[%s535_s2 + $0x60] ss:$8 sps:$4 sm:$0xff]   ;;  %v363_v63 = vld [vmem:[%s535_s2 + $0x74] ss:$8 sps:$4 sm:$0xff]  }
  0x10   :  { %v365_v1 = vld [vmem:[%s535_s2 + $0x70] ss:$8 sps:$4 sm:$0xff]   ;;  %s374_s28 = scalar_lea.vmem %s314_s27, 64 }
  0x11   :  { %p375_p0 = scmp.ne.s32.totalorder %s314_s27, %s374_s28  ;;  %p380_p2 = scmp.lt.s32.totalorder %s374_s28, %s374_s28 }
  0x12   :  { %257 = vmatpush1.bf16.msra.mxu0 %v347_v45 }
  0x13   :  { %258 = vmatprep.subr.bf16.mxu0 %v348_v52  ;;  %p381_p3 = por %p380_p2, %p379_p1 }
  0x15   :  { %p382_p4 = pnand %p381_p3, %p375_p0 }
  0x16   :  { %259 = vmatpush1.bf16.msra.mxu0 %v350_v54 }
  0x17   :  { %260 = vmatprep.subr.bf16.mxu0 %v351_v55 }
  0x1a   :  { %261 = vmatpush1.bf16.msra.mxu0 %v353_v56 }
  0x1b   :  { %262 = vmatprep.subr.bf16.mxu0 %v354_v57 }
  0x1e   :  { %263 = vmatpush1.bf16.msra.mxu0 %v356_v58 }
  0x1f   :  { %264 = vmatprep.subr.bf16.mxu0 %v357_v59 }
  0x22   :  { %265 = vmatpush1.bf16.msra.mxu0 %v359_v60 }
  0x23   :  { %266 = vmatprep.subr.bf16.mxu0 %v360_v61 }
  0x26   :  { %267 = vmatpush1.bf16.msra.mxu0 %v362_v62 }
  0x27   :  { %268 = vmatprep.subr.bf16.mxu0 %v363_v63 }
  0x2a   :  { %269 = vmatpush1.bf16.msra.mxu0 %v365_v1 }
  0x95   :  { %v32_v15 = vpop.xlane.xlu0 %31 }
  0x96   :  { %v37_v17 = vmul.f32 0.0078125, %v32_v15 }
  0x98   :  { %v46_v20 = vrot.slane %v37_v17, %v45_v16 }
  0x99   :  { %v35_v18 = vpop.xlane.xlu0 %34 }
  0x9a   :  { %v38_v19 = vmul.f32 0.0078125, %v35_v18 }
  0x9c   :  { %v50_v21 = vrot.slane %v38_v19, %v45_v16 }
  0x9e   :  { %v52_v22 = vsel %vm51_vm1, %v50_v21, %v46_v20 }
  0x9f   :  { %v55_v23 = vsel %vm54_vm2, %v52_v22, -inf }
  0xa0   :  { %56 = vmax.xlane.f32.xlu1 %v55_v23 }
 0x12d   :  { %v57_v27 = vpop.xlane.xlu1 %56 }
 0x12e   :  { %v62_v28 = vrot.slane %v57_v27, %v451_v25  ;;  %v66_v29 = vrot.slane %v57_v27, %v453_v26  ;;  %v155_v27 = vld [vmem:[%s536_s3] sm:$0x3] }
 0x130   :  { %v69_v30 = vsub.f32 %v37_v17, %v62_v28  ;;  %v70_v31 = vsub.f32 %v38_v19, %v66_v29  ;;  %v160_v28 = vrot.slane %v155_v27, %v451_v25  ;;  %v164_v29 = vrot.slane %v155_v27, %v453_v26 }
 0x132   :  { %v71_v32 = vmul.f32 1.442695, %v69_v30  ;;  %v73_v33 = vmul.f32 1.442695, %v70_v31 }
 0x134   :  { %366 = vpow2.f32 %v71_v32 }
 0x135   :  { %368 = vpow2.f32 %v73_v33 }
 0x13e   :  { %v367_v34 = vpop.eup %366 }
 0x13f   :  { %v369_v35 = vpop.eup %368  ;;  %78 = vperm.xlu1 %340, %v367_v34  }
 0x140   :  { %81 = vperm.xlu0 %341, %v369_v35  }
 0x1be   :  { %v79_v36 = vpop.permute.xlu1 %78 }
 0x1bf   :  { %v82_v37 = vpop.permute.xlu0 %81  ;;  %v86_v38 = vrot.slane %v79_v36, %v45_v16 }
 0x1c0   :  { %v90_v39 = vrot.slane %v82_v37, %v45_v16 }
 0x1c2   :  { %v91_v40 = vsel %vm51_vm1, %v90_v39, %v86_v38 }
 0x1c3   :  { %v93_v41 = vsel %vm54_vm2, %v91_v40, 0.0 }
 0x1c4   :  { %94 = vadd.xlane.f32.xlu1 %v93_v41 }
 0x251   :  { %v95_v46 = vpop.xlane.xlu1 %94 }
 0x252   :  { %v100_v47 = vrot.slane %v95_v46, %v451_v25  ;;  %v104_v48 = vrot.slane %v95_v46, %v453_v26 }
 0x254   :  { %370 = vrcp.f32 %v100_v47 }
 0x255   :  { %372 = vrcp.f32 %v104_v48 }
 0x25e   :  { %v371_v49 = vpop.eup %370 }
 0x25f   :  { %v108_v50 = vmul.f32 %v371_v49, %v367_v34  ;;  %v373_v51 = vpop.eup %372 }
 0x260   :  { %v110_v53 = vmul.f32 %v373_v51, %v369_v35 }
 0x261   :  { %113 = vperm.xlu0 %341, %v108_v50  }
 0x265   :  { %118 = vperm.xlu0 %341, %v110_v53  }
 0x2e0   :  { %v114_v3 = vpop.permute.xlu0 %113 }
 0x2e1   :  { %v121_v5 = vmul.f32 %v114_v3, %v21_v2 }
 0x2e3   :  { %v123_v7 = vsel %vm29_vm0, %v121_v5, 0.0 }
 0x2e4   :  { %v124_v8 = vrot.slane %v123_v7, 4  ;;  %v119_v9 = vpop.permute.xlu0 %118 }
 0x2e5   :  { %v122_v10 = vmul.f32 %v119_v9, %v22_v6 }
 0x2e6   :  { %v125_v11 = vadd.f32 %v124_v8, %v123_v7 }
 0x2e7   :  { %v130_v12 = vsel %vm29_vm0, %v122_v10, 0.0 }
 0x2e8   :  { %v126_v13 = vrot.slane %v125_v11, 2  ;;  %v131_v14 = vrot.slane %v130_v12, 4 }
 0x2ea   :  { %v127_v15 = vadd.f32 %v126_v13, %v125_v11  ;;  %v132_v16 = vadd.f32 %v131_v14, %v130_v12 }
 0x2ec   :  { %v128_v17 = vrot.slane %v127_v15, 1  ;;  %v133_v18 = vrot.slane %v132_v16, 2 }
 0x2ee   :  { %v129_v19 = vadd.f32 %v128_v17, %v127_v15  ;;  %v134_v20 = vadd.f32 %v133_v18, %v132_v16 }
 0x2f0   :  { %v135_v0 = vrot.slane %v134_v20, 1  ;;  %v137_v2 = vpack.c.bf16 %v129_v19, %v129_v19 }
 0x2f2   :  { %v136_v21 = vadd.f32 %v135_v0, %v134_v20  ;;  %v169_v23 = vunpack.c.l.b16 %v137_v2 }
 0x2f4   :  { %v138_v22 = vpack.c.bf16 %v136_v21, %v136_v21 }
 0x2f6   :  { %v170_v24 = vunpack.c.l.b16 %v138_v22 }
 0x2f8   :  { %v171_v4 = vsel %vm51_vm1, %v170_v24, %v169_v23 }
 0x2f9   :  { %v172_v6 = vpack.c.b16 %v171_v4, %v171_v4 }
 0x2fb   :  { %287 = vmatmul.mubr.bf16.vlgmr.msra.gmra.mrb[0].mxu0 %v172_v6 }
 0x3ce   :  { %v288_v30 = vpop.f32.mrb[0].mxu0 }
 0x3cf   :  { %v289_v31 = vadd.f32 %v288_v30, %v160_v28  ;;  %v290_v32 = vpop.f32.mrb[1].mxu0 }
 0x3d0   :  { %v291_v33 = vadd.f32 %v290_v32, %v164_v29  ;;  %v292_v34 = vpop.f32.mrb[2].mxu0 }
 0x3d1   :  { %v293_v35 = vpop.f32.mrb[3].mxu0 }
 0x3d2   :  { %v297_v36 = vcombine.low %v289_v31, %v291_v33 }
 0x3d4   :  { %337 = vst.sshfl [vmem:[#allocation2] sm:$0x33 pattern:$0x76325410] %v297_v36 }
 0x3d5   :  { %385 = shalt.err (!%p382_p4)
}
 0x3d6   :  { %s386_s30 = scalar_lea.hbm %s537_s4, 64 }
 0x3d7   :  { %p387_p5 = scmp.ne.s32.totalorder %s537_s4, %s386_s30  ;;  %p390_p6 = scmp.lt.u32.totalorder %s386_s30, %s537_s4 }
 0x3d9   :  { %p392_p7 = pnand %p390_p6, %p387_p5 }
 0x3db   :  { %395 = shalt.err (!%p392_p7)
}
 0x3dc   :  { %316 = dma.vmem_to_hbm [thread:$0]  %s314_s27, 64, %s537_s4, [#allocation3]  }
 0x3dd   :  { %396 = dma.done.wait [#allocation3], 64  }
 0x3de   :  { %397 = vsyncadd [#allocation3], 4294967232 }
 0x3df   :  { %320 = vsyncpa [#allocation3], 1 }

// kernel: gseqformer_forward.22
= control target key start
LH: loop header
LB: loop body
LE: loop exit
PB: predicated region body
PF: predicated region fallthrough
CT: control target
= control target key end

     0   :  { %v1226_v1 = vmov 0.0   ;;  %vm1227_vm0 = vmmov 0   ;;  %s1538_s4 = inlined_call_operand.vmem [shape: bf16[384,128], index: 4, kind: input, shape index: {}]   ;;  %s1539_s1 = inlined_call_operand.vmem [shape: bf16[8,384], index: 1, kind: input, shape index: {}]   ;;  %s1540_s3 = inlined_call_operand.vmem [shape: bf16[384,128], index: 3, kind: input, shape index: {}]   ;;  %s1541_s0 = inlined_call_operand.vmem [shape: bf16[8,384], index: 0, kind: input, shape index: {}]   ;;  %s1542_s5 = inlined_call_operand.vmem [shape: bf16[384,128], index: 5, kind: input, shape index: {}]   ;;  %s1543_s2 = inlined_call_operand.vmem [shape: bf16[8,384], index: 2, kind: input, shape index: {}]   ;;  %s1544_s6 = inlined_call_operand.vmem [shape: f32[1,128], index: 6, kind: input, shape index: {}]   ;;  %s1545_s7 = inlined_call_operand.vmem [shape: bf16[8,128], index: 7, kind: output, shape index: {}]  }
   0x1   :  { %v1143_v0 = vld [vmem:[%s1538_s4 + $0x40] sm:$0xff]   ;;  %1081 = vmatprep.subr.bf16.mxu1 %v1226_v1  ;;  %1097 = vmatprep.mubr.msk.bf16.mxu1 %vm1227_vm0, %v1226_v1  ;;  %v1146_v4 = vld [vmem:[%s1538_s4 + $0x48] sm:$0xff]   ;;  %v1149_v7 = vld [vmem:[%s1538_s4 + $0x50] sm:$0xff]  }
   0x2   :  { %v1144_v2 = vld [vmem:[%s1538_s4] sm:$0xff]   ;;  %988 = vmatprep.subr.bf16.mxu0 %v1143_v0  ;;  %v1147_v5 = vld [vmem:[%s1538_s4 + $0x8] sm:$0xff]   ;;  %v1150_v8 = vld [vmem:[%s1538_s4 + $0x10] sm:$0xff]  }
   0x3   :  { %v1145_v3 = vld [vmem:[%s1538_s4 + $0x80] sm:$0xff]   ;;  %989 = vmatpush3.bf16.msra.mxu0 %v1144_v2  ;;  %v1148_v6 = vld [vmem:[%s1538_s4 + $0x88] sm:$0xff]   ;;  %v1151_v9 = vld [vmem:[%s1538_s4 + $0x90] sm:$0xff]  }
   0x4   :  { %1082 = vmatpush3.bf16.msra.mxu1 %v1145_v3  ;;  %990 = vmatprep.subr.bf16.mxu0 %v1146_v4  ;;  %v1152_v10 = vld [vmem:[%s1538_s4 + $0x58] sm:$0xff]   ;;  %v1155_v13 = vld [vmem:[%s1538_s4 + $0x60] sm:$0xff]   ;;  %v1158_v16 = vld [vmem:[%s1538_s4 + $0x68] sm:$0xff]  }
   0x5   :  { %1083 = vmatprep.subr.bf16.mxu1 %v1226_v1  ;;  %v1153_v11 = vld [vmem:[%s1538_s4 + $0x18] sm:$0xff]   ;;  %v1156_v14 = vld [vmem:[%s1538_s4 + $0x20] sm:$0xff]   ;;  %v1159_v17 = vld [vmem:[%s1538_s4 + $0x28] sm:$0xff]  }
   0x6   :  { %v1154_v12 = vld [vmem:[%s1538_s4 + $0x98] sm:$0xff]   ;;  %v1157_v15 = vld [vmem:[%s1538_s4 + $0xa0] sm:$0xff]   ;;  %v1160_v18 = vld [vmem:[%s1538_s4 + $0xa8] sm:$0xff]  }
   0x7   :  { %991 = vmatpush3.bf16.msra.mxu0 %v1147_v5  ;;  %v1161_v19 = vld [vmem:[%s1538_s4 + $0x70] sm:$0xff]   ;;  %v1164_v22 = vld [vmem:[%s1538_s4 + $0x78] sm:$0xff]   ;;  %v77_v23 = vld [vmem:[%s1539_s1] sm:$0xff] }
   0x8   :  { %1084 = vmatpush3.bf16.msra.mxu1 %v1148_v6  ;;  %992 = vmatprep.subr.bf16.mxu0 %v1149_v7  ;;  %v1162_v20 = vld [vmem:[%s1538_s4 + $0x30] sm:$0xff]   ;;  %v907_v24 = vcombine.high %v77_v23, %v77_v23  ;;  %v1165_v25 = vld [vmem:[%s1538_s4 + $0x38] sm:$0xff]   ;;  %v1170_v27 = vld [vmem:[%s1540_s3 + $0x40] sm:$0xff]   ;;  %v906_v29 = vcombine.low %v77_v23, %v77_v23 }
   0x9   :  { %1085 = vmatprep.subr.bf16.mxu1 %v1226_v1  ;;  %v1163_v21 = vld [vmem:[%s1538_s4 + $0xb0] sm:$0xff]   ;;  %v1166_v26 = vld [vmem:[%s1538_s4 + $0xb8] sm:$0xff]   ;;  %v1169_v28 = vld [vmem:[%s1539_s1 + $0x8] ss:$0 sps:$4 sm:$0xff]  }
   0xa   :  { %314 = vmatprep.mubr.bf16.mxu0 %v907_v24  ;;  %v1171_v30 = vld [vmem:[%s1540_s3] sm:$0xff]   ;;  %v1173_v32 = vld [vmem:[%s1540_s3 + $0x48] sm:$0xff]   ;;  %v1176_v35 = vld [vmem:[%s1540_s3 + $0x50] sm:$0xff]  }
   0xb   :  { %993 = vmatpush3.bf16.msra.mxu0 %v1150_v8  ;;  %v1172_v31 = vld [vmem:[%s1540_s3 + $0x80] sm:$0xff]   ;;  %v1174_v33 = vld [vmem:[%s1540_s3 + $0x8] sm:$0xff]   ;;  %v1177_v36 = vld [vmem:[%s1540_s3 + $0x10] sm:$0xff]  }
   0xc   :  { %1086 = vmatpush3.bf16.msra.mxu1 %v1151_v9  ;;  %994 = vmatprep.subr.bf16.mxu0 %v1152_v10  ;;  %v1175_v34 = vld [vmem:[%s1540_s3 + $0x88] sm:$0xff]   ;;  %v1178_v37 = vld [vmem:[%s1540_s3 + $0x90] sm:$0xff]   ;;  %v1179_v38 = vld [vmem:[%s1540_s3 + $0x58] sm:$0xff]  }
   0xd   :  { %1087 = vmatprep.subr.bf16.mxu1 %v1226_v1  ;;  %v1180_v39 = vld [vmem:[%s1540_s3 + $0x18] sm:$0xff]   ;;  %v1182_v41 = vld [vmem:[%s1540_s3 + $0x60] sm:$0xff]   ;;  %v1185_v44 = vld [vmem:[%s1540_s3 + $0x68] sm:$0xff]  }
   0xe   :  { %v1181_v40 = vld [vmem:[%s1540_s3 + $0x98] sm:$0xff]   ;;  %v1183_v42 = vld [vmem:[%s1540_s3 + $0x20] sm:$0xff]   ;;  %v1186_v46 = vld [vmem:[%s1540_s3 + $0x28] sm:$0xff]  }
   0xf   :  { %995 = vmatpush3.bf16.msra.mxu0 %v1153_v11  ;;  %v1184_v43 = vld [vmem:[%s1540_s3 + $0xa0] sm:$0xff]   ;;  %v1187_v48 = vld [vmem:[%s1540_s3 + $0xa8] sm:$0xff]   ;;  %v1188_v49 = vld [vmem:[%s1540_s3 + $0x70] sm:$0xff]  }
  0x10   :  { %1088 = vmatpush3.bf16.msra.mxu1 %v1154_v12  ;;  %996 = vmatprep.subr.bf16.mxu0 %v1155_v13  ;;  %v27_v45 = vld [vmem:[%s1541_s0] sm:$0xff]  ;;  %v1189_v50 = vld [vmem:[%s1540_s3 + $0x30] sm:$0xff]   ;;  %v1191_v52 = vld [vmem:[%s1540_s3 + $0x78] sm:$0xff]  }
  0x11   :  { %1089 = vmatprep.subr.bf16.mxu1 %v1226_v1  ;;  %v934_v47 = vcombine.high %v27_v45, %v27_v45  ;;  %v1190_v51 = vld [vmem:[%s1540_s3 + $0xb0] sm:$0xff]   ;;  %v1192_v53 = vld [vmem:[%s1540_s3 + $0x38] sm:$0xff]   ;;  %v1197_v55 = vld [vmem:[%s1542_s5 + $0x40] sm:$0xff]   ;;  %v933_v57 = vcombine.low %v27_v45, %v27_v45 }
  0x12   :  { %v1193_v54 = vld [vmem:[%s1540_s3 + $0xb8] sm:$0xff]   ;;  %v1196_v56 = vld [vmem:[%s1541_s0 + $0x8] ss:$0 sps:$4 sm:$0xff]   ;;  %v1198_v58 = vld [vmem:[%s1542_s5] sm:$0xff]  }
  0x13   :  { %997 = vmatpush3.bf16.msra.mxu0 %v1156_v14  ;;  %v1199_v59 = vld [vmem:[%s1542_s5 + $0x80] sm:$0xff]   ;;  %v1200_v60 = vld [vmem:[%s1542_s5 + $0x48] sm:$0xff]   ;;  %v1203_v63 = vld [vmem:[%s1542_s5 + $0x50] sm:$0xff]  }
  0x14   :  { %1090 = vmatpush3.bf16.msra.mxu1 %v1157_v15  ;;  %998 = vmatprep.subr.bf16.mxu0 %v1158_v16  ;;  %v1201_v61 = vld [vmem:[%s1542_s5 + $0x8] sm:$0xff]   ;;  %v1204_v0 = vld [vmem:[%s1542_s5 + $0x10] sm:$0xff]   ;;  %v1206_v3 = vld [vmem:[%s1542_s5 + $0x58] sm:$0xff]  }
  0x15   :  { %1091 = vmatprep.subr.bf16.mxu1 %v1226_v1  ;;  %v1202_v62 = vld [vmem:[%s1542_s5 + $0x88] sm:$0xff]   ;;  %v1205_v2 = vld [vmem:[%s1542_s5 + $0x90] sm:$0xff]   ;;  %v597_v4 = vld [vmem:[%s1543_s2] sm:$0xff] }
  0x16   :  { %v1207_v5 = vld [vmem:[%s1542_s5 + $0x18] sm:$0xff]   ;;  %v961_v6 = vcombine.high %v597_v4, %v597_v4  ;;  %v1209_v8 = vld [vmem:[%s1542_s5 + $0x60] sm:$0xff]   ;;  %v1212_v11 = vld [vmem:[%s1542_s5 + $0x68] sm:$0xff]  }
  0x17   :  { %999 = vmatpush3.bf16.msra.mxu0 %v1159_v17  ;;  %v1208_v7 = vld [vmem:[%s1542_s5 + $0x98] sm:$0xff]   ;;  %v1210_v9 = vld [vmem:[%s1542_s5 + $0x20] sm:$0xff]   ;;  %v1213_v12 = vld [vmem:[%s1542_s5 + $0x28] sm:$0xff]  }
  0x18   :  { %1092 = vmatpush3.bf16.msra.mxu1 %v1160_v18  ;;  %1000 = vmatprep.subr.bf16.mxu0 %v1161_v19  ;;  %v1211_v10 = vld [vmem:[%s1542_s5 + $0xa0] sm:$0xff]   ;;  %v1214_v13 = vld [vmem:[%s1542_s5 + $0xa8] sm:$0xff]   ;;  %v1215_v14 = vld [vmem:[%s1542_s5 + $0x70] sm:$0xff]  }
  0x19   :  { %1093 = vmatprep.subr.bf16.mxu1 %v1226_v1  ;;  %v1216_v15 = vld [vmem:[%s1542_s5 + $0x30] sm:$0xff]   ;;  %v1218_v17 = vld [vmem:[%s1542_s5 + $0x78] sm:$0xff]  }
  0x1a   :  { %v1217_v16 = vld [vmem:[%s1542_s5 + $0xb0] sm:$0xff]   ;;  %v1219_v18 = vld [vmem:[%s1542_s5 + $0x38] sm:$0xff]  }
  0x1b   :  { %1001 = vmatpush3.bf16.msra.mxu0 %v1162_v20  ;;  %v1220_v19 = vld [vmem:[%s1542_s5 + $0xb8] sm:$0xff]   ;;  %v960_v20 = vcombine.low %v597_v4, %v597_v4 }
  0x1c   :  { %1094 = vmatpush3.bf16.msra.mxu1 %v1163_v21  ;;  %1002 = vmatprep.subr.bf16.mxu0 %v1164_v22  ;;  %v1223_v21 = vld [vmem:[%s1543_s2 + $0x8] ss:$0 sps:$4 sm:$0xff]  }
  0x1d   :  { %1095 = vmatprep.subr.bf16.mxu1 %v1226_v1 }
  0x1f   :  { %1003 = vmatpush3.bf16.msra.mxu0 %v1165_v25 }
  0x20   :  { %1096 = vmatpush3.bf16.msra.mxu1 %v1166_v26  ;;  %1019 = vmatprep.subr.bf16.mxu0 %v1170_v27 }
  0x21   :  { %1101 = vmatprep.subr.bf16.mxu1 %v1226_v1 }
  0x22   :  { %315 = vmatmul.mubr.bf16.vlgmr.msra.gmra.mrb[0].mxu0 %v906_v29 }
  0x23   :  { %1098 = vmatmul.mubr.bf16.vlgmr.msra.gmra.mrb[0].mxu1 %v1169_v28  ;;  %1020 = vmatpush3.bf16.msra.mxu0 %v1171_v30 }
  0x24   :  { %1102 = vmatpush3.bf16.msra.mxu1 %v1172_v31  ;;  %1021 = vmatprep.subr.bf16.mxu0 %v1173_v32 }
  0x25   :  { %1103 = vmatprep.subr.bf16.mxu1 %v1226_v1  ;;  %1117 = vmatprep.mubr.msk.bf16.mxu1 %vm1227_vm0, %v1226_v1 }
  0x26   :  { %549 = vmatprep.mubr.bf16.mxu0 %v934_v47 }
  0x27   :  { %1022 = vmatpush3.bf16.msra.mxu0 %v1174_v33 }
  0x28   :  { %1104 = vmatpush3.bf16.msra.mxu1 %v1175_v34  ;;  %1023 = vmatprep.subr.bf16.mxu0 %v1176_v35 }
  0x29   :  { %1105 = vmatprep.subr.bf16.mxu1 %v1226_v1 }
  0x2b   :  { %1024 = vmatpush3.bf16.msra.mxu0 %v1177_v36 }
  0x2c   :  { %1106 = vmatpush3.bf16.msra.mxu1 %v1178_v37  ;;  %1025 = vmatprep.subr.bf16.mxu0 %v1179_v38 }
  0x2d   :  { %1107 = vmatprep.subr.bf16.mxu1 %v1226_v1 }
  0x2f   :  { %1026 = vmatpush3.bf16.msra.mxu0 %v1180_v39 }
  0x30   :  { %1108 = vmatpush3.bf16.msra.mxu1 %v1181_v40  ;;  %1027 = vmatprep.subr.bf16.mxu0 %v1182_v41 }
  0x31   :  { %1109 = vmatprep.subr.bf16.mxu1 %v1226_v1 }
  0x33   :  { %1028 = vmatpush3.bf16.msra.mxu0 %v1183_v42 }
  0x34   :  { %1110 = vmatpush3.bf16.msra.mxu1 %v1184_v43  ;;  %1029 = vmatprep.subr.bf16.mxu0 %v1185_v44 }
  0x35   :  { %1111 = vmatprep.subr.bf16.mxu1 %v1226_v1 }
  0x37   :  { %1030 = vmatpush3.bf16.msra.mxu0 %v1186_v46 }
  0x38   :  { %1112 = vmatpush3.bf16.msra.mxu1 %v1187_v48  ;;  %1031 = vmatprep.subr.bf16.mxu0 %v1188_v49 }
  0x39   :  { %1113 = vmatprep.subr.bf16.mxu1 %v1226_v1 }
  0x3b   :  { %1032 = vmatpush3.bf16.msra.mxu0 %v1189_v50 }
  0x3c   :  { %1114 = vmatpush3.bf16.msra.mxu1 %v1190_v51  ;;  %1033 = vmatprep.subr.bf16.mxu0 %v1191_v52  ;;  %v987_v52 = vld [vmem:[%s1544_s6] ss:$0 sm:$0xff] }
  0x3d   :  { %1115 = vmatprep.subr.bf16.mxu1 %v1226_v1 }
  0x3f   :  { %1034 = vmatpush3.bf16.msra.mxu0 %v1192_v53 }
  0x40   :  { %1116 = vmatpush3.bf16.msra.mxu1 %v1193_v54  ;;  %1050 = vmatprep.subr.bf16.mxu0 %v1197_v55 }
  0x41   :  { %1121 = vmatprep.subr.bf16.mxu1 %v1226_v1 }
  0x42   :  { %550 = vmatmul.mubr.bf16.vlgmr.msra.gmra.mrb[4].mxu0 %v933_v57 }
  0x43   :  { %1118 = vmatmul.mubr.bf16.vlgmr.msra.gmra.mrb[4].mxu1 %v1196_v56  ;;  %1051 = vmatpush3.bf16.msra.mxu0 %v1198_v58 }
  0x44   :  { %1122 = vmatpush3.bf16.msra.mxu1 %v1199_v59  ;;  %1052 = vmatprep.subr.bf16.mxu0 %v1200_v60 }
  0x45   :  { %1123 = vmatprep.subr.bf16.mxu1 %v1226_v1  ;;  %1137 = vmatprep.mubr.msk.bf16.mxu1 %vm1227_vm0, %v1226_v1 }
  0x46   :  { %834 = vmatprep.mubr.bf16.mxu0 %v961_v6 }
  0x47   :  { %1053 = vmatpush3.bf16.msra.mxu0 %v1201_v61 }
  0x48   :  { %1124 = vmatpush3.bf16.msra.mxu1 %v1202_v62  ;;  %1054 = vmatprep.subr.bf16.mxu0 %v1203_v63 }
  0x49   :  { %1125 = vmatprep.subr.bf16.mxu1 %v1226_v1 }
  0x4b   :  { %1055 = vmatpush3.bf16.msra.mxu0 %v1204_v0 }
  0x4c   :  { %1126 = vmatpush3.bf16.msra.mxu1 %v1205_v2  ;;  %1056 = vmatprep.subr.bf16.mxu0 %v1206_v3 }
  0x4d   :  { %1127 = vmatprep.subr.bf16.mxu1 %v1226_v1 }
  0x4f   :  { %1057 = vmatpush3.bf16.msra.mxu0 %v1207_v5 }
  0x50   :  { %1128 = vmatpush3.bf16.msra.mxu1 %v1208_v7  ;;  %1058 = vmatprep.subr.bf16.mxu0 %v1209_v8 }
  0x51   :  { %1129 = vmatprep.subr.bf16.mxu1 %v1226_v1 }
  0x53   :  { %1059 = vmatpush3.bf16.msra.mxu0 %v1210_v9 }
  0x54   :  { %1130 = vmatpush3.bf16.msra.mxu1 %v1211_v10  ;;  %1060 = vmatprep.subr.bf16.mxu0 %v1212_v11 }
  0x55   :  { %1131 = vmatprep.subr.bf16.mxu1 %v1226_v1 }
  0x57   :  { %1061 = vmatpush3.bf16.msra.mxu0 %v1213_v12 }
  0x58   :  { %1132 = vmatpush3.bf16.msra.mxu1 %v1214_v13  ;;  %1062 = vmatprep.subr.bf16.mxu0 %v1215_v14 }
  0x59   :  { %1133 = vmatprep.subr.bf16.mxu1 %v1226_v1 }
  0x5b   :  { %1063 = vmatpush3.bf16.msra.mxu0 %v1216_v15 }
  0x5c   :  { %1134 = vmatpush3.bf16.msra.mxu1 %v1217_v16  ;;  %1064 = vmatprep.subr.bf16.mxu0 %v1218_v17 }
  0x5d   :  { %1135 = vmatprep.subr.bf16.mxu1 %v1226_v1 }
  0x5f   :  { %1065 = vmatpush3.bf16.msra.mxu0 %v1219_v18 }
  0x60   :  { %1136 = vmatpush3.bf16.msra.mxu1 %v1220_v19 }
  0x62   :  { %835 = vmatmul.mubr.bf16.vlgmr.msra.gmra.mrb[8].mxu0 %v960_v20 }
  0x63   :  { %1138 = vmatmul.mubr.bf16.vlgmr.msra.gmra.mrb[8].mxu1 %v1223_v21 }
  0xf5   :  { %v1004_v22 = vpop.f32.mrb[0].mxu0 }
  0xf6   :  { %v1005_v23 = vpop.f32.mrb[1].mxu0  ;;  %v356_v24 = vpop.f32.mrb[0].mxu1 }
  0xf7   :  { %v1006_v25 = vadd.f32 %v1005_v23, %v1004_v22  ;;  %v1007_v26 = vpop.f32.mrb[2].mxu0  ;;  %v1099_v27 = vpop.f32.mrb[1].mxu1 }
  0xf8   :  { %v1008_v28 = vpop.f32.mrb[3].mxu0  ;;  %v359_v29 = vpop.f32.mrb[2].mxu1 }
  0xf9   :  { %v357_v30 = vadd.f32 %v1006_v25, %v356_v24  ;;  %v1100_v31 = vpop.f32.mrb[3].mxu1 }
 0x115   :  { %v1035_v1 = vpop.f32.mrb[4].mxu0 }
 0x116   :  { %v1036_v32 = vpop.f32.mrb[5].mxu0  ;;  %v591_v33 = vpop.f32.mrb[4].mxu1 }
 0x117   :  { %v1037_v34 = vadd.f32 %v1036_v32, %v1035_v1  ;;  %v1038_v35 = vpop.f32.mrb[6].mxu0  ;;  %v1119_v36 = vpop.f32.mrb[5].mxu1 }
 0x118   :  { %v1039_v37 = vpop.f32.mrb[7].mxu0  ;;  %v594_v38 = vpop.f32.mrb[6].mxu1 }
 0x119   :  { %v552_v39 = vadd.f32 %v1037_v34, %v357_v30  ;;  %v1120_v40 = vpop.f32.mrb[7].mxu1 }
 0x11b   :  { %v592_v41 = vadd.f32 %v591_v33, %v552_v39 }
 0x135   :  { %v1066_v42 = vpop.f32.mrb[8].mxu0 }
 0x136   :  { %v876_v43 = vpop.f32.mrb[8].mxu1  ;;  %v1067_v44 = vpop.f32.mrb[9].mxu0 }
 0x137   :  { %v1068_v45 = vadd.f32 %v1067_v44, %v1066_v42  ;;  %v1139_v46 = vpop.f32.mrb[9].mxu1  ;;  %v1069_v47 = vpop.f32.mrb[10].mxu0 }
 0x138   :  { %v879_v48 = vpop.f32.mrb[10].mxu1  ;;  %v1070_v49 = vpop.f32.mrb[11].mxu0 }
 0x139   :  { %v877_v50 = vadd.f32 %v1068_v45, %v876_v43  ;;  %v1140_v51 = vpop.f32.mrb[11].mxu1 }
 0x13b   :  { %v882_v53 = vadd.f32 %v877_v50, %v592_v41 }
 0x13d   :  { %v890_v54 = vadd.f32 %v987_v52, %v882_v53 }
 0x13f   :  { %v891_v55 = vmul.f32 %v890_v54, %v890_v54 }
 0x141   :  { %v892_v56 = vmul.f32 %v891_v55, %v890_v54 }
 0x143   :  { %v893_v57 = vmul.f32 0.044715, %v892_v56 }
 0x145   :  { %v894_v58 = vadd.f32 %v893_v57, %v890_v54 }
 0x147   :  { %v895_v59 = vmul.f32 0.7978846, %v894_v58 }
 0x149   :  { %1224 = vtanh.f32 %v895_v59 }
 0x153   :  { %v1225_v60 = vpop.eup %1224 }
 0x154   :  { %v897_v61 = vadd.f32 1.0, %v1225_v60 }
 0x156   :  { %v898_v62 = vmul.f32 0.5, %v897_v61 }
 0x158   :  { %v899_v63 = vmul.f32 %v898_v62, %v890_v54 }
 0x15a   :  { %v900_v0 = vpack.c.bf16 %v899_v63, %v899_v63 }
 0x15c   :  { %901 = vst [vmem:[%s1545_s7] sm:$0xf] %v900_v0 }

// kernel: gseqformer_forward.21
= control target key start
LH: loop header
LB: loop body
LE: loop exit
PB: predicated region body
PF: predicated region fallthrough
CT: control target
= control target key end

     0   :  { %s2405_s4 = inlined_call_operand.vmem [shape: bf16[256,384], index: 4, kind: input, shape index: {}]   ;;  %s2406_s3 = inlined_call_operand.vmem [shape: bf16[256,384], index: 3, kind: input, shape index: {}]   ;;  %s2407_s1 = inlined_call_operand.vmem [shape: bf16[16,256], index: 1, kind: input, shape index: {}]   ;;  %s2408_s0 = inlined_call_operand.vmem [shape: bf16[16,256], index: 0, kind: input, shape index: {}]   ;;  %s2409_s5 = inlined_call_operand.vmem [shape: bf16[256,384], index: 5, kind: input, shape index: {}]   ;;  %s2410_s2 = inlined_call_operand.vmem [shape: bf16[16,256], index: 2, kind: input, shape index: {}]   ;;  %s2411_s6 = inlined_call_operand.vmem [shape: f32[1,384], index: 6, kind: input, shape index: {}]   ;;  %s2412_s7 = inlined_call_operand.vmem [shape: bf16[16,384], index: 7, kind: input, shape index: {}]   ;;  %s2413_s8 = inlined_call_operand.vmem [shape: bf16[16,384], index: 8, kind: output, shape index: {}]  }
   0x1   :  { %v1637_v0 = vld [vmem:[%s2405_s4 + $0x4] ss:$12 sps:$4 sm:$0xff]   ;;  %v1641_v2 = vld [vmem:[%s2405_s4] ss:$12 sps:$4 sm:$0xff]   ;;  %v1643_v4 = vld [vmem:[%s2405_s4 + $0x1c] ss:$12 sps:$4 sm:$0xff]  }
   0x2   :  { %v1639_v1 = vld [vmem:[%s2406_s3 + $0x4] ss:$12 sps:$4 sm:$0xff]   ;;  %428 = vmatprep.subr.bf16.mxu1 %v1637_v0  ;;  %v1642_v3 = vld [vmem:[%s2406_s3] ss:$12 sps:$4 sm:$0xff]   ;;  %v1645_v5 = vld [vmem:[%s2406_s3 + $0x1c] ss:$12 sps:$4 sm:$0xff]  }
   0x3   :  { %778 = vmatprep.subr.bf16.mxu0 %v1639_v1  ;;  %429 = vmatpush1.bf16.msra.mxu1 %v1641_v2  ;;  %v1647_v6 = vld [vmem:[%s2405_s4 + $0x18] ss:$12 sps:$4 sm:$0xff]   ;;  %v1649_v8 = vld [vmem:[%s2405_s4 + $0x34] ss:$12 sps:$4 sm:$0xff]   ;;  %v1653_v10 = vld [vmem:[%s2405_s4 + $0x30] ss:$12 sps:$4 sm:$0xff]  }
   0x4   :  { %779 = vmatpush1.bf16.msra.mxu0 %v1642_v3  ;;  %430 = vmatprep.subr.bf16.mxu1 %v1643_v4  ;;  %v1648_v7 = vld [vmem:[%s2406_s3 + $0x18] ss:$12 sps:$4 sm:$0xff]   ;;  %v1651_v9 = vld [vmem:[%s2406_s3 + $0x34] ss:$12 sps:$4 sm:$0xff]   ;;  %v1654_v11 = vld [vmem:[%s2406_s3 + $0x30] ss:$12 sps:$4 sm:$0xff]  }
   0x5   :  { %780 = vmatprep.subr.bf16.mxu0 %v1645_v5  ;;  %v1655_v12 = vld [vmem:[%s2405_s4 + $0x4c] ss:$12 sps:$4 sm:$0xff]   ;;  %v1659_v14 = vld [vmem:[%s2405_s4 + $0x48] ss:$12 sps:$4 sm:$0xff]   ;;  %v1661_v16 = vld [vmem:[%s2405_s4 + $0x64] ss:$12 sps:$4 sm:$0xff]  }
   0x6   :  { %v1657_v13 = vld [vmem:[%s2406_s3 + $0x4c] ss:$12 sps:$4 sm:$0xff]   ;;  %v1660_v15 = vld [vmem:[%s2406_s3 + $0x48] ss:$12 sps:$4 sm:$0xff]   ;;  %v1663_v17 = vld [vmem:[%s2406_s3 + $0x64] ss:$12 sps:$4 sm:$0xff]  }
   0x7   :  { %431 = vmatpush1.bf16.msra.mxu1 %v1647_v6  ;;  %v1665_v18 = vld [vmem:[%s2405_s4 + $0x60] ss:$12 sps:$4 sm:$0xff]   ;;  %v1667_v20 = vld [vmem:[%s2405_s4 + $0x7c] ss:$12 sps:$4 sm:$0xff]   ;;  %v1671_v22 = vld [vmem:[%s2405_s4 + $0x78] ss:$12 sps:$4 sm:$0xff]  }
   0x8   :  { %781 = vmatpush1.bf16.msra.mxu0 %v1648_v7  ;;  %432 = vmatprep.subr.bf16.mxu1 %v1649_v8  ;;  %v1666_v19 = vld [vmem:[%s2406_s3 + $0x60] ss:$12 sps:$4 sm:$0xff]   ;;  %v1669_v21 = vld [vmem:[%s2406_s3 + $0x7c] ss:$12 sps:$4 sm:$0xff]   ;;  %v1672_v23 = vld [vmem:[%s2406_s3 + $0x78] ss:$12 sps:$4 sm:$0xff]  }
   0x9   :  { %782 = vmatprep.subr.bf16.mxu0 %v1651_v9  ;;  %v1673_v24 = vld [vmem:[%s2405_s4 + $0x94] ss:$12 sps:$4 sm:$0xff]   ;;  %v1677_v26 = vld [vmem:[%s2405_s4 + $0x90] ss:$12 sps:$4 sm:$0xff]   ;;  %v1679_v28 = vld [vmem:[%s2405_s4 + $0xac] ss:$12 sps:$4 sm:$0xff]  }
   0xa   :  { %v1675_v25 = vld [vmem:[%s2406_s3 + $0x94] ss:$12 sps:$4 sm:$0xff]   ;;  %v1678_v27 = vld [vmem:[%s2406_s3 + $0x90] ss:$12 sps:$4 sm:$0xff]   ;;  %v1681_v29 = vld [vmem:[%s2406_s3 + $0xac] ss:$12 sps:$4 sm:$0xff]  }
   0xb   :  { %433 = vmatpush1.bf16.msra.mxu1 %v1653_v10  ;;  %v1683_v30 = vld [vmem:[%s2405_s4 + $0xa8] ss:$12 sps:$4 sm:$0xff]   ;;  %v1685_v32 = vld [vmem:[%s2405_s4 + $0xc4] ss:$12 sps:$4 sm:$0xff]   ;;  %v1689_v34 = vld [vmem:[%s2405_s4 + $0xc0] ss:$12 sps:$4 sm:$0xff]  }
   0xc   :  { %783 = vmatpush1.bf16.msra.mxu0 %v1654_v11  ;;  %434 = vmatprep.subr.bf16.mxu1 %v1655_v12  ;;  %v1684_v31 = vld [vmem:[%s2406_s3 + $0xa8] ss:$12 sps:$4 sm:$0xff]   ;;  %v1687_v33 = vld [vmem:[%s2406_s3 + $0xc4] ss:$12 sps:$4 sm:$0xff]   ;;  %v1690_v35 = vld [vmem:[%s2406_s3 + $0xc0] ss:$12 sps:$4 sm:$0xff]  }
   0xd   :  { %784 = vmatprep.subr.bf16.mxu0 %v1657_v13  ;;  %v1691_v36 = vld [vmem:[%s2405_s4 + $0xdc] ss:$12 sps:$4 sm:$0xff]   ;;  %v1695_v38 = vld [vmem:[%s2405_s4 + $0xd8] ss:$12 sps:$4 sm:$0xff]   ;;  %v1697_v40 = vld [vmem:[%s2405_s4 + $0xf4] ss:$12 sps:$4 sm:$0xff]  }
   0xe   :  { %v1693_v37 = vld [vmem:[%s2406_s3 + $0xdc] ss:$12 sps:$4 sm:$0xff]   ;;  %v1696_v39 = vld [vmem:[%s2406_s3 + $0xd8] ss:$12 sps:$4 sm:$0xff]   ;;  %v1699_v41 = vld [vmem:[%s2406_s3 + $0xf4] ss:$12 sps:$4 sm:$0xff]  }
   0xf   :  { %435 = vmatpush1.bf16.msra.mxu1 %v1659_v14  ;;  %v1701_v42 = vld [vmem:[%s2405_s4 + $0xf0] ss:$12 sps:$4 sm:$0xff]   ;;  %v1703_v44 = vld [vmem:[%s2405_s4 + $0x10c] ss:$12 sps:$4 sm:$0xff]   ;;  %v1707_v46 = vld [vmem:[%s2405_s4 + $0x108] ss:$12 sps:$4 sm:$0xff]  }
  0x10   :  { %785 = vmatpush1.bf16.msra.mxu0 %v1660_v15  ;;  %436 = vmatprep.subr.bf16.mxu1 %v1661_v16  ;;  %v1702_v43 = vld [vmem:[%s2406_s3 + $0xf0] ss:$12 sps:$4 sm:$0xff]   ;;  %v1705_v45 = vld [vmem:[%s2406_s3 + $0x10c] ss:$12 sps:$4 sm:$0xff]   ;;  %v1708_v47 = vld [vmem:[%s2406_s3 + $0x108] ss:$12 sps:$4 sm:$0xff]  }
  0x11   :  { %786 = vmatprep.subr.bf16.mxu0 %v1663_v17  ;;  %v2042_v48 = vld [vmem:[%s2407_s1 + $0x4] ss:$8 sps:$4 sm:$0xff]   ;;  %v1715_v54 = vld [vmem:[%s2405_s4 + $0x13c] ss:$12 sps:$4 sm:$0xff]   ;;  %v1721_v58 = vld [vmem:[%s2405_s4 + $0x154] ss:$12 sps:$4 sm:$0xff]  }
  0x12   :  { %v1709_v49 = vld [vmem:[%s2405_s4 + $0x124] ss:$12 sps:$4 sm:$0xff]   ;;  %460 = vmatprep.mubr.bf16.mxu1 %v2042_v48  ;;  %v1713_v52 = vld [vmem:[%s2405_s4 + $0x120] ss:$12 sps:$4 sm:$0xff]   ;;  %v1717_v55 = vld [vmem:[%s2406_s3 + $0x13c] ss:$12 sps:$4 sm:$0xff]  }
  0x13   :  { %437 = vmatpush1.bf16.msra.mxu1 %v1665_v18  ;;  %v1711_v50 = vld [vmem:[%s2406_s3 + $0x124] ss:$12 sps:$4 sm:$0xff]   ;;  %v1714_v53 = vld [vmem:[%s2406_s3 + $0x120] ss:$12 sps:$4 sm:$0xff]   ;;  %v1731_v0 = vld [vmem:[%s2405_s4 + $0x168] ss:$12 sps:$4 sm:$0xff]  }
  0x14   :  { %787 = vmatpush1.bf16.msra.mxu0 %v1666_v19  ;;  %438 = vmatprep.subr.bf16.mxu1 %v1667_v20  ;;  %v2054_v51 = vld [vmem:[%s2408_s0 + $0x4] ss:$8 sps:$4 sm:$0xff]   ;;  %v1723_v59 = vld [vmem:[%s2406_s3 + $0x154] ss:$12 sps:$4 sm:$0xff]   ;;  %v1725_v60 = vld [vmem:[%s2405_s4 + $0x150] ss:$12 sps:$4 sm:$0xff]  }
  0x15   :  { %788 = vmatprep.subr.bf16.mxu0 %v1669_v21  ;;  %v1719_v56 = vld [vmem:[%s2405_s4 + $0x138] ss:$12 sps:$4 sm:$0xff]   ;;  %810 = vmatprep.mubr.bf16.mxu0 %v2054_v51  ;;  %v1726_v61 = vld [vmem:[%s2406_s3 + $0x150] ss:$12 sps:$4 sm:$0xff]   ;;  %v1732_v1 = vld [vmem:[%s2406_s3 + $0x168] ss:$12 sps:$4 sm:$0xff]  }
  0x16   :  { %v1720_v57 = vld [vmem:[%s2406_s3 + $0x138] ss:$12 sps:$4 sm:$0xff]   ;;  %v1736_v2 = vld [vmem:[%s2405_s4 + $0xc8] ss:$12 sps:$4 sm:$0xff]   ;;  %v1740_v6 = vld [vmem:[%s2409_s5] ss:$12 sps:$4 sm:$0xff]  }
  0x17   :  { %439 = vmatpush1.bf16.msra.mxu1 %v1671_v22  ;;  %v1727_v62 = vld [vmem:[%s2405_s4 + $0x16c] ss:$12 sps:$4 sm:$0xff]   ;;  %v2105_v3 = vld [vmem:[%s2407_s1] ss:$8 sps:$4 sm:$0xff]   ;;  %v1742_v5 = vld [vmem:[%s2409_s5 + $0x4] ss:$12 sps:$4 sm:$0xff]  }
  0x18   :  { %789 = vmatpush1.bf16.msra.mxu0 %v1672_v23  ;;  %440 = vmatprep.subr.bf16.mxu1 %v1673_v24  ;;  %v1729_v63 = vld [vmem:[%s2406_s3 + $0x16c] ss:$12 sps:$4 sm:$0xff]   ;;  %v2110_v4 = vld [vmem:[%s2408_s0] ss:$8 sps:$4 sm:$0xff]   ;;  %v1750_v14 = vld [vmem:[%s2409_s5 + $0x30] ss:$12 sps:$4 sm:$0xff]  }
  0x19   :  { %790 = vmatprep.subr.bf16.mxu0 %v1675_v25  ;;  %v1743_v7 = vld [vmem:[%s2405_s4 + $0x8] ss:$12 sps:$4 sm:$0xff]   ;;  %v1744_v8 = vld [vmem:[%s2405_s4 + $0xe0] ss:$12 sps:$4 sm:$0xff]   ;;  %v1745_v10 = vld [vmem:[%s2409_s5 + $0x18] ss:$12 sps:$4 sm:$0xff]  }
  0x1a   :  { %v1747_v9 = vld [vmem:[%s2409_s5 + $0x1c] ss:$12 sps:$4 sm:$0xff]   ;;  %v1748_v11 = vld [vmem:[%s2405_s4 + $0x20] ss:$12 sps:$4 sm:$0xff]   ;;  %v1749_v12 = vld [vmem:[%s2405_s4 + $0xf8] ss:$12 sps:$4 sm:$0xff]  }
  0x1b   :  { %441 = vmatpush1.bf16.msra.mxu1 %v1677_v26  ;;  %v1752_v13 = vld [vmem:[%s2409_s5 + $0x34] ss:$12 sps:$4 sm:$0xff]   ;;  %v1753_v15 = vld [vmem:[%s2405_s4 + $0x38] ss:$12 sps:$4 sm:$0xff]   ;;  %v1754_v16 = vld [vmem:[%s2405_s4 + $0x110] ss:$12 sps:$4 sm:$0xff]  }
  0x1c   :  { %791 = vmatpush1.bf16.msra.mxu0 %v1678_v27  ;;  %442 = vmatprep.subr.bf16.mxu1 %v1679_v28  ;;  %v1757_v17 = vld [vmem:[%s2409_s5 + $0x4c] ss:$12 sps:$4 sm:$0xff]   ;;  %v1755_v18 = vld [vmem:[%s2409_s5 + $0x48] ss:$12 sps:$4 sm:$0xff]   ;;  %v1758_v19 = vld [vmem:[%s2405_s4 + $0x50] ss:$12 sps:$4 sm:$0xff]  }
  0x1d   :  { %792 = vmatprep.subr.bf16.mxu0 %v1681_v29  ;;  %v1759_v20 = vld [vmem:[%s2405_s4 + $0x128] ss:$12 sps:$4 sm:$0xff]   ;;  %v1762_v21 = vld [vmem:[%s2409_s5 + $0x64] ss:$12 sps:$4 sm:$0xff]   ;;  %v1760_v22 = vld [vmem:[%s2409_s5 + $0x60] ss:$12 sps:$4 sm:$0xff]  }
  0x1e   :  { %v1763_v23 = vld [vmem:[%s2405_s4 + $0x68] ss:$12 sps:$4 sm:$0xff]   ;;  %v1764_v24 = vld [vmem:[%s2405_s4 + $0x140] ss:$12 sps:$4 sm:$0xff]   ;;  %v1765_v26 = vld [vmem:[%s2409_s5 + $0x78] ss:$12 sps:$4 sm:$0xff]  }
  0x1f   :  { %443 = vmatpush1.bf16.msra.mxu1 %v1683_v30  ;;  %v1767_v25 = vld [vmem:[%s2409_s5 + $0x7c] ss:$12 sps:$4 sm:$0xff]   ;;  %v1768_v27 = vld [vmem:[%s2405_s4 + $0x80] ss:$12 sps:$4 sm:$0xff]   ;;  %v1769_v28 = vld [vmem:[%s2405_s4 + $0x158] ss:$12 sps:$4 sm:$0xff]  }
  0x20   :  { %793 = vmatpush1.bf16.msra.mxu0 %v1684_v31  ;;  %444 = vmatprep.subr.bf16.mxu1 %v1685_v32  ;;  %v1772_v29 = vld [vmem:[%s2409_s5 + $0x94] ss:$12 sps:$4 sm:$0xff]   ;;  %v1770_v30 = vld [vmem:[%s2409_s5 + $0x90] ss:$12 sps:$4 sm:$0xff]   ;;  %v1773_v31 = vld [vmem:[%s2405_s4 + $0x98] ss:$12 sps:$4 sm:$0xff]  }
  0x21   :  { %794 = vmatprep.subr.bf16.mxu0 %v1687_v33  ;;  %v1774_v32 = vld [vmem:[%s2405_s4 + $0x170] ss:$12 sps:$4 sm:$0xff]   ;;  %v1777_v33 = vld [vmem:[%s2409_s5 + $0xac] ss:$12 sps:$4 sm:$0xff]  }
  0x23   :  { %445 = vmatpush1.bf16.msra.mxu1 %v1689_v34  ;;  %v1775_v34 = vld [vmem:[%s2409_s5 + $0xa8] ss:$12 sps:$4 sm:$0xff]  }
  0x24   :  { %795 = vmatpush1.bf16.msra.mxu0 %v1690_v35  ;;  %446 = vmatprep.subr.bf16.mxu1 %v1691_v36  ;;  %v1778_v35 = vld [vmem:[%s2405_s4 + $0xb0] ss:$12 sps:$4 sm:$0xff]   ;;  %v1779_v36 = vld [vmem:[%s2406_s3 + $0xc8] ss:$12 sps:$4 sm:$0xff]  }
  0x25   :  { %796 = vmatprep.subr.bf16.mxu0 %v1693_v37  ;;  %v1782_v37 = vld [vmem:[%s2409_s5 + $0xc4] ss:$12 sps:$4 sm:$0xff]  }
  0x27   :  { %447 = vmatpush1.bf16.msra.mxu1 %v1695_v38  ;;  %v1780_v38 = vld [vmem:[%s2409_s5 + $0xc0] ss:$12 sps:$4 sm:$0xff]  }
  0x28   :  { %797 = vmatpush1.bf16.msra.mxu0 %v1696_v39  ;;  %448 = vmatprep.subr.bf16.mxu1 %v1697_v40  ;;  %v1783_v39 = vld [vmem:[%s2406_s3 + $0x8] ss:$12 sps:$4 sm:$0xff]   ;;  %v1784_v40 = vld [vmem:[%s2406_s3 + $0xe0] ss:$12 sps:$4 sm:$0xff]  }
  0x29   :  { %798 = vmatprep.subr.bf16.mxu0 %v1699_v41  ;;  %v1787_v41 = vld [vmem:[%s2409_s5 + $0xdc] ss:$12 sps:$4 sm:$0xff]  }
  0x2b   :  { %449 = vmatpush1.bf16.msra.mxu1 %v1701_v42  ;;  %v1785_v42 = vld [vmem:[%s2409_s5 + $0xd8] ss:$12 sps:$4 sm:$0xff]  }
  0x2c   :  { %799 = vmatpush1.bf16.msra.mxu0 %v1702_v43  ;;  %450 = vmatprep.subr.bf16.mxu1 %v1703_v44  ;;  %v1788_v43 = vld [vmem:[%s2406_s3 + $0x20] ss:$12 sps:$4 sm:$0xff]  }
  0x2d   :  { %800 = vmatprep.subr.bf16.mxu0 %v1705_v45  ;;  %v2236_v44 = vld [vmem:[%s2410_s2 + $0x4] ss:$8 sps:$4 sm:$0xff]  }
  0x2e   :  { %v1789_v45 = vld [vmem:[%s2406_s3 + $0xf8] ss:$12 sps:$4 sm:$0xff]  }
  0x2f   :  { %451 = vmatpush1.bf16.msra.mxu1 %v1707_v46  ;;  %v1792_v46 = vld [vmem:[%s2409_s5 + $0xf4] ss:$12 sps:$4 sm:$0xff]  }
  0x30   :  { %801 = vmatpush1.bf16.msra.mxu0 %v1708_v47  ;;  %452 = vmatprep.subr.bf16.mxu1 %v1709_v49  ;;  %v1790_v47 = vld [vmem:[%s2409_s5 + $0xf0] ss:$12 sps:$4 sm:$0xff]  }
  0x31   :  { %802 = vmatprep.subr.bf16.mxu0 %v1711_v50  ;;  %v1794_v49 = vld [vmem:[%s2406_s3 + $0x110] ss:$12 sps:$4 sm:$0xff]   ;;  %v1797_v50 = vld [vmem:[%s2409_s5 + $0x10c] ss:$12 sps:$4 sm:$0xff]  }
  0x33   :  { %453 = vmatpush1.bf16.msra.mxu1 %v1713_v52  ;;  %v1798_v52 = vld [vmem:[%s2406_s3 + $0x50] ss:$12 sps:$4 sm:$0xff]  }
  0x34   :  { %803 = vmatpush1.bf16.msra.mxu0 %v1714_v53  ;;  %454 = vmatprep.subr.bf16.mxu1 %v1715_v54  ;;  %v1799_v53 = vld [vmem:[%s2406_s3 + $0x128] ss:$12 sps:$4 sm:$0xff]   ;;  %v1802_v54 = vld [vmem:[%s2409_s5 + $0x124] ss:$12 sps:$4 sm:$0xff]  }
  0x35   :  { %804 = vmatprep.subr.bf16.mxu0 %v1717_v55  ;;  %v1800_v55 = vld [vmem:[%s2409_s5 + $0x120] ss:$12 sps:$4 sm:$0xff]  }
  0x37   :  { %455 = vmatpush1.bf16.msra.mxu1 %v1719_v56  ;;  %v1803_v56 = vld [vmem:[%s2406_s3 + $0x68] ss:$12 sps:$4 sm:$0xff]  }
  0x38   :  { %805 = vmatpush1.bf16.msra.mxu0 %v1720_v57  ;;  %456 = vmatprep.subr.bf16.mxu1 %v1721_v58  ;;  %v1804_v57 = vld [vmem:[%s2406_s3 + $0x140] ss:$12 sps:$4 sm:$0xff]   ;;  %v1807_v58 = vld [vmem:[%s2409_s5 + $0x13c] ss:$12 sps:$4 sm:$0xff]  }
  0x39   :  { %806 = vmatprep.subr.bf16.mxu0 %v1723_v59  ;;  %v1805_v59 = vld [vmem:[%s2409_s5 + $0x138] ss:$12 sps:$4 sm:$0xff]  }
  0x3b   :  { %457 = vmatpush1.bf16.msra.mxu1 %v1725_v60  ;;  %v1808_v60 = vld [vmem:[%s2406_s3 + $0x80] ss:$12 sps:$4 sm:$0xff]  }
  0x3c   :  { %807 = vmatpush1.bf16.msra.mxu0 %v1726_v61  ;;  %458 = vmatprep.subr.bf16.mxu1 %v1727_v62  ;;  %v1809_v61 = vld [vmem:[%s2406_s3 + $0x158] ss:$12 sps:$4 sm:$0xff]   ;;  %v1812_v62 = vld [vmem:[%s2409_s5 + $0x154] ss:$12 sps:$4 sm:$0xff]  }
  0x3d   :  { %808 = vmatprep.subr.bf16.mxu0 %v1729_v63  ;;  %v1810_v63 = vld [vmem:[%s2409_s5 + $0x150] ss:$12 sps:$4 sm:$0xff]  }
  0x3f   :  { %459 = vmatpush1.bf16.msra.mxu1 %v1731_v0  ;;  %v1813_v0 = vld [vmem:[%s2406_s3 + $0x98] ss:$12 sps:$4 sm:$0xff]  }
  0x40   :  { %809 = vmatpush1.bf16.msra.mxu0 %v1732_v1  ;;  %1563 = vmatprep.subr.bf16.mxu1 %v1736_v2  ;;  %v1814_v1 = vld [vmem:[%s2406_s3 + $0x170] ss:$12 sps:$4 sm:$0xff]   ;;  %v1817_v2 = vld [vmem:[%s2409_s5 + $0x16c] ss:$12 sps:$4 sm:$0xff]  }
  0x41   :  { %1194 = vmatprep.subr.bf16.mxu0 %v1742_v5  ;;  %v1818_v5 = vld [vmem:[%s2406_s3 + $0xb0] ss:$12 sps:$4 sm:$0xff]  }
  0x42   :  { %461 = vmatmul.mubr.bf16.vlgmr.msra.gmra.mrb[0].mxu1 %v2105_v3 }
  0x43   :  { %811 = vmatmul.mubr.bf16.vlgmr.msra.gmra.mrb[0].mxu0 %v2110_v4  ;;  %1564 = vmatpush3.bf16.msra.mxu1 %v1743_v7  ;;  %v1819_v7 = vld [vmem:[%s2410_s2] ss:$8 sps:$4 sm:$0xff]  }
  0x44   :  { %1195 = vmatpush1.bf16.msra.mxu0 %v1740_v6  ;;  %1565 = vmatprep.subr.bf16.mxu1 %v1744_v8  ;;  %v1822_v6 = vld [vmem:[%s2409_s5 + $0xc8] ss:$12 sps:$4 sm:$0xff]  }
  0x45   :  { %1196 = vmatprep.subr.bf16.mxu0 %v1747_v9  ;;  %503 = vmatprep.mubr.bf16.mxu1 %v2042_v48  ;;  %v1793_v48 = vld [vmem:[%s2406_s3 + $0x38] ss:$12 sps:$4 sm:$0xff]   ;;  %v1823_v8 = vld [vmem:[%s2409_s5 + $0x8] ss:$12 sps:$4 sm:$0xff]   ;;  %v1824_v9 = vld [vmem:[%s2409_s5 + $0xe0] ss:$12 sps:$4 sm:$0xff]  }
  0x46   :  { %1226 = vmatprep.mubr.bf16.mxu0 %v2236_v44 }
  0x47   :  { %1566 = vmatpush3.bf16.msra.mxu1 %v1748_v11  ;;  %v1826_v11 = vld [vmem:[%s2409_s5 + $0xf8] ss:$12 sps:$4 sm:$0xff]  }
  0x48   :  { %1197 = vmatpush1.bf16.msra.mxu0 %v1745_v10  ;;  %1567 = vmatprep.subr.bf16.mxu1 %v1749_v12  ;;  %v1825_v10 = vld [vmem:[%s2409_s5 + $0x20] ss:$12 sps:$4 sm:$0xff]   ;;  %v1827_v12 = vld [vmem:[%s2409_s5 + $0x38] ss:$12 sps:$4 sm:$0xff]  }
  0x49   :  { %1198 = vmatprep.subr.bf16.mxu0 %v1752_v13  ;;  %v1829_v13 = vld [vmem:[%s2409_s5 + $0x50] ss:$12 sps:$4 sm:$0xff]  }
  0x4b   :  { %1568 = vmatpush3.bf16.msra.mxu1 %v1753_v15  ;;  %v1831_v15 = vld [vmem:[%s2409_s5 + $0x68] ss:$12 sps:$4 sm:$0xff]  }
  0x4c   :  { %1199 = vmatpush1.bf16.msra.mxu0 %v1750_v14  ;;  %1569 = vmatprep.subr.bf16.mxu1 %v1754_v16  ;;  %v1830_v14 = vld [vmem:[%s2409_s5 + $0x128] ss:$12 sps:$4 sm:$0xff]   ;;  %v1832_v16 = vld [vmem:[%s2409_s5 + $0x140] ss:$12 sps:$4 sm:$0xff]  }
  0x4d   :  { %1200 = vmatprep.subr.bf16.mxu0 %v1757_v17  ;;  %v1833_v17 = vld [vmem:[%s2409_s5 + $0x80] ss:$12 sps:$4 sm:$0xff]  }
  0x4f   :  { %1570 = vmatpush3.bf16.msra.mxu1 %v1758_v19  ;;  %v1835_v19 = vld [vmem:[%s2409_s5 + $0x98] ss:$12 sps:$4 sm:$0xff]  }
  0x50   :  { %1201 = vmatpush1.bf16.msra.mxu0 %v1755_v18  ;;  %1571 = vmatprep.subr.bf16.mxu1 %v1759_v20  ;;  %v1834_v18 = vld [vmem:[%s2409_s5 + $0x158] ss:$12 sps:$4 sm:$0xff]   ;;  %v1836_v20 = vld [vmem:[%s2409_s5 + $0x170] ss:$12 sps:$4 sm:$0xff]  }
  0x51   :  { %1202 = vmatprep.subr.bf16.mxu0 %v1762_v21  ;;  %v1837_v21 = vld [vmem:[%s2409_s5 + $0xb0] ss:$12 sps:$4 sm:$0xff]  }
  0x53   :  { %1572 = vmatpush3.bf16.msra.mxu1 %v1763_v23 }
  0x54   :  { %1203 = vmatpush1.bf16.msra.mxu0 %v1760_v22  ;;  %1573 = vmatprep.subr.bf16.mxu1 %v1764_v24 }
  0x55   :  { %1204 = vmatprep.subr.bf16.mxu0 %v1767_v25 }
  0x57   :  { %1574 = vmatpush3.bf16.msra.mxu1 %v1768_v27 }
  0x58   :  { %1205 = vmatpush1.bf16.msra.mxu0 %v1765_v26  ;;  %1575 = vmatprep.subr.bf16.mxu1 %v1769_v28 }
  0x59   :  { %1206 = vmatprep.subr.bf16.mxu0 %v1772_v29 }
  0x5b   :  { %1576 = vmatpush3.bf16.msra.mxu1 %v1773_v31 }
  0x5c   :  { %1207 = vmatpush1.bf16.msra.mxu0 %v1770_v30  ;;  %1577 = vmatprep.subr.bf16.mxu1 %v1774_v32  ;;  %v1286_v32 = vlaneseq }
  0x5d   :  { %1208 = vmatprep.subr.bf16.mxu0 %v1777_v33 }
  0x5e   :  { %v2365_v33 = vshrl.u32 %v1286_v32, 7 }
  0x5f   :  { %1578 = vmatpush3.bf16.msra.mxu1 %v1778_v35  ;;  %v2371_v35 = vld [vmem:[%s2411_s6] sm:$0x7] }
  0x60   :  { %1209 = vmatpush1.bf16.msra.mxu0 %v1775_v34  ;;  %1585 = vmatprep.subr.bf16.mxu1 %v1779_v36  ;;  %v1288_v34 = vsub.s32 0, %v2365_v33  ;;  %v1292_v36 = vsub.s32 1, %v2365_v33  ;;  %v1296_v32 = vsub.s32 2, %v2365_v33 }
  0x61   :  { %1210 = vmatprep.subr.bf16.mxu0 %v1782_v37 }
  0x62   :  { %504 = vmatmul.mubr.bf16.vlgmr.msra.gmra.mrb[4].mxu1 %v2105_v3  ;;  %v1815_v3 = vld [vmem:[%s2409_s5 + $0x168] ss:$12 sps:$4 sm:$0xff]   ;;  %v1289_v37 = vrot.slane %v2371_v35, %v1288_v34 }
  0x63   :  { %1586 = vmatpush3.bf16.msra.mxu1 %v1783_v39  ;;  %853 = vmatprep.mubr.bf16.mxu1 %v2054_v51  ;;  %v1795_v51 = vld [vmem:[%s2409_s5 + $0x108] ss:$12 sps:$4 sm:$0xff]  }
  0x64   :  { %1211 = vmatpush1.bf16.msra.mxu0 %v1780_v38  ;;  %1587 = vmatprep.subr.bf16.mxu1 %v1784_v40  ;;  %v1293_v40 = vrot.slane %v2371_v35, %v1292_v36 }
  0x65   :  { %1212 = vmatprep.subr.bf16.mxu0 %v1787_v41 }
  0x67   :  { %1588 = vmatpush3.bf16.msra.mxu1 %v1788_v43 }
  0x68   :  { %1213 = vmatpush1.bf16.msra.mxu0 %v1785_v42  ;;  %1589 = vmatprep.subr.bf16.mxu1 %v1789_v45 }
  0x69   :  { %1214 = vmatprep.subr.bf16.mxu0 %v1792_v46 }
  0x6b   :  { %1590 = vmatpush3.bf16.msra.mxu1 %v1793_v48 }
  0x6c   :  { %1215 = vmatpush1.bf16.msra.mxu0 %v1790_v47  ;;  %1591 = vmatprep.subr.bf16.mxu1 %v1794_v49 }
  0x6d   :  { %1216 = vmatprep.subr.bf16.mxu0 %v1797_v50 }
  0x6f   :  { %1592 = vmatpush3.bf16.msra.mxu1 %v1798_v52 }
  0x70   :  { %1217 = vmatpush1.bf16.msra.mxu0 %v1795_v51  ;;  %1593 = vmatprep.subr.bf16.mxu1 %v1799_v53 }
  0x71   :  { %1218 = vmatprep.subr.bf16.mxu0 %v1802_v54 }
  0x73   :  { %1594 = vmatpush3.bf16.msra.mxu1 %v1803_v56 }
  0x74   :  { %1219 = vmatpush1.bf16.msra.mxu0 %v1800_v55  ;;  %1595 = vmatprep.subr.bf16.mxu1 %v1804_v57 }
  0x75   :  { %1220 = vmatprep.subr.bf16.mxu0 %v1807_v58 }
  0x77   :  { %1596 = vmatpush3.bf16.msra.mxu1 %v1808_v60 }
  0x78   :  { %1221 = vmatpush1.bf16.msra.mxu0 %v1805_v59  ;;  %1597 = vmatprep.subr.bf16.mxu1 %v1809_v61 }
  0x79   :  { %1222 = vmatprep.subr.bf16.mxu0 %v1812_v62 }
  0x7b   :  { %1598 = vmatpush3.bf16.msra.mxu1 %v1813_v0 }
  0x7c   :  { %1223 = vmatpush1.bf16.msra.mxu0 %v1810_v63  ;;  %1599 = vmatprep.subr.bf16.mxu1 %v1814_v1 }
  0x7d   :  { %1224 = vmatprep.subr.bf16.mxu0 %v1817_v2 }
  0x7f   :  { %1600 = vmatpush3.bf16.msra.mxu1 %v1818_v5 }
  0x80   :  { %1225 = vmatpush1.bf16.msra.mxu0 %v1815_v3  ;;  %1607 = vmatprep.subr.bf16.mxu1 %v1822_v6 }
  0x82   :  { %854 = vmatmul.mubr.bf16.vlgmr.msra.gmra.mrb[8].mxu1 %v2110_v4  ;;  %v1828_v4 = vld [vmem:[%s2409_s5 + $0x110] ss:$12 sps:$4 sm:$0xff]  }
  0x83   :  { %1227 = vmatmul.mubr.bf16.vlgmr.msra.gmra.mrb[0].mxu0 %v1819_v7  ;;  %1608 = vmatpush3.bf16.msra.mxu1 %v1823_v8 }
  0x84   :  { %1269 = vmatprep.mubr.bf16.mxu1 %v2236_v44  ;;  %1609 = vmatprep.subr.bf16.mxu1 %v1824_v9 }
  0x87   :  { %1610 = vmatpush3.bf16.msra.mxu1 %v1825_v10 }
  0x88   :  { %1611 = vmatprep.subr.bf16.mxu1 %v1826_v11 }
  0x8b   :  { %1612 = vmatpush3.bf16.msra.mxu1 %v1827_v12 }
  0x8c   :  { %1613 = vmatprep.subr.bf16.mxu1 %v1828_v4 }
  0x8f   :  { %1614 = vmatpush3.bf16.msra.mxu1 %v1829_v13 }
  0x90   :  { %1615 = vmatprep.subr.bf16.mxu1 %v1830_v14 }
  0x93   :  { %1616 = vmatpush3.bf16.msra.mxu1 %v1831_v15 }
  0x94   :  { %1617 = vmatprep.subr.bf16.mxu1 %v1832_v16  ;;  %v1361_v16 = vld [vmem:[%s2412_s7] sm:$0xff] }
  0x97   :  { %1618 = vmatpush3.bf16.msra.mxu1 %v1833_v17 }
  0x98   :  { %1619 = vmatprep.subr.bf16.mxu1 %v1834_v18 }
  0x9b   :  { %1620 = vmatpush3.bf16.msra.mxu1 %v1835_v19 }
  0x9c   :  { %1621 = vmatprep.subr.bf16.mxu1 %v1836_v20 }
  0x9f   :  { %1622 = vmatpush3.bf16.msra.mxu1 %v1837_v21  ;;  %v1363_v21 = vld [vmem:[%s2412_s7 + $0xc] sm:$0xff] }
  0xa2   :  { %1270 = vmatmul.mubr.bf16.vlgmr.msra.gmra.mrb[12].mxu1 %v1819_v7 }
 0x115   :  { %v462_v22 = vpop.f32.mrb[0].mxu1 }
 0x116   :  { %v464_v23 = vpop.f32.mrb[1].mxu1 }
 0x117   :  { %v466_v24 = vpop.f32.mrb[2].mxu1 }
 0x118   :  { %v468_v25 = vpop.f32.mrb[3].mxu1 }
 0x135   :  { %v1579_v26 = vpop.f32.mrb[4].mxu1 }
 0x136   :  { %v1580_v27 = vpop.f32.mrb[5].mxu1 }
 0x137   :  { %v1581_v28 = vadd.f32 %v1580_v27, %v1579_v26  ;;  %v1582_v29 = vpop.f32.mrb[6].mxu1  ;;  %v1366_v27 = vunpack.c.h.bf16 %v1361_v16 }
 0x138   :  { %v1583_v30 = vpop.f32.mrb[7].mxu1 }
 0x139   :  { %v1584_v31 = vadd.f32 %v1583_v30, %v1582_v29 }
 0x155   :  { %v1601_v38 = vpop.f32.mrb[8].mxu1 }
 0x156   :  { %v1228_v39 = vpop.f32.mrb[0].mxu0  ;;  %v1602_v42 = vpop.f32.mrb[9].mxu1 }
 0x157   :  { %v1629_v41 = vadd.f32 %v1228_v39, %v462_v22  ;;  %v1230_v43 = vpop.f32.mrb[1].mxu0  ;;  %v1603_v44 = vadd.f32 %v1602_v42, %v1601_v38  ;;  %v1604_v46 = vpop.f32.mrb[10].mxu1 }
 0x158   :  { %v1630_v45 = vadd.f32 %v1230_v43, %v464_v23  ;;  %v1232_v47 = vpop.f32.mrb[2].mxu0  ;;  %v1605_v50 = vpop.f32.mrb[11].mxu1 }
 0x159   :  { %v1301_v48 = vadd.f32 %v1629_v41, %v1289_v37  ;;  %v1631_v49 = vadd.f32 %v1232_v47, %v466_v24  ;;  %v1234_v51 = vpop.f32.mrb[3].mxu0  ;;  %v2376_v52 = vadd.f32 %v1603_v44, %v1581_v28  ;;  %v1606_v54 = vadd.f32 %v1605_v50, %v1604_v46 }
 0x15a   :  { %v1302_v53 = vadd.f32 %v1630_v45, %v1293_v40  ;;  %v1632_v55 = vadd.f32 %v1234_v51, %v468_v25  ;;  %v1365_v24 = vunpack.c.l.bf16 %v1361_v16  ;;  %v1297_v46 = vrot.slane %v2371_v35, %v1296_v32 }
 0x15b   :  { %v1307_v56 = vmul.f32 %v1301_v48, %v1301_v48  ;;  %v1304_v57 = vadd.f32 %v1631_v49, %v1289_v37  ;;  %v2378_v59 = vadd.f32 %v1606_v54, %v1584_v31  ;;  %v1368_v31 = vunpack.c.l.bf16 %v1363_v21 }
 0x15c   :  { %v1308_v58 = vmul.f32 %v1302_v53, %v1302_v53  ;;  %v1305_v60 = vadd.f32 %v1632_v55, %v1293_v40  ;;  %v1369_v37 = vunpack.c.h.bf16 %v1363_v21 }
 0x15d   :  { %v1313_v61 = vmul.f32 %v1307_v56, %v1301_v48  ;;  %v1310_v62 = vmul.f32 %v1304_v57, %v1304_v57 }
 0x15e   :  { %v1314_v63 = vmul.f32 %v1308_v58, %v1302_v53  ;;  %v1311_v0 = vmul.f32 %v1305_v60, %v1305_v60 }
 0x15f   :  { %v1319_v1 = vmul.f32 0.044715, %v1313_v61  ;;  %v1316_v2 = vmul.f32 %v1310_v62, %v1304_v57 }
 0x160   :  { %v1320_v3 = vmul.f32 0.044715, %v1314_v63  ;;  %v1317_v5 = vmul.f32 %v1311_v0, %v1305_v60 }
 0x161   :  { %v1325_v6 = vadd.f32 %v1319_v1, %v1301_v48  ;;  %v1322_v7 = vmul.f32 0.044715, %v1316_v2 }
 0x162   :  { %v1326_v8 = vadd.f32 %v1320_v3, %v1302_v53  ;;  %v1323_v9 = vmul.f32 0.044715, %v1317_v5 }
 0x163   :  { %v1331_v10 = vmul.f32 0.7978846, %v1325_v6  ;;  %v1328_v11 = vadd.f32 %v1322_v7, %v1304_v57 }
 0x164   :  { %v1332_v12 = vmul.f32 0.7978846, %v1326_v8  ;;  %v1329_v4 = vadd.f32 %v1323_v9, %v1305_v60 }
 0x165   :  { %1838 = vtanh.f32 %v1331_v10  ;;  %v1334_v13 = vmul.f32 0.7978846, %v1328_v11 }
 0x166   :  { %1840 = vtanh.f32 %v1332_v12  ;;  %v1335_v14 = vmul.f32 0.7978846, %v1329_v4 }
 0x167   :  { %1842 = vtanh.f32 %v1334_v13 }
 0x168   :  { %1844 = vtanh.f32 %v1335_v14 }
 0x16f   :  { %v1839_v15 = vpop.eup %1838 }
 0x170   :  { %v1841_v17 = vpop.eup %1840  ;;  %v1343_v18 = vadd.f32 1.0, %v1839_v15 }
 0x171   :  { %v1843_v19 = vpop.eup %1842  ;;  %v1344_v20 = vadd.f32 1.0, %v1841_v17 }
 0x172   :  { %v1845_v22 = vpop.eup %1844  ;;  %v1349_v23 = vmul.f32 0.5, %v1343_v18  ;;  %v1346_v25 = vadd.f32 1.0, %v1843_v19 }
 0x173   :  { %v1350_v26 = vmul.f32 0.5, %v1344_v20  ;;  %v1347_v28 = vadd.f32 1.0, %v1845_v22 }
 0x174   :  { %v1355_v29 = vmul.f32 %v1349_v23, %v1301_v48  ;;  %v1352_v30 = vmul.f32 0.5, %v1346_v25 }
 0x175   :  { %v1356_v34 = vmul.f32 %v1350_v26, %v1302_v53  ;;  %v1353_v36 = vmul.f32 0.5, %v1347_v28  ;;  %v1623_v40 = vpop.f32.mrb[12].mxu1 }
 0x176   :  { %v1371_v38 = vadd.f32 %v1365_v24, %v1355_v29  ;;  %v1358_v39 = vmul.f32 %v1352_v30, %v1304_v57  ;;  %v1624_v43 = vpop.f32.mrb[13].mxu1 }
 0x177   :  { %v1372_v41 = vadd.f32 %v1366_v27, %v1356_v34  ;;  %v1359_v42 = vmul.f32 %v1353_v36, %v1305_v60  ;;  %v1625_v45 = vadd.f32 %v1624_v43, %v1623_v40  ;;  %v1626_v47 = vpop.f32.mrb[14].mxu1 }
 0x178   :  { %v1374_v44 = vadd.f32 %v1368_v31, %v1358_v39  ;;  %v1627_v50 = vpop.f32.mrb[15].mxu1 }
 0x179   :  { %v1559_v49 = vpack.c.bf16 %v1372_v41, %v1371_v38  ;;  %v1375_v48 = vadd.f32 %v1369_v37, %v1359_v42  ;;  %v1280_v51 = vadd.f32 %v1625_v45, %v2376_v52  ;;  %v1628_v33 = vadd.f32 %v1627_v50, %v1626_v47 }
 0x17b   :  { %1397 = vst [vmem:[%s2413_s8] sm:$0xff] %v1559_v49  ;;  %v1561_v53 = vpack.c.bf16 %v1375_v48, %v1374_v44  ;;  %v1303_v54 = vadd.f32 %v1297_v46, %v1280_v51  ;;  %v1283_v55 = vadd.f32 %v1628_v33, %v2378_v59  ;;  %v1362_v59 = vld [vmem:[%s2412_s7 + $0x8] ss:$12 sps:$4 sm:$0xff]  }
 0x17c   :  { %v1367_v7 = vunpack.c.l.bf16 %v1362_v59  ;;  %v1370_v11 = vunpack.c.h.bf16 %v1362_v59 }
 0x17d   :  { %1399 = vst [vmem:[%s2413_s8 + $0xc] sm:$0xff] %v1561_v53  ;;  %v1309_v35 = vmul.f32 %v1303_v54, %v1303_v54  ;;  %v1306_v56 = vadd.f32 %v1297_v46, %v1283_v55 }
 0x17f   :  { %v1315_v57 = vmul.f32 %v1309_v35, %v1303_v54  ;;  %v1312_v58 = vmul.f32 %v1306_v56, %v1306_v56 }
 0x181   :  { %v1321_v60 = vmul.f32 0.044715, %v1315_v57  ;;  %v1318_v61 = vmul.f32 %v1312_v58, %v1306_v56 }
 0x183   :  { %v1327_v52 = vadd.f32 %v1321_v60, %v1303_v54  ;;  %v1324_v62 = vmul.f32 0.044715, %v1318_v61 }
 0x185   :  { %v1333_v63 = vmul.f32 0.7978846, %v1327_v52  ;;  %v1330_v0 = vadd.f32 %v1324_v62, %v1306_v56 }
 0x187   :  { %1846 = vtanh.f32 %v1333_v63  ;;  %v1336_v1 = vmul.f32 0.7978846, %v1330_v0 }
 0x189   :  { %1848 = vtanh.f32 %v1336_v1 }
 0x191   :  { %v1847_v2 = vpop.eup %1846 }
 0x192   :  { %v1345_v3 = vadd.f32 1.0, %v1847_v2 }
 0x193   :  { %v1849_v5 = vpop.eup %1848 }
 0x194   :  { %v1351_v6 = vmul.f32 0.5, %v1345_v3  ;;  %v1348_v8 = vadd.f32 1.0, %v1849_v5 }
 0x196   :  { %v1357_v9 = vmul.f32 %v1351_v6, %v1303_v54  ;;  %v1354_v10 = vmul.f32 0.5, %v1348_v8 }
 0x198   :  { %v1373_v12 = vadd.f32 %v1367_v7, %v1357_v9  ;;  %v1360_v4 = vmul.f32 %v1354_v10, %v1306_v56 }
 0x19a   :  { %v1560_v13 = vpack.c.bf16 %v1373_v12, %v1373_v12  ;;  %v1376_v14 = vadd.f32 %v1370_v11, %v1360_v4 }
 0x19c   :  { %1398 = vst [vmem:[%s2413_s8 + $0x8] sm:$0xf] %v1560_v13  ;;  %v1562_v15 = vpack.c.bf16 %v1376_v14, %v1376_v14 }
 0x19e   :  { %1400 = vst [vmem:[%s2413_s8 + $0x14] sm:$0xf] %v1562_v15 }

</bundles_post_ra>
